<compile_context>
chip_gen: v7x
topology: tpu7x:2x2x1
jax: 0.10.0
libtpu: 0.0.40
codegen_flags: <defaults>
</compile_context>

<pallas_src>
import functools

import jax
import jax.numpy as jnp
from jax.experimental import pallas as pl
from jax.experimental.pallas import tpu as pltpu

KSIZE = 3


def _round_up(x, m):
    return (x + m - 1) // m * m


def _choose_m_tile(m, pref=256):
    """Largest multiple-of-16 divisor of m that is <= pref.

    Keeps at least 2 M tiles whenever m >= 32 so v7x's 2 TensorCores both get
    work; for tiny m the single full-axis block (always legal) is returned.
    """
    if m % 16 != 0:
        return m
    cap = min(pref, m // 2) if m >= 32 else min(pref, m)
    cap -= cap % 16
    for tm in range(cap, 0, -16):
        if m % tm == 0:
            return tm
    return m


# ------------------------------ Pallas kernel ------------------------------ #
def _matmul_bias_act_kernel(a_ref, w_ref, b_ref, o_ref, *, act):
    """o = act(A_tile @ W + bias); MXU matmul with f32 accumulation."""
    r = jnp.dot(a_ref[...], w_ref[...], preferred_element_type=jnp.float32)
    r = r + b_ref[...]
    if act == "relu":
        r = jnp.maximum(r, 0.0)
    elif act == "sigmoid":
        r = jax.nn.sigmoid(r)
    o_ref[...] = r.astype(o_ref.dtype)


def conv_matmul_bias_act(a, w, bias, *, n_out, act, out_dtype):
    """act(a @ w + bias)[:, :n_out] with a single pallas_call.

    a: (M, K) bf16 fused im2col patches (taps folded into K)
    w: (K, N_pad) bf16 fused weights — constant block index => DMA'd once,
       resident in VMEM across all M tiles.
    bias: (1, N_pad) f32
    """
    m, k = a.shape
    n_pad = w.shape[1]
    m_pad = _round_up(m, 8)
    if m_pad != m:                       # only the tiny latent layers hit this
        a = jnp.pad(a, ((0, m_pad - m), (0, 0)))
    tm = _choose_m_tile(m_pad)

    out = pl.pallas_call(
        functools.partial(_matmul_bias_act_kernel, act=act),
        out_shape=jax.ShapeDtypeStruct((m_pad, n_pad), out_dtype),
        grid=(m_pad // tm,),
        in_specs=[
            pl.BlockSpec((tm, k), lambda i: (i, 0)),
            pl.BlockSpec((k, n_pad), lambda i: (0, 0)),   # resident weights
            pl.BlockSpec((1, n_pad), lambda i: (0, 0)),   # resident bias
        ],
        out_specs=pl.BlockSpec((tm, n_pad), lambda i: (i, 0)),
        compiler_params=pltpu.CompilerParams(
            dimension_semantics=("parallel",)),
    )(a, w, bias)
    return out[:m, :n_out]


# -------------------------------- JAX glue --------------------------------- #
def _im2col_cl(xpad, stride, od, oh, ow):
    """xpad: (N, Dp, Hp, Wp, C) channel-last -> (N*od*oh*ow, 27*C).

    Column order (kd, kh, kw, ci) — matches the prepared weight flattening.
    """
    cols = []
    for kd in range(KSIZE):
        for kh in range(KSIZE):
            for kw in range(KSIZE):
                sl = xpad[:,
                          kd:kd + (od - 1) * stride + 1:stride,
                          kh:kh + (oh - 1) * stride + 1:stride,
                          kw:kw + (ow - 1) * stride + 1:stride,
                          :]
                cols.append(sl)
    p = jnp.stack(cols, axis=4)                  # (N, od, oh, ow, 27, C)
    return p.reshape(xpad.shape[0] * od * oh * ow, KSIZE ** 3 * xpad.shape[-1])


def _dilate_cl(x, s):
    if s == 1:
        return x
    n, d, h, w, c = x.shape
    out = jnp.zeros((n, (d - 1) * s + 1, (h - 1) * s + 1, (w - 1) * s + 1, c),
                    x.dtype)
    return out.at[:, ::s, ::s, ::s, :].set(x)


def conv4d_layer(x, arrs, meta, *, act, out_dtype):
    """x: (B, T, D, H, W, C) channel-last.  Returns (B, T_out, OD, OH, OW, Cout)."""
    B, T, D, H, W, C = x.shape
    stride, pad, output_padding = 2, 1, 1
    transposed = meta["transposed"]
    cout = meta["cout"]
    ktap = KSIZE ** 3 * C
    ktap_pad = _round_up(ktap, 128)

    ts = [t for t in range(0, T, stride) if t + 2 < T]
    if ts:
        # tap j of output frame f uses input frame f*stride + j (strided slice);
        # the 1/3 averaging is folded into w3/b3.
        F = len(ts)
        tap_frames = [x[:, j:(F - 1) * stride + j + 1:stride] for j in range(3)]
        w_mat, bias = arrs["w3"], arrs["b3"]
    else:
        # PyTorch fallback: only conv_t1 on frame 0, no averaging.
        F = 1
        tap_frames = [x[:, 0:1]]
        w_mat, bias = arrs["w1"], arrs["b1"]

    if not transposed:
        OD = (D + 2 * pad - KSIZE) // stride + 1
        OH = (H + 2 * pad - KSIZE) // stride + 1
        OW = (W + 2 * pad - KSIZE) // stride + 1
    else:
        OD = (D - 1) * stride - 2 * pad + KSIZE + output_padding
        OH = (H - 1) * stride - 2 * pad + KSIZE + output_padding
        OW = (W - 1) * stride - 2 * pad + KSIZE + output_padding

    lo = KSIZE - 1 - pad
    hi = KSIZE - 1 - pad + output_padding

    # Build A directly in the fused (M, taps*Ktap_pad) layout.
    a_cols = []
    for xf in tap_frames:
        xf = xf.reshape(B * F, D, H, W, C)
        if not transposed:
            xpad = jnp.pad(xf, ((0, 0), (pad, pad), (pad, pad), (pad, pad), (0, 0)))
            patches = _im2col_cl(xpad, stride, OD, OH, OW)
        else:
            xd = _dilate_cl(xf, stride)
            xpad = jnp.pad(xd, ((0, 0), (lo, hi), (lo, hi), (lo, hi), (0, 0)))
            patches = _im2col_cl(xpad, 1, OD, OH, OW)
        if ktap_pad != ktap:
            patches = jnp.pad(patches, ((0, 0), (0, ktap_pad - ktap)))
        a_cols.append(patches)
    A = a_cols[0] if len(a_cols) == 1 else jnp.concatenate(a_cols, axis=1)

    out = conv_matmul_bias_act(A, w_mat, bias, n_out=cout, act=act,
                               out_dtype=out_dtype)
    return out.reshape(B, F, OD, OH, OW, cout)


# ------------------------- one-time weight preparation ---------------------- #
def _prepare_layer(layer_params, *, transposed):
    """Raw PyTorch-layout weights -> matmul-ready fused bf16 matrices.

    Returns (arrays, meta):
      arrays: w3 (3*Ktap_pad, N_pad) bf16 with 1/3 folded, b3 (1, N_pad) f32,
              w1/b1 single-tap fallback variants.
      meta:   static python metadata (kept OUT of the jit pytree).
    """
    w_list = [jnp.asarray(p[0], jnp.float32) for p in layer_params]
    b_list = [jnp.asarray(p[1], jnp.float32) for p in layer_params]
    if not transposed:
        cout, cin = int(w_list[0].shape[0]), int(w_list[0].shape[1])
        # (Cout, Cin, kd, kh, kw) -> (kd, kh, kw, Cin, Cout) -> (27*Cin, Cout)
        mats = [jnp.transpose(w, (2, 3, 4, 1, 0)).reshape(KSIZE ** 3 * cin, cout)
                for w in w_list]
    else:
        cin, cout = int(w_list[0].shape[0]), int(w_list[0].shape[1])
        # ConvTranspose3d weight (Cin, Cout, 3,3,3) -> equivalent conv weight
        mats = [jnp.transpose(jnp.flip(w, axis=(2, 3, 4)),
                              (2, 3, 4, 0, 1)).reshape(KSIZE ** 3 * cin, cout)
                for w in w_list]

    ktap = KSIZE ** 3 * cin
    ktap_pad = _round_up(ktap, 128)
    n_pad = _round_up(cout, 128)

    def pad_mat(m):  # (ktap, cout) -> (ktap_pad, n_pad), zero rows/cols
        return jnp.pad(m, ((0, ktap_pad - ktap), (0, n_pad - cout)))

    w3 = (jnp.concatenate([pad_mat(m) for m in mats], axis=0)
          / 3.0).astype(jnp.bfloat16)
    b3 = jnp.pad((b_list[0] + b_list[1] + b_list[2]) / 3.0,
                 (0, n_pad - cout)).reshape(1, n_pad).astype(jnp.float32)
    w1 = pad_mat(mats[0]).astype(jnp.bfloat16)
    b1 = jnp.pad(b_list[0], (0, n_pad - cout)).reshape(1, n_pad).astype(jnp.float32)

    arrays = dict(w3=w3, b3=b3, w1=w1, b1=b1)
    meta = dict(transposed=transposed, cout=cout)
    return arrays, meta


def prepare_params(params):
    arrays, meta = [], []
    for lp in params["enc"]:
        a, m = _prepare_layer(lp, transposed=False)
        arrays.append(a)
        meta.append(m)
    for lp in params["dec"]:
        a, m = _prepare_layer(lp, transposed=True)
        arrays.append(a)
        meta.append(m)
    return arrays, meta


# ----------------------------- params / forward ---------------------------- #
def init_params(key, in_channels=4):
    enc_cfg = [(in_channels, 64), (64, 32), (32, 16)]
    dec_cfg = [(16, 32), (32, 64), (64, in_channels)]
    params = {"enc": [], "dec": []}
    for cin, cout in enc_cfg:
        layer = []
        for _ in range(3):
            key, k1, k2 = jax.random.split(key, 3)
            bound = 1.0 / (cin * KSIZE ** 3) ** 0.5
            w = jax.random.uniform(k1, (cout, cin, KSIZE, KSIZE, KSIZE),
                                   jnp.float32, -bound, bound)
            b = jax.random.uniform(k2, (cout,), jnp.float32, -bound, bound)
            layer.append((w, b))
        params["enc"].append(tuple(layer))
    for cin, cout in dec_cfg:
        layer = []
        for _ in range(3):
            key, k1, k2 = jax.random.split(key, 3)
            bound = 1.0 / (cin * KSIZE ** 3) ** 0.5
            w = jax.random.uniform(k1, (cin, cout, KSIZE, KSIZE, KSIZE),
                                   jnp.float32, -bound, bound)
            b = jax.random.uniform(k2, (cout,), jnp.float32, -bound, bound)
            layer.append((w, b))
        params["dec"].append(tuple(layer))
    return params


def autoencoder4d_forward(prep_arrays, x, *, meta):
    """x: (B, C, T, D, H, W) float32 (PyTorch layout)."""
    # Channel-last + bf16 once for the whole network (no per-layer transposes).
    x = jnp.transpose(x, (0, 2, 3, 4, 5, 1)).astype(jnp.bfloat16)
    n_layers = len(meta)
    for i, (arrs, m) in enumerate(zip(prep_arrays, meta)):
        last = i == n_layers - 1
        x = conv4d_layer(x, arrs, m,
                         act="sigmoid" if last else "relu",
                         out_dtype=jnp.float32 if last else jnp.bfloat16)
    return jnp.transpose(x, (0, 5, 1, 2, 3, 4))    # back to (B, C, T, D, H, W)


if __name__ == "__main__":
    key = jax.random.PRNGKey(0)
    pkey, xkey = jax.random.split(key)
    params = init_params(pkey, in_channels=4)
    # One-time weight prep (out of the jitted hot path).
    prep_arrays, prep_meta = prepare_params(params)

    # Small shapes consistent with the module: (B, C, T, D, H, W)
    x = jax.random.uniform(xkey, (1, 4, 8, 8, 8, 8), dtype=jnp.float32)

    fwd = jax.jit(functools.partial(autoencoder4d_forward, meta=prep_meta))
    y = fwd(prep_arrays, x)
    jax.block_until_ready(y)

    # Encoder: T 8->3->1->1, spatial 8->4->2->1; decoder: T stays 1, spatial 1->2->4->8.
    assert y.shape == (1, 4, 1, 8, 8, 8), y.shape
    assert bool(jnp.all(jnp.isfinite(y)))
    print("KERNEL_OK")
</pallas_src>

<mosaic_0001>
module attributes {stable_mosaic.version = 11 : i64} {
  func.func @_matmul_bias_act_kernel(%arg0: i32, %arg1: memref<96x384xbf16, #tpu.memory_space<vmem>>, %arg2: memref<384x128xbf16, #tpu.memory_space<vmem>>, %arg3: memref<1x128xf32, #tpu.memory_space<vmem>>, %arg4: memref<96x128xbf16, #tpu.memory_space<vmem>>) attributes {dimension_semantics = [#tpu.dimension_semantics<parallel>], iteration_bounds = array<i64: 2>, scalar_prefetch = 0 : i64, scratch_operands = 0 : i64, tpu.core_type = #tpu.core_type<tc>, window_params = [{transform_indices = @transform_0, window_bounds = array<i64: 96, 384>}, {pipeline_mode = #tpu.pipeline_mode<synchronous>, transform_indices = @transform_1, window_bounds = array<i64: 384, 128>}, {pipeline_mode = #tpu.pipeline_mode<synchronous>, transform_indices = @transform_2, window_bounds = array<i64: 1, 128>}, {transform_indices = @transform_3, window_bounds = array<i64: 96, 128>}]} {
    %c0 = arith.constant 0 : index
    %c0_0 = arith.constant 0 : index
    %0 = vector.load %arg1[%c0, %c0_0] : memref<96x384xbf16, #tpu.memory_space<vmem>>, vector<96x384xbf16>
    %c0_1 = arith.constant 0 : index
    %c0_2 = arith.constant 0 : index
    %1 = vector.load %arg2[%c0_1, %c0_2] : memref<384x128xbf16, #tpu.memory_space<vmem>>, vector<384x128xbf16>
    %cst = arith.constant dense<0.000000e+00> : vector<96x128xf32>
    %2 = tpu.matmul %0, %1, %cst {dimension_numbers = #tpu.dot_dimension_numbers<[1], [0], [0], [1], [0, 0, 1, 1], [], []>} : vector<96x384xbf16>, vector<384x128xbf16>, vector<96x128xf32> -> vector<96x128xf32>
    %c0_3 = arith.constant 0 : index
    %c0_4 = arith.constant 0 : index
    %3 = vector.load %arg3[%c0_3, %c0_4] : memref<1x128xf32, #tpu.memory_space<vmem>>, vector<1x128xf32>
    %4 = vector.broadcast %3 : vector<1x128xf32> to vector<96x128xf32>
    %5 = arith.addf %2, %4 : vector<96x128xf32>
    %cst_5 = arith.constant 0.000000e+00 : f32
    %6 = vector.broadcast %cst_5 : f32 to vector<96x128xf32>
    %7 = arith.maximumf %5, %6 : vector<96x128xf32>
    %8 = arith.truncf %7 : vector<96x128xf32> to vector<96x128xbf16>
    %c0_6 = arith.constant 0 : index
    %c0_7 = arith.constant 0 : index
    %9 = vector.load %arg4[%c0_6, %c0_7] : memref<96x128xbf16, #tpu.memory_space<vmem>>, vector<96x128xbf16>
    tpu.vector_store %arg4[%c0_6, %c0_7], %8 {strides = array<i32>} : memref<96x128xbf16, #tpu.memory_space<vmem>>, vector<96x128xbf16>,
    return
  }
  func.func @transform_0(%arg0: i32) -> (i32, i32) {
    %c0_i32 = arith.constant 0 : i32
    %c0_i32_0 = arith.constant 0 : i32
    return %arg0, %c0_i32 : i32, i32
  }
  func.func @transform_1(%arg0: i32) -> (i32, i32) {
    %c0_i32 = arith.constant 0 : i32
    %c0_i32_0 = arith.constant 0 : i32
    %c0_i32_1 = arith.constant 0 : i32
    return %c0_i32, %c0_i32_0 : i32, i32
  }
  func.func @transform_2(%arg0: i32) -> (i32, i32) {
    %c0_i32 = arith.constant 0 : i32
    %c0_i32_0 = arith.constant 0 : i32
    %c0_i32_1 = arith.constant 0 : i32
    return %c0_i32, %c0_i32_0 : i32, i32
  }
  func.func @transform_3(%arg0: i32) -> (i32, i32) {
    %c0_i32 = arith.constant 0 : i32
    %c0_i32_0 = arith.constant 0 : i32
    return %arg0, %c0_i32 : i32, i32
  }
}

module attributes {stable_mosaic.version = 11 : i64} {
  func.func @_matmul_bias_act_kernel(%arg0: i32, %arg1: memref<8x5376xbf16, #tpu.memory_space<vmem>>, %arg2: memref<5376x128xbf16, #tpu.memory_space<vmem>>, %arg3: memref<1x128xf32, #tpu.memory_space<vmem>>, %arg4: memref<8x128xbf16, #tpu.memory_space<vmem>>) attributes {dimension_semantics = [#tpu.dimension_semantics<parallel>], iteration_bounds = array<i64: 1>, scalar_prefetch = 0 : i64, scratch_operands = 0 : i64, tpu.core_type = #tpu.core_type<tc>, window_params = [{transform_indices = @transform_0, window_bounds = array<i64: 8, 5376>}, {pipeline_mode = #tpu.pipeline_mode<synchronous>, transform_indices = @transform_1, window_bounds = array<i64: 5376, 128>}, {pipeline_mode = #tpu.pipeline_mode<synchronous>, transform_indices = @transform_2, window_bounds = array<i64: 1, 128>}, {transform_indices = @transform_3, window_bounds = array<i64: 8, 128>}]} {
    %c0 = arith.constant 0 : index
    %c0_0 = arith.constant 0 : index
    %0 = vector.load %arg1[%c0, %c0_0] : memref<8x5376xbf16, #tpu.memory_space<vmem>>, vector<8x5376xbf16>
    %c0_1 = arith.constant 0 : index
    %c0_2 = arith.constant 0 : index
    %1 = vector.load %arg2[%c0_1, %c0_2] : memref<5376x128xbf16, #tpu.memory_space<vmem>>, vector<5376x128xbf16>
    %cst = arith.constant dense<0.000000e+00> : vector<8x128xf32>
    %2 = tpu.matmul %0, %1, %cst {dimension_numbers = #tpu.dot_dimension_numbers<[1], [0], [0], [1], [0, 0, 1, 1], [], []>} : vector<8x5376xbf16>, vector<5376x128xbf16>, vector<8x128xf32> -> vector<8x128xf32>
    %c0_3 = arith.constant 0 : index
    %c0_4 = arith.constant 0 : index
    %3 = vector.load %arg3[%c0_3, %c0_4] : memref<1x128xf32, #tpu.memory_space<vmem>>, vector<1x128xf32>
    %4 = vector.broadcast %3 : vector<1x128xf32> to vector<8x128xf32>
    %5 = arith.addf %2, %4 : vector<8x128xf32>
    %cst_5 = arith.constant 0.000000e+00 : f32
    %6 = vector.broadcast %cst_5 : f32 to vector<8x128xf32>
    %7 = arith.maximumf %5, %6 : vector<8x128xf32>
    %8 = arith.truncf %7 : vector<8x128xf32> to vector<8x128xbf16>
    %c0_6 = arith.constant 0 : index
    %c0_7 = arith.constant 0 : index
    %9 = vector.load %arg4[%c0_6, %c0_7] : memref<8x128xbf16, #tpu.memory_space<vmem>>, vector<8x128xbf16>
    tpu.vector_store %arg4[%c0_6, %c0_7], %8 {strides = array<i32>} : memref<8x128xbf16, #tpu.memory_space<vmem>>, vector<8x128xbf16>,
    return
  }
  func.func @transform_0(%arg0: i32) -> (i32, i32) {
    %c0_i32 = arith.constant 0 : i32
    %c0_i32_0 = arith.constant 0 : i32
    return %arg0, %c0_i32 : i32, i32
  }
  func.func @transform_1(%arg0: i32) -> (i32, i32) {
    %c0_i32 = arith.constant 0 : i32
    %c0_i32_0 = arith.constant 0 : i32
    %c0_i32_1 = arith.constant 0 : i32
    return %c0_i32, %c0_i32_0 : i32, i32
  }
  func.func @transform_2(%arg0: i32) -> (i32, i32) {
    %c0_i32 = arith.constant 0 : i32
    %c0_i32_0 = arith.constant 0 : i32
    %c0_i32_1 = arith.constant 0 : i32
    return %c0_i32, %c0_i32_0 : i32, i32
  }
  func.func @transform_3(%arg0: i32) -> (i32, i32) {
    %c0_i32 = arith.constant 0 : i32
    %c0_i32_0 = arith.constant 0 : i32
    return %arg0, %c0_i32 : i32, i32
  }
}

module attributes {stable_mosaic.version = 11 : i64} {
  func.func @_matmul_bias_act_kernel(%arg0: i32, %arg1: memref<8x896xbf16, #tpu.memory_space<vmem>>, %arg2: memref<896x128xbf16, #tpu.memory_space<vmem>>, %arg3: memref<1x128xf32, #tpu.memory_space<vmem>>, %arg4: memref<8x128xbf16, #tpu.memory_space<vmem>>) attributes {dimension_semantics = [#tpu.dimension_semantics<parallel>], iteration_bounds = array<i64: 1>, scalar_prefetch = 0 : i64, scratch_operands = 0 : i64, tpu.core_type = #tpu.core_type<tc>, window_params = [{transform_indices = @transform_0, window_bounds = array<i64: 8, 896>}, {pipeline_mode = #tpu.pipeline_mode<synchronous>, transform_indices = @transform_1, window_bounds = array<i64: 896, 128>}, {pipeline_mode = #tpu.pipeline_mode<synchronous>, transform_indices = @transform_2, window_bounds = array<i64: 1, 128>}, {transform_indices = @transform_3, window_bounds = array<i64: 8, 128>}]} {
    %c0 = arith.constant 0 : index
    %c0_0 = arith.constant 0 : index
    %0 = vector.load %arg1[%c0, %c0_0] : memref<8x896xbf16, #tpu.memory_space<vmem>>, vector<8x896xbf16>
    %c0_1 = arith.constant 0 : index
    %c0_2 = arith.constant 0 : index
    %1 = vector.load %arg2[%c0_1, %c0_2] : memref<896x128xbf16, #tpu.memory_space<vmem>>, vector<896x128xbf16>
    %cst = arith.constant dense<0.000000e+00> : vector<8x128xf32>
    %2 = tpu.matmul %0, %1, %cst {dimension_numbers = #tpu.dot_dimension_numbers<[1], [0], [0], [1], [0, 0, 1, 1], [], []>} : vector<8x896xbf16>, vector<896x128xbf16>, vector<8x128xf32> -> vector<8x128xf32>
    %c0_3 = arith.constant 0 : index
    %c0_4 = arith.constant 0 : index
    %3 = vector.load %arg3[%c0_3, %c0_4] : memref<1x128xf32, #tpu.memory_space<vmem>>, vector<1x128xf32>
    %4 = vector.broadcast %3 : vector<1x128xf32> to vector<8x128xf32>
    %5 = arith.addf %2, %4 : vector<8x128xf32>
    %cst_5 = arith.constant 0.000000e+00 : f32
    %6 = vector.broadcast %cst_5 : f32 to vector<8x128xf32>
    %7 = arith.maximumf %5, %6 : vector<8x128xf32>
    %8 = arith.truncf %7 : vector<8x128xf32> to vector<8x128xbf16>
    %c0_6 = arith.constant 0 : index
    %c0_7 = arith.constant 0 : index
    %9 = vector.load %arg4[%c0_6, %c0_7] : memref<8x128xbf16, #tpu.memory_space<vmem>>, vector<8x128xbf16>
    tpu.vector_store %arg4[%c0_6, %c0_7], %8 {strides = array<i32>} : memref<8x128xbf16, #tpu.memory_space<vmem>>, vector<8x128xbf16>,
    return
  }
  func.func @transform_0(%arg0: i32) -> (i32, i32) {
    %c0_i32 = arith.constant 0 : i32
    %c0_i32_0 = arith.constant 0 : i32
    return %arg0, %c0_i32 : i32, i32
  }
  func.func @transform_1(%arg0: i32) -> (i32, i32) {
    %c0_i32 = arith.constant 0 : i32
    %c0_i32_0 = arith.constant 0 : i32
    %c0_i32_1 = arith.constant 0 : i32
    return %c0_i32, %c0_i32_0 : i32, i32
  }
  func.func @transform_2(%arg0: i32) -> (i32, i32) {
    %c0_i32 = arith.constant 0 : i32
    %c0_i32_0 = arith.constant 0 : i32
    %c0_i32_1 = arith.constant 0 : i32
    return %c0_i32, %c0_i32_0 : i32, i32
  }
  func.func @transform_3(%arg0: i32) -> (i32, i32) {
    %c0_i32 = arith.constant 0 : i32
    %c0_i32_0 = arith.constant 0 : i32
    return %arg0, %c0_i32 : i32, i32
  }
}

module attributes {stable_mosaic.version = 11 : i64} {
  func.func @_matmul_bias_act_kernel(%arg0: i32, %arg1: memref<8x512xbf16, #tpu.memory_space<vmem>>, %arg2: memref<512x128xbf16, #tpu.memory_space<vmem>>, %arg3: memref<1x128xf32, #tpu.memory_space<vmem>>, %arg4: memref<8x128xbf16, #tpu.memory_space<vmem>>) attributes {dimension_semantics = [#tpu.dimension_semantics<parallel>], iteration_bounds = array<i64: 1>, scalar_prefetch = 0 : i64, scratch_operands = 0 : i64, tpu.core_type = #tpu.core_type<tc>, window_params = [{transform_indices = @transform_0, window_bounds = array<i64: 8, 512>}, {pipeline_mode = #tpu.pipeline_mode<synchronous>, transform_indices = @transform_1, window_bounds = array<i64: 512, 128>}, {pipeline_mode = #tpu.pipeline_mode<synchronous>, transform_indices = @transform_2, window_bounds = array<i64: 1, 128>}, {transform_indices = @transform_3, window_bounds = array<i64: 8, 128>}]} {
    %c0 = arith.constant 0 : index
    %c0_0 = arith.constant 0 : index
    %0 = vector.load %arg1[%c0, %c0_0] : memref<8x512xbf16, #tpu.memory_space<vmem>>, vector<8x512xbf16>
    %c0_1 = arith.constant 0 : index
    %c0_2 = arith.constant 0 : index
    %1 = vector.load %arg2[%c0_1, %c0_2] : memref<512x128xbf16, #tpu.memory_space<vmem>>, vector<512x128xbf16>
    %cst = arith.constant dense<0.000000e+00> : vector<8x128xf32>
    %2 = tpu.matmul %0, %1, %cst {dimension_numbers = #tpu.dot_dimension_numbers<[1], [0], [0], [1], [0, 0, 1, 1], [], []>} : vector<8x512xbf16>, vector<512x128xbf16>, vector<8x128xf32> -> vector<8x128xf32>
    %c0_3 = arith.constant 0 : index
    %c0_4 = arith.constant 0 : index
    %3 = vector.load %arg3[%c0_3, %c0_4] : memref<1x128xf32, #tpu.memory_space<vmem>>, vector<1x128xf32>
    %4 = vector.broadcast %3 : vector<1x128xf32> to vector<8x128xf32>
    %5 = arith.addf %2, %4 : vector<8x128xf32>
    %cst_5 = arith.constant 0.000000e+00 : f32
    %6 = vector.broadcast %cst_5 : f32 to vector<8x128xf32>
    %7 = arith.maximumf %5, %6 : vector<8x128xf32>
    %8 = arith.truncf %7 : vector<8x128xf32> to vector<8x128xbf16>
    %c0_6 = arith.constant 0 : index
    %c0_7 = arith.constant 0 : index
    %9 = vector.load %arg4[%c0_6, %c0_7] : memref<8x128xbf16, #tpu.memory_space<vmem>>, vector<8x128xbf16>
    tpu.vector_store %arg4[%c0_6, %c0_7], %8 {strides = array<i32>} : memref<8x128xbf16, #tpu.memory_space<vmem>>, vector<8x128xbf16>,
    return
  }
  func.func @transform_0(%arg0: i32) -> (i32, i32) {
    %c0_i32 = arith.constant 0 : i32
    %c0_i32_0 = arith.constant 0 : i32
    return %arg0, %c0_i32 : i32, i32
  }
  func.func @transform_1(%arg0: i32) -> (i32, i32) {
    %c0_i32 = arith.constant 0 : i32
    %c0_i32_0 = arith.constant 0 : i32
    %c0_i32_1 = arith.constant 0 : i32
    return %c0_i32, %c0_i32_0 : i32, i32
  }
  func.func @transform_2(%arg0: i32) -> (i32, i32) {
    %c0_i32 = arith.constant 0 : i32
    %c0_i32_0 = arith.constant 0 : i32
    %c0_i32_1 = arith.constant 0 : i32
    return %c0_i32, %c0_i32_0 : i32, i32
  }
  func.func @transform_3(%arg0: i32) -> (i32, i32) {
    %c0_i32 = arith.constant 0 : i32
    %c0_i32_0 = arith.constant 0 : i32
    return %arg0, %c0_i32 : i32, i32
  }
}

module attributes {stable_mosaic.version = 11 : i64} {
  func.func @_matmul_bias_act_kernel(%arg0: i32, %arg1: memref<32x896xbf16, #tpu.memory_space<vmem>>, %arg2: memref<896x128xbf16, #tpu.memory_space<vmem>>, %arg3: memref<1x128xf32, #tpu.memory_space<vmem>>, %arg4: memref<32x128xbf16, #tpu.memory_space<vmem>>) attributes {dimension_semantics = [#tpu.dimension_semantics<parallel>], iteration_bounds = array<i64: 2>, scalar_prefetch = 0 : i64, scratch_operands = 0 : i64, tpu.core_type = #tpu.core_type<tc>, window_params = [{transform_indices = @transform_0, window_bounds = array<i64: 32, 896>}, {pipeline_mode = #tpu.pipeline_mode<synchronous>, transform_indices = @transform_1, window_bounds = array<i64: 896, 128>}, {pipeline_mode = #tpu.pipeline_mode<synchronous>, transform_indices = @transform_2, window_bounds = array<i64: 1, 128>}, {transform_indices = @transform_3, window_bounds = array<i64: 32, 128>}]} {
    %c0 = arith.constant 0 : index
    %c0_0 = arith.constant 0 : index
    %0 = vector.load %arg1[%c0, %c0_0] : memref<32x896xbf16, #tpu.memory_space<vmem>>, vector<32x896xbf16>
    %c0_1 = arith.constant 0 : index
    %c0_2 = arith.constant 0 : index
    %1 = vector.load %arg2[%c0_1, %c0_2] : memref<896x128xbf16, #tpu.memory_space<vmem>>, vector<896x128xbf16>
    %cst = arith.constant dense<0.000000e+00> : vector<32x128xf32>
    %2 = tpu.matmul %0, %1, %cst {dimension_numbers = #tpu.dot_dimension_numbers<[1], [0], [0], [1], [0, 0, 1, 1], [], []>} : vector<32x896xbf16>, vector<896x128xbf16>, vector<32x128xf32> -> vector<32x128xf32>
    %c0_3 = arith.constant 0 : index
    %c0_4 = arith.constant 0 : index
    %3 = vector.load %arg3[%c0_3, %c0_4] : memref<1x128xf32, #tpu.memory_space<vmem>>, vector<1x128xf32>
    %4 = vector.broadcast %3 : vector<1x128xf32> to vector<32x128xf32>
    %5 = arith.addf %2, %4 : vector<32x128xf32>
    %cst_5 = arith.constant 0.000000e+00 : f32
    %6 = vector.broadcast %cst_5 : f32 to vector<32x128xf32>
    %7 = arith.maximumf %5, %6 : vector<32x128xf32>
    %8 = arith.truncf %7 : vector<32x128xf32> to vector<32x128xbf16>
    %c0_6 = arith.constant 0 : index
    %c0_7 = arith.constant 0 : index
    %9 = vector.load %arg4[%c0_6, %c0_7] : memref<32x128xbf16, #tpu.memory_space<vmem>>, vector<32x128xbf16>
    tpu.vector_store %arg4[%c0_6, %c0_7], %8 {strides = array<i32>} : memref<32x128xbf16, #tpu.memory_space<vmem>>, vector<32x128xbf16>,
    return
  }
  func.func @transform_0(%arg0: i32) -> (i32, i32) {
    %c0_i32 = arith.constant 0 : i32
    %c0_i32_0 = arith.constant 0 : i32
    return %arg0, %c0_i32 : i32, i32
  }
  func.func @transform_1(%arg0: i32) -> (i32, i32) {
    %c0_i32 = arith.constant 0 : i32
    %c0_i32_0 = arith.constant 0 : i32
    %c0_i32_1 = arith.constant 0 : i32
    return %c0_i32, %c0_i32_0 : i32, i32
  }
  func.func @transform_2(%arg0: i32) -> (i32, i32) {
    %c0_i32 = arith.constant 0 : i32
    %c0_i32_0 = arith.constant 0 : i32
    %c0_i32_1 = arith.constant 0 : i32
    return %c0_i32, %c0_i32_0 : i32, i32
  }
  func.func @transform_3(%arg0: i32) -> (i32, i32) {
    %c0_i32 = arith.constant 0 : i32
    %c0_i32_0 = arith.constant 0 : i32
    return %arg0, %c0_i32 : i32, i32
  }
}

module attributes {stable_mosaic.version = 11 : i64} {
  func.func @_matmul_bias_act_kernel(%arg0: i32, %arg1: memref<256x1792xbf16, #tpu.memory_space<vmem>>, %arg2: memref<1792x128xbf16, #tpu.memory_space<vmem>>, %arg3: memref<1x128xf32, #tpu.memory_space<vmem>>, %arg4: memref<256x128xf32, #tpu.memory_space<vmem>>) attributes {dimension_semantics = [#tpu.dimension_semantics<parallel>], iteration_bounds = array<i64: 2>, scalar_prefetch = 0 : i64, scratch_operands = 0 : i64, tpu.core_type = #tpu.core_type<tc>, window_params = [{transform_indices = @transform_0, window_bounds = array<i64: 256, 1792>}, {pipeline_mode = #tpu.pipeline_mode<synchronous>, transform_indices = @transform_1, window_bounds = array<i64: 1792, 128>}, {pipeline_mode = #tpu.pipeline_mode<synchronous>, transform_indices = @transform_2, window_bounds = array<i64: 1, 128>}, {transform_indices = @transform_3, window_bounds = array<i64: 256, 128>}]} {
    %c0 = arith.constant 0 : index
    %c0_0 = arith.constant 0 : index
    %0 = vector.load %arg1[%c0, %c0_0] : memref<256x1792xbf16, #tpu.memory_space<vmem>>, vector<256x1792xbf16>
    %c0_1 = arith.constant 0 : index
    %c0_2 = arith.constant 0 : index
    %1 = vector.load %arg2[%c0_1, %c0_2] : memref<1792x128xbf16, #tpu.memory_space<vmem>>, vector<1792x128xbf16>
    %cst = arith.constant dense<0.000000e+00> : vector<256x128xf32>
    %2 = tpu.matmul %0, %1, %cst {dimension_numbers = #tpu.dot_dimension_numbers<[1], [0], [0], [1], [0, 0, 1, 1], [], []>} : vector<256x1792xbf16>, vector<1792x128xbf16>, vector<256x128xf32> -> vector<256x128xf32>
    %c0_3 = arith.constant 0 : index
    %c0_4 = arith.constant 0 : index
    %3 = vector.load %arg3[%c0_3, %c0_4] : memref<1x128xf32, #tpu.memory_space<vmem>>, vector<1x128xf32>
    %4 = vector.broadcast %3 : vector<1x128xf32> to vector<256x128xf32>
    %5 = arith.addf %2, %4 : vector<256x128xf32>
    %6 = arith.negf %5 : vector<256x128xf32>
    %7 = math.exp %6 : vector<256x128xf32>
    %cst_5 = arith.constant 1.000000e+00 : f32
    %8 = vector.broadcast %cst_5 : f32 to vector<256x128xf32>
    %9 = arith.addf %8, %7 : vector<256x128xf32>
    %10 = arith.divf %8, %9 : vector<256x128xf32>
    %c0_6 = arith.constant 0 : index
    %c0_7 = arith.constant 0 : index
    %11 = vector.load %arg4[%c0_6, %c0_7] : memref<256x128xf32, #tpu.memory_space<vmem>>, vector<256x128xf32>
    tpu.vector_store %arg4[%c0_6, %c0_7], %10 {strides = array<i32>} : memref<256x128xf32, #tpu.memory_space<vmem>>, vector<256x128xf32>,
    return
  }
  func.func @transform_0(%arg0: i32) -> (i32, i32) {
    %c0_i32 = arith.constant 0 : i32
    %c0_i32_0 = arith.constant 0 : i32
    return %arg0, %c0_i32 : i32, i32
  }
  func.func @transform_1(%arg0: i32) -> (i32, i32) {
    %c0_i32 = arith.constant 0 : i32
    %c0_i32_0 = arith.constant 0 : i32
    %c0_i32_1 = arith.constant 0 : i32
    return %c0_i32, %c0_i32_0 : i32, i32
  }
  func.func @transform_2(%arg0: i32) -> (i32, i32) {
    %c0_i32 = arith.constant 0 : i32
    %c0_i32_0 = arith.constant 0 : i32
    %c0_i32_1 = arith.constant 0 : i32
    return %c0_i32, %c0_i32_0 : i32, i32
  }
  func.func @transform_3(%arg0: i32) -> (i32, i32) {
    %c0_i32 = arith.constant 0 : i32
    %c0_i32_0 = arith.constant 0 : i32
    return %arg0, %c0_i32 : i32, i32
  }
}

</mosaic_0001>

<bundles_post_ra>
// kernel: autoencoder4d_forward.6
= control target key start
LH: loop header
LB: loop body
LE: loop exit
PB: predicated region body
PF: predicated region fallthrough
CT: control target
= control target key end

     0   :  { %s1077_s12 = smov 0   ;;  %s1215_s0 = inlined_call_operand.vmem [shape: bf16[192,384], index: 0, kind: input, shape index: {}]   ;;  %s1216_s1 = inlined_call_operand.vmem [shape: bf16[384,128], index: 1, kind: input, shape index: {}]   ;;  %s1217_s2 = inlined_call_operand.vmem [shape: f32[1,128], index: 2, kind: input, shape index: {}]   ;;  %s1218_s3 = inlined_call_operand.vmem [shape: bf16[192,128], index: 3, kind: output, shape index: {}]  }
   0x1 LB: > { %s787_s13 = sadd.s32 4294967295, %s1055_s12   ;;  %p791_p0 = scmp.ge.s32.totalorder %s1055_s12, 1  ;;  %s1055_s12 = sphi %s1077_s12, %s13_s12  }
   0x2   : > { %p139_p1 = scmp.lt.s32.totalorder %s1055_s12, 3 }
   0x4   : > { %p140_p2 = pnand %p791_p0, %p139_p1 }
   0x5   : > { %v1001_v0 = vld [vmem:[%s1216_s1 + $0x40] sm:$0xff] (!%p140_p2)   ;;  %v1003_v2 = vld [vmem:[%s1216_s1 + $0x48] sm:$0xff] (!%p140_p2)   ;;  %v1006_v5 = vld [vmem:[%s1216_s1 + $0x50] sm:$0xff] (!%p140_p2)   ;;  %s164_s26 = smul.u32 (!%p140_p2), 12, %s787_s13 }
   0x6   : > { %143 = sbr.rel (%p140_p2) target bundleno = 304 (0x130), region = 32  ;;  %v1002_v1 = vld [vmem:[%s1216_s1] sm:$0xff] (!%p140_p2)   ;;  %898 = vmatprep.subr.bf16.mxu0 (!%p140_p2), %v1001_v0  ;;  %v1005_v4 = vld [vmem:[%s1216_s1 + $0x8] sm:$0xff] (!%p140_p2)   ;;  %v1008_v7 = vld [vmem:[%s1216_s1 + $0x10] sm:$0xff] (!%p140_p2)  }
   0x7   : > { %899 = vmatpush3.bf16.msra.mxu0 (!%p140_p2), %v1002_v1  ;;  %v1004_v3 = vld [vmem:[%s1216_s1 + $0x80] sm:$0xff] (!%p140_p2)   ;;  %v1007_v6 = vld [vmem:[%s1216_s1 + $0x88] sm:$0xff] (!%p140_p2)   ;;  %v1009_v8 = vld [vmem:[%s1216_s1 + $0x58] sm:$0xff] (!%p140_p2)   ;;  %p165_p3 = scmp.lt.s32.totalorder (!%p140_p2), %s164_s26, 23 }
   0x8   : > { %900 = vmatprep.subr.bf16.mxu0 (!%p140_p2), %v1003_v2  ;;  %964 = vmatprep.subr.bf16.mxu1 (!%p140_p2), %v1004_v3  ;;  %v1010_v9 = vld [vmem:[%s1216_s1 + $0x90] sm:$0xff] (!%p140_p2)   ;;  %v1011_v10 = vld [vmem:[%s1216_s1 + $0x18] sm:$0xff] (!%p140_p2)   ;;  %v1012_v11 = vld [vmem:[%s1216_s1 + $0x60] sm:$0xff] (!%p140_p2)  }
   0x9   : > { %965 = vmatpush3.bf16.msra.mxu1 (!%p140_p2), %v1004_v3  ;;  %v1013_v12 = vld [vmem:[%s1216_s1 + $0x98] sm:$0xff] (!%p140_p2)   ;;  %v1014_v13 = vld [vmem:[%s1216_s1 + $0x20] sm:$0xff] (!%p140_p2)   ;;  %v1015_v15 = vld [vmem:[%s1216_s1 + $0x68] sm:$0xff] (!%p140_p2)  }
   0xa   : > { %966 = vmatprep.subr.bf16.mxu1 (!%p140_p2), %v1007_v6  ;;  %v1016_v14 = vld [vmem:[%s1216_s1 + $0xa0] sm:$0xff] (!%p140_p2)   ;;  %v1017_v16 = vld [vmem:[%s1216_s1 + $0x28] sm:$0xff] (!%p140_p2)   ;;  %v1018_v18 = vld [vmem:[%s1216_s1 + $0x70] sm:$0xff] (!%p140_p2)  }
   0xb   : > { %901 = vmatpush3.bf16.msra.mxu0 (!%p140_p2), %v1005_v4  ;;  %v1019_v17 = vld [vmem:[%s1216_s1 + $0xa8] sm:$0xff] (!%p140_p2)   ;;  %v1020_v19 = vld [vmem:[%s1216_s1 + $0x30] sm:$0xff] (!%p140_p2)   ;;  %v1021_v20 = vld [vmem:[%s1216_s1 + $0x78] sm:$0xff] (!%p140_p2)  }
   0xc   : > { %902 = vmatprep.subr.bf16.mxu0 (!%p140_p2), %v1006_v5  ;;  %v1022_v21 = vld [vmem:[%s1216_s1 + $0xb0] sm:$0xff] (!%p140_p2)   ;;  %v1023_v23 = vld [vmem:[%s1216_s1 + $0x38] sm:$0xff] (!%p140_p2)   ;;  %v1186_v44 = vld [vmem:[%s1217_s2] ss:$0 sm:$0xff] (!%p140_p2) }
   0xd   : > { %967 = vmatpush3.bf16.msra.mxu1 %v1007_v6  ;;  %s1220_s26 = smov (!%p165_p3, %s164_s26), 23  ;;  %v1027_v25 = vld [vmem:[%s1216_s1 + $0xb8] sm:$0xff]  }
   0xe   : > { %968 = vmatprep.subr.bf16.mxu1 %v1010_v9  ;;  %s992_s21 = smul.u32 12, %s1220_s26  ;;  %s793_s18 = sshll.u32 %s1220_s26, 2 }
   0xf   : > { %903 = vmatpush3.bf16.msra.mxu0 %v1008_v7 }
  0x10   : > { %904 = vmatprep.subr.bf16.mxu0 %v1009_v8  ;;  %s1151_s6 = scalar_lea.vmem %s1215_s0, %s992_s21  ;;  %s1194_s21 = scalar_lea.vmem %s1218_s3, %s793_s18 }
  0x11   : > { %969 = vmatpush3.bf16.msra.mxu1 %v1010_v9  ;;  %v1026_v22 = vld [vmem:[%s1151_s6 + $0x4] ss:$12 sps:$4 sm:$0xff]   ;;  %v1028_v24 = vld [vmem:[%s1151_s6 + $0x8] ss:$12 sps:$4 sm:$0xff]   ;;  %v1024_v26 = vld [vmem:[%s1151_s6] ss:$12 sps:$4 sm:$0xff]  }
  0x12   : > { %970 = vmatprep.subr.bf16.mxu1 %v1013_v12  ;;  %529 = vmatprep.mubr.bf16.mxu0 %v1026_v22  ;;  %v1030_v27 = vld [vmem:[%s1151_s6 + $0x1c] ss:$12 sps:$4 sm:$0xff]   ;;  %v1029_v28 = vld [vmem:[%s1151_s6 + $0x20] ss:$12 sps:$4 sm:$0xff]   ;;  %v1036_v29 = vld [vmem:[%s1151_s6 + $0x38] ss:$12 sps:$4 sm:$0xff]  }
  0x13   : > { %905 = vmatpush3.bf16.msra.mxu0 %v1011_v10  ;;  %980 = vmatprep.mubr.bf16.mxu1 %v1028_v24  ;;  %v1032_v30 = vld [vmem:[%s1151_s6 + $0x18] ss:$12 sps:$4 sm:$0xff]   ;;  %v1033_v31 = vld [vmem:[%s1151_s6 + $0x34] ss:$12 sps:$4 sm:$0xff]   ;;  %v1037_v32 = vld [vmem:[%s1151_s6 + $0x50] ss:$12 sps:$4 sm:$0xff]  }
  0x14   : > { %906 = vmatprep.subr.bf16.mxu0 %v1012_v11  ;;  %v1044_v33 = vld [vmem:[%s1151_s6 + $0x68] ss:$12 sps:$4 sm:$0xff]   ;;  %v1035_v34 = vld [vmem:[%s1151_s6 + $0x30] ss:$12 sps:$4 sm:$0xff]   ;;  %v1038_v35 = vld [vmem:[%s1151_s6 + $0x4c] ss:$12 sps:$4 sm:$0xff]  }
  0x15   : > { %971 = vmatpush3.bf16.msra.mxu1 %v1013_v12  ;;  %v1045_v36 = vld [vmem:[%s1151_s6 + $0x80] ss:$12 sps:$4 sm:$0xff]   ;;  %v1040_v37 = vld [vmem:[%s1151_s6 + $0x48] ss:$12 sps:$4 sm:$0xff]   ;;  %v1041_v38 = vld [vmem:[%s1151_s6 + $0x64] ss:$12 sps:$4 sm:$0xff]  }
  0x16   : > { %972 = vmatprep.subr.bf16.mxu1 %v1016_v14  ;;  %v1043_v39 = vld [vmem:[%s1151_s6 + $0x60] ss:$12 sps:$4 sm:$0xff]   ;;  %v1046_v40 = vld [vmem:[%s1151_s6 + $0x7c] ss:$12 sps:$4 sm:$0xff]   ;;  %v1048_v41 = vld [vmem:[%s1151_s6 + $0x78] ss:$12 sps:$4 sm:$0xff]  }
  0x17   : > { %907 = vmatpush3.bf16.msra.mxu0 %v1014_v13 }
  0x18   : > { %908 = vmatprep.subr.bf16.mxu0 %v1015_v15 }
  0x19   : > { %973 = vmatpush3.bf16.msra.mxu1 %v1016_v14 }
  0x1a   : > { %974 = vmatprep.subr.bf16.mxu1 %v1019_v17 }
  0x1b   : > { %909 = vmatpush3.bf16.msra.mxu0 %v1017_v16 }
  0x1c   : > { %910 = vmatprep.subr.bf16.mxu0 %v1018_v18 }
  0x1d   : > { %975 = vmatpush3.bf16.msra.mxu1 %v1019_v17 }
  0x1e   : > { %976 = vmatprep.subr.bf16.mxu1 %v1022_v21 }
  0x1f   : > { %911 = vmatpush3.bf16.msra.mxu0 %v1020_v19 }
  0x20   : > { %912 = vmatprep.subr.bf16.mxu0 %v1021_v20 }
  0x21   : > { %977 = vmatpush3.bf16.msra.mxu1 %v1022_v21 }
  0x22   : > { %978 = vmatprep.subr.bf16.mxu1 %v1027_v25 }
  0x23   : > { %913 = vmatpush3.bf16.msra.mxu0 %v1023_v23 }
  0x25   : > { %979 = vmatpush3.bf16.msra.mxu1 %v1027_v25 }
  0x26   : > { %530 = vmatmul.mubr.bf16.vlgmr.msra.gmra.mrb[0].mxu0 %v1024_v26 }
  0x27   : > { %537 = vmatprep.mubr.bf16.mxu0 %v1030_v27 }
  0x28   : > { %981 = vmatmul.mubr.bf16.vlgmr.msra.gmra.mrb[0].mxu1 %v1029_v28 }
  0x29   : > { %984 = vmatprep.mubr.bf16.mxu1 %v1036_v29 }
  0x2e   : > { %538 = vmatmul.mubr.bf16.gmra.mrb[4].mxu0 %v1032_v30 }
  0x2f   : > { %545 = vmatprep.mubr.bf16.mxu0 %v1033_v31 }
  0x30   : > { %985 = vmatmul.mubr.bf16.gmra.mrb[4].mxu1 %v1037_v32 }
  0x31   : > { %988 = vmatprep.mubr.bf16.mxu1 %v1044_v33 }
  0x36   : > { %546 = vmatmul.mubr.bf16.gmra.mrb[8].mxu0 %v1035_v34 }
  0x37   : > { %553 = vmatprep.mubr.bf16.mxu0 %v1038_v35 }
  0x38   : > { %989 = vmatmul.mubr.bf16.gmra.mrb[8].mxu1 %v1045_v36 }
  0x3e   : > { %554 = vmatmul.mubr.bf16.gmra.mrb[12].mxu0 %v1040_v37 }
  0x3f   : > { %561 = vmatprep.mubr.bf16.mxu0 %v1041_v38 }
  0x46   : > { %562 = vmatmul.mubr.bf16.gmra.mrb[16].mxu0 %v1043_v39 }
  0x47   : > { %569 = vmatprep.mubr.bf16.mxu0 %v1046_v40 }
  0x4e   : > { %570 = vmatmul.mubr.bf16.gmra.mrb[20].mxu0 %v1048_v41 }
  0xf9   : > { %v914_v42 = vpop.f32.mrb[0].mxu0 }
  0xfa   : > { %v915_v43 = vpop.f32.mrb[1].mxu0 }
  0xfb   : > { %v916_v45 = vadd.f32 %v915_v43, %v914_v42  ;;  %v917_v46 = vpop.f32.mrb[2].mxu0  ;;  %v982_v48 = vpop.f32.mrb[0].mxu1 }
  0xfc   : > { %v918_v47 = vpop.f32.mrb[3].mxu0  ;;  %v612_v51 = vpop.f32.mrb[1].mxu1 }
  0xfd   : > { %v919_v49 = vadd.f32 %v918_v47, %v917_v46  ;;  %v532_v50 = vadd.f32 %v916_v45, %v1186_v44  ;;  %v983_v52 = vpop.f32.mrb[2].mxu1 }
  0xfe   : > { %v615_v55 = vpop.f32.mrb[3].mxu1 }
  0xff   : > { %v613_v53 = vadd.f32 %v612_v51, %v532_v50  ;;  %v535_v54 = vadd.f32 %v919_v49, %v1186_v44 }
 0x101   : > { %v616_v56 = vadd.f32 %v615_v55, %v535_v54  ;;  %v920_v57 = vpop.f32.mrb[4].mxu0  ;;  %v659_v59 = vmax.f32 %v613_v53, 0.0 }
 0x102   : > { %v921_v58 = vpop.f32.mrb[5].mxu0 }
 0x103   : > { %v660_v60 = vmax.f32 %v616_v56, 0.0  ;;  %v922_v61 = vadd.f32 %v921_v58, %v920_v57  ;;  %v923_v62 = vpop.f32.mrb[6].mxu0  ;;  %v986_v0 = vpop.f32.mrb[4].mxu1 }
 0x104   : > { %v924_v63 = vpop.f32.mrb[7].mxu0  ;;  %v628_v4 = vpop.f32.mrb[5].mxu1 }
 0x105   : > { %v866_v1 = vpack.c.bf16 %v660_v60, %v659_v59  ;;  %v540_v2 = vadd.f32 %v922_v61, %v1186_v44  ;;  %v925_v3 = vadd.f32 %v924_v63, %v923_v62  ;;  %v987_v5 = vpop.f32.mrb[6].mxu1 }
 0x106   : > { %v631_v8 = vpop.f32.mrb[7].mxu1 }
 0x107   : > { %867 = vst [vmem:[%s1194_s21] sm:$0xff] %v866_v1   ;;  %v621_v6 = vadd.f32 %v982_v48, %v540_v2  ;;  %v543_v7 = vadd.f32 %v925_v3, %v1186_v44 }
 0x109   : > { %v624_v9 = vadd.f32 %v983_v52, %v543_v7  ;;  %v926_v10 = vpop.f32.mrb[8].mxu0  ;;  %v661_v12 = vmax.f32 %v621_v6, 0.0 }
 0x10a   : > { %v927_v11 = vpop.f32.mrb[9].mxu0 }
 0x10b   : > { %v662_v13 = vmax.f32 %v624_v9, 0.0  ;;  %v928_v14 = vadd.f32 %v927_v11, %v926_v10  ;;  %v929_v15 = vpop.f32.mrb[10].mxu0  ;;  %v990_v17 = vpop.f32.mrb[8].mxu1 }
 0x10c   : > { %v930_v16 = vpop.f32.mrb[11].mxu0  ;;  %v644_v21 = vpop.f32.mrb[9].mxu1 }
 0x10d   : > { %v871_v18 = vpack.c.bf16 %v662_v13, %v661_v12  ;;  %v931_v19 = vadd.f32 %v930_v16, %v929_v15  ;;  %v548_v20 = vadd.f32 %v928_v14, %v1186_v44  ;;  %v991_v22 = vpop.f32.mrb[10].mxu1 }
 0x10e   : > { %v647_v25 = vpop.f32.mrb[11].mxu1 }
 0x10f   : > { %893 = vst [vmem:[%s1194_s21 + $0x8] sm:$0xff] %v871_v18   ;;  %v629_v23 = vadd.f32 %v628_v4, %v548_v20  ;;  %v551_v24 = vadd.f32 %v931_v19, %v1186_v44 }
 0x111   : > { %v632_v26 = vadd.f32 %v631_v8, %v551_v24  ;;  %v932_v27 = vpop.f32.mrb[12].mxu0  ;;  %v663_v29 = vmax.f32 %v629_v23, 0.0 }
 0x112   : > { %v933_v28 = vpop.f32.mrb[13].mxu0 }
 0x113   : > { %v664_v30 = vmax.f32 %v632_v26, 0.0  ;;  %v934_v31 = vadd.f32 %v933_v28, %v932_v27  ;;  %v935_v32 = vpop.f32.mrb[14].mxu0 }
 0x114   : > { %v936_v33 = vpop.f32.mrb[15].mxu0 }
 0x115   : > { %v876_v34 = vpack.c.bf16 %v664_v30, %v663_v29  ;;  %v556_v35 = vadd.f32 %v934_v31, %v1186_v44  ;;  %v937_v36 = vadd.f32 %v936_v33, %v935_v32 }
 0x117   : > { %894 = vst [vmem:[%s1194_s21 + $0x10] sm:$0xff] %v876_v34   ;;  %v637_v37 = vadd.f32 %v986_v0, %v556_v35  ;;  %v559_v38 = vadd.f32 %v937_v36, %v1186_v44 }
 0x119   : > { %v640_v39 = vadd.f32 %v987_v5, %v559_v38  ;;  %v938_v40 = vpop.f32.mrb[16].mxu0  ;;  %v665_v42 = vmax.f32 %v637_v37, 0.0 }
 0x11a   : > { %v939_v41 = vpop.f32.mrb[17].mxu0 }
 0x11b   : > { %v666_v43 = vmax.f32 %v640_v39, 0.0  ;;  %v940_v45 = vadd.f32 %v939_v41, %v938_v40  ;;  %v941_v46 = vpop.f32.mrb[18].mxu0 }
 0x11c   : > { %v942_v47 = vpop.f32.mrb[19].mxu0 }
 0x11d   : > { %v881_v48 = vpack.c.bf16 %v666_v43, %v665_v42  ;;  %v943_v49 = vadd.f32 %v942_v47, %v941_v46  ;;  %v564_v50 = vadd.f32 %v940_v45, %v1186_v44 }
 0x11f   : > { %895 = vst [vmem:[%s1194_s21 + $0x18] sm:$0xff] %v881_v48   ;;  %v645_v51 = vadd.f32 %v644_v21, %v564_v50  ;;  %v567_v52 = vadd.f32 %v943_v49, %v1186_v44 }
 0x121   : > { %v648_v53 = vadd.f32 %v647_v25, %v567_v52  ;;  %v944_v54 = vpop.f32.mrb[20].mxu0  ;;  %v667_v56 = vmax.f32 %v645_v51, 0.0 }
 0x122   : > { %v945_v55 = vpop.f32.mrb[21].mxu0 }
 0x123   : > { %v668_v57 = vmax.f32 %v648_v53, 0.0  ;;  %v946_v58 = vadd.f32 %v945_v55, %v944_v54  ;;  %v947_v59 = vpop.f32.mrb[22].mxu0 }
 0x124   : > { %v948_v60 = vpop.f32.mrb[23].mxu0 }
 0x125   : > { %v886_v61 = vpack.c.bf16 %v668_v57, %v667_v56  ;;  %v572_v62 = vadd.f32 %v946_v58, %v1186_v44  ;;  %v949_v63 = vadd.f32 %v948_v60, %v947_v59 }
 0x127   : > { %896 = vst [vmem:[%s1194_s21 + $0x20] sm:$0xff] %v886_v61   ;;  %v653_v0 = vadd.f32 %v990_v17, %v572_v62  ;;  %v575_v1 = vadd.f32 %v949_v63, %v1186_v44 }
 0x129   : > { %v656_v2 = vadd.f32 %v991_v22, %v575_v1  ;;  %v669_v3 = vmax.f32 %v653_v0, 0.0 }
 0x12b   : > { %v670_v4 = vmax.f32 %v656_v2, 0.0 }
 0x12d   : > { %v891_v5 = vpack.c.bf16 %v670_v4, %v669_v3 }
 0x12f   : > { %897 = vst [vmem:[%s1194_s21 + $0x28] sm:$0xff] %v891_v5  }
 0x130 PF: > { %s13_s12 = sadd.s32 1, %s1055_s12  }
 0x131   : > { %p10_p4 = scmp.ge.s32.totalorder %s13_s12, 4  }
 0x133   :  { %12 = sbr.rel (!%p10_p4) target bundleno = 1 (0x1), region = 62 }

// kernel: autoencoder4d_forward.8
= control target key start
LH: loop header
LB: loop body
LE: loop exit
PB: predicated region body
PF: predicated region fallthrough
CT: control target
= control target key end

     0   :  { %v890_v42 = vmov 0.0   ;;  %vm891_vm0 = vmmov 0   ;;  %s1098_s1 = inlined_call_operand.vmem [shape: bf16[896,128], index: 1, kind: input, shape index: {}]   ;;  %s1099_s0 = inlined_call_operand.vmem [shape: bf16[8,896], index: 0, kind: input, shape index: {}]   ;;  %s1100_s2 = inlined_call_operand.vmem [shape: f32[1,128], index: 2, kind: input, shape index: {}]   ;;  %s1101_s3 = inlined_call_operand.vmem [shape: bf16[8,128], index: 3, kind: output, shape index: {}]  }
   0x1   :  { %v827_v0 = vld [vmem:[%s1098_s1 + $0x40] sm:$0xff]   ;;  %v831_v4 = vld [vmem:[%s1098_s1 + $0x48] sm:$0xff]   ;;  %v835_v8 = vld [vmem:[%s1098_s1 + $0x50] sm:$0xff]  }
   0x2   :  { %v828_v1 = vld [vmem:[%s1098_s1] sm:$0xff]   ;;  %730 = vmatprep.subr.bf16.mxu0 %v827_v0  ;;  %v832_v5 = vld [vmem:[%s1098_s1 + $0x8] sm:$0xff]   ;;  %v836_v9 = vld [vmem:[%s1098_s1 + $0x10] sm:$0xff]  }
   0x3   :  { %v829_v2 = vld [vmem:[%s1098_s1 + $0xc0] sm:$0xff]   ;;  %731 = vmatpush3.bf16.msra.mxu0 %v828_v1  ;;  %v833_v6 = vld [vmem:[%s1098_s1 + $0xc8] sm:$0xff]   ;;  %v837_v10 = vld [vmem:[%s1098_s1 + $0xd0] sm:$0xff]  }
   0x4   :  { %v830_v3 = vld [vmem:[%s1098_s1 + $0x80] sm:$0xff]   ;;  %752 = vmatprep.subr.bf16.mxu1 %v829_v2  ;;  %732 = vmatprep.subr.bf16.mxu0 %v831_v4  ;;  %v834_v7 = vld [vmem:[%s1098_s1 + $0x88] sm:$0xff]   ;;  %v838_v11 = vld [vmem:[%s1098_s1 + $0x90] sm:$0xff]  }
   0x5   :  { %753 = vmatpush3.bf16.msra.mxu1 %v830_v3  ;;  %v839_v12 = vld [vmem:[%s1098_s1 + $0x58] sm:$0xff]   ;;  %v843_v16 = vld [vmem:[%s1098_s1 + $0x60] sm:$0xff]   ;;  %v847_v20 = vld [vmem:[%s1098_s1 + $0x68] sm:$0xff]  }
   0x6   :  { %754 = vmatprep.subr.bf16.mxu1 %v833_v6  ;;  %v840_v13 = vld [vmem:[%s1098_s1 + $0x18] sm:$0xff]   ;;  %v844_v17 = vld [vmem:[%s1098_s1 + $0x20] sm:$0xff]   ;;  %v848_v21 = vld [vmem:[%s1098_s1 + $0x28] sm:$0xff]  }
   0x7   :  { %733 = vmatpush3.bf16.msra.mxu0 %v832_v5  ;;  %v841_v14 = vld [vmem:[%s1098_s1 + $0xd8] sm:$0xff]   ;;  %v845_v18 = vld [vmem:[%s1098_s1 + $0xe0] sm:$0xff]   ;;  %v849_v22 = vld [vmem:[%s1098_s1 + $0xe8] sm:$0xff]  }
   0x8   :  { %734 = vmatprep.subr.bf16.mxu0 %v835_v8  ;;  %v842_v15 = vld [vmem:[%s1098_s1 + $0x98] sm:$0xff]   ;;  %v846_v19 = vld [vmem:[%s1098_s1 + $0xa0] sm:$0xff]   ;;  %v850_v23 = vld [vmem:[%s1098_s1 + $0xa8] sm:$0xff]  }
   0x9   :  { %755 = vmatpush3.bf16.msra.mxu1 %v834_v7  ;;  %v851_v24 = vld [vmem:[%s1098_s1 + $0x70] sm:$0xff]   ;;  %v855_v28 = vld [vmem:[%s1098_s1 + $0x78] sm:$0xff]   ;;  %v15_v31 = vld [vmem:[%s1099_s0] sm:$0xff] }
   0xa   :  { %756 = vmatprep.subr.bf16.mxu1 %v837_v10  ;;  %v852_v25 = vld [vmem:[%s1098_s1 + $0x30] sm:$0xff]   ;;  %v856_v29 = vld [vmem:[%s1098_s1 + $0x38] sm:$0xff]   ;;  %v667_v32 = vcombine.low %v15_v31, %v15_v31  ;;  %v668_v33 = vcombine.high %v15_v31, %v15_v31  ;;  %v861_v35 = vld [vmem:[%s1098_s1 + $0x140] sm:$0xff]  }
   0xb   :  { %735 = vmatpush3.bf16.msra.mxu0 %v836_v9  ;;  %v853_v26 = vld [vmem:[%s1098_s1 + $0xf0] sm:$0xff]   ;;  %v857_v30 = vld [vmem:[%s1098_s1 + $0xf8] sm:$0xff]   ;;  %v16_v36 = vld [vmem:[%s1099_s0 + $0x8] sm:$0xff] }
   0xc   :  { %736 = vmatprep.subr.bf16.mxu0 %v839_v12  ;;  %v854_v27 = vld [vmem:[%s1098_s1 + $0xb0] sm:$0xff]   ;;  %v860_v34 = vld [vmem:[%s1098_s1 + $0xb8] sm:$0xff]   ;;  %531 = vmatprep.mubr.bf16.mxu0 %v668_v33  ;;  %v669_v37 = vcombine.low %v16_v36, %v16_v36  ;;  %v670_v38 = vcombine.high %v16_v36, %v16_v36  ;;  %v864_v39 = vld [vmem:[%s1098_s1 + $0x100] sm:$0xff]  }
   0xd   :  { %757 = vmatpush3.bf16.msra.mxu1 %v838_v11  ;;  %v865_v40 = vld [vmem:[%s1098_s1 + $0x180] sm:$0xff]   ;;  %v866_v41 = vld [vmem:[%s1098_s1 + $0x148] sm:$0xff]   ;;  %v869_v45 = vld [vmem:[%s1098_s1 + $0x150] sm:$0xff]  }
   0xe   :  { %758 = vmatprep.subr.bf16.mxu1 %v841_v14  ;;  %571 = vmatprep.mubr.bf16.mxu1 %v670_v38  ;;  %v867_v43 = vld [vmem:[%s1098_s1 + $0x108] sm:$0xff]   ;;  %v870_v46 = vld [vmem:[%s1098_s1 + $0x110] sm:$0xff]   ;;  %v872_v48 = vld [vmem:[%s1098_s1 + $0x158] sm:$0xff]  }
   0xf   :  { %737 = vmatpush3.bf16.msra.mxu0 %v840_v13  ;;  %v868_v44 = vld [vmem:[%s1098_s1 + $0x188] sm:$0xff]   ;;  %v871_v47 = vld [vmem:[%s1098_s1 + $0x190] sm:$0xff]   ;;  %v873_v49 = vld [vmem:[%s1098_s1 + $0x118] sm:$0xff]  }
  0x10   :  { %738 = vmatprep.subr.bf16.mxu0 %v843_v16  ;;  %v875_v50 = vld [vmem:[%s1098_s1 + $0x160] sm:$0xff]   ;;  %v874_v51 = vld [vmem:[%s1098_s1 + $0x198] sm:$0xff]   ;;  %v878_v53 = vld [vmem:[%s1098_s1 + $0x168] sm:$0xff]  }
  0x11   :  { %759 = vmatpush3.bf16.msra.mxu1 %v842_v15  ;;  %v876_v52 = vld [vmem:[%s1098_s1 + $0x120] sm:$0xff]   ;;  %v879_v55 = vld [vmem:[%s1098_s1 + $0x128] sm:$0xff]   ;;  %v881_v56 = vld [vmem:[%s1098_s1 + $0x170] sm:$0xff]  }
  0x12   :  { %760 = vmatprep.subr.bf16.mxu1 %v845_v18  ;;  %v877_v54 = vld [vmem:[%s1098_s1 + $0x1a0] sm:$0xff]   ;;  %v880_v57 = vld [vmem:[%s1098_s1 + $0x1a8] sm:$0xff]   ;;  %v17_v58 = vld [vmem:[%s1099_s0 + $0x10] sm:$0xff] }
  0x13   :  { %739 = vmatpush3.bf16.msra.mxu0 %v844_v17  ;;  %v882_v59 = vld [vmem:[%s1098_s1 + $0x130] sm:$0xff]   ;;  %v672_v60 = vcombine.high %v17_v58, %v17_v58  ;;  %v884_v61 = vld [vmem:[%s1098_s1 + $0x178] sm:$0xff]   ;;  %v671_v1 = vcombine.low %v17_v58, %v17_v58  ;;  %v666_v4 = vld [vmem:[%s1100_s2] ss:$0 sm:$0xff] }
  0x14   :  { %740 = vmatprep.subr.bf16.mxu0 %v847_v20  ;;  %v883_v62 = vld [vmem:[%s1098_s1 + $0x1b0] sm:$0xff]   ;;  %v885_v63 = vld [vmem:[%s1098_s1 + $0x138] sm:$0xff]  }
  0x15   :  { %761 = vmatpush3.bf16.msra.mxu1 %v846_v19  ;;  %v888_v0 = vld [vmem:[%s1098_s1 + $0x1b8] sm:$0xff]  }
  0x16   :  { %762 = vmatprep.subr.bf16.mxu1 %v849_v22  ;;  %v889_v2 = vld [vmem:[%s1099_s0 + $0x18] ss:$0 sps:$4 sm:$0xff]  }
  0x17   :  { %741 = vmatpush3.bf16.msra.mxu0 %v848_v21 }
  0x18   :  { %742 = vmatprep.subr.bf16.mxu0 %v851_v24 }
  0x19   :  { %763 = vmatpush3.bf16.msra.mxu1 %v850_v23 }
  0x1a   :  { %764 = vmatprep.subr.bf16.mxu1 %v853_v26 }
  0x1b   :  { %743 = vmatpush3.bf16.msra.mxu0 %v852_v25 }
  0x1c   :  { %744 = vmatprep.subr.bf16.mxu0 %v855_v28 }
  0x1d   :  { %765 = vmatpush3.bf16.msra.mxu1 %v854_v27 }
  0x1e   :  { %766 = vmatprep.subr.bf16.mxu1 %v857_v30 }
  0x1f   :  { %745 = vmatpush3.bf16.msra.mxu0 %v856_v29 }
  0x20   :  { %774 = vmatprep.subr.bf16.mxu0 %v861_v35 }
  0x21   :  { %767 = vmatpush3.bf16.msra.mxu1 %v860_v34 }
  0x22   :  { %532 = vmatmul.mubr.bf16.vlgmr.msra.gmra.mrb[0].mxu0 %v667_v32  ;;  %805 = vmatprep.subr.bf16.mxu1 %v890_v42 }
  0x23   :  { %775 = vmatpush3.bf16.msra.mxu0 %v864_v39  ;;  %611 = vmatprep.mubr.bf16.mxu0 %v672_v60 }
  0x24   :  { %572 = vmatmul.mubr.bf16.vlgmr.msra.gmra.mrb[0].mxu1 %v669_v37  ;;  %776 = vmatprep.subr.bf16.mxu0 %v866_v41 }
  0x25   :  { %806 = vmatpush3.bf16.msra.mxu1 %v865_v40  ;;  %821 = vmatprep.mubr.msk.bf16.mxu1 %vm891_vm0, %v890_v42 }
  0x26   :  { %807 = vmatprep.subr.bf16.mxu1 %v890_v42 }
  0x27   :  { %777 = vmatpush3.bf16.msra.mxu0 %v867_v43 }
  0x28   :  { %778 = vmatprep.subr.bf16.mxu0 %v869_v45 }
  0x29   :  { %808 = vmatpush3.bf16.msra.mxu1 %v868_v44 }
  0x2a   :  { %809 = vmatprep.subr.bf16.mxu1 %v890_v42 }
  0x2b   :  { %779 = vmatpush3.bf16.msra.mxu0 %v870_v46 }
  0x2c   :  { %780 = vmatprep.subr.bf16.mxu0 %v872_v48 }
  0x2d   :  { %810 = vmatpush3.bf16.msra.mxu1 %v871_v47 }
  0x2e   :  { %811 = vmatprep.subr.bf16.mxu1 %v890_v42 }
  0x2f   :  { %781 = vmatpush3.bf16.msra.mxu0 %v873_v49 }
  0x30   :  { %782 = vmatprep.subr.bf16.mxu0 %v875_v50 }
  0x31   :  { %812 = vmatpush3.bf16.msra.mxu1 %v874_v51 }
  0x32   :  { %813 = vmatprep.subr.bf16.mxu1 %v890_v42 }
  0x33   :  { %783 = vmatpush3.bf16.msra.mxu0 %v876_v52 }
  0x34   :  { %784 = vmatprep.subr.bf16.mxu0 %v878_v53 }
  0x35   :  { %814 = vmatpush3.bf16.msra.mxu1 %v877_v54 }
  0x36   :  { %815 = vmatprep.subr.bf16.mxu1 %v890_v42 }
  0x37   :  { %785 = vmatpush3.bf16.msra.mxu0 %v879_v55 }
  0x38   :  { %786 = vmatprep.subr.bf16.mxu0 %v881_v56 }
  0x39   :  { %816 = vmatpush3.bf16.msra.mxu1 %v880_v57 }
  0x3a   :  { %817 = vmatprep.subr.bf16.mxu1 %v890_v42 }
  0x3b   :  { %787 = vmatpush3.bf16.msra.mxu0 %v882_v59 }
  0x3c   :  { %788 = vmatprep.subr.bf16.mxu0 %v884_v61 }
  0x3d   :  { %818 = vmatpush3.bf16.msra.mxu1 %v883_v62 }
  0x3e   :  { %819 = vmatprep.subr.bf16.mxu1 %v890_v42 }
  0x3f   :  { %789 = vmatpush3.bf16.msra.mxu0 %v885_v63 }
  0x41   :  { %820 = vmatpush3.bf16.msra.mxu1 %v888_v0 }
  0x42   :  { %612 = vmatmul.mubr.bf16.vlgmr.msra.gmra.mrb[4].mxu0 %v671_v1 }
  0x44   :  { %822 = vmatmul.mubr.bf16.vlgmr.msra.gmra.mrb[4].mxu1 %v889_v2 }
  0xf5   :  { %v746_v3 = vpop.f32.mrb[0].mxu0 }
  0xf6   :  { %v747_v5 = vpop.f32.mrb[1].mxu0 }
  0xf7   :  { %v748_v6 = vadd.f32 %v747_v5, %v746_v3  ;;  %v749_v7 = vpop.f32.mrb[2].mxu0  ;;  %v768_v8 = vpop.f32.mrb[0].mxu1 }
  0xf8   :  { %v750_v9 = vpop.f32.mrb[3].mxu0  ;;  %v769_v10 = vpop.f32.mrb[1].mxu1 }
  0xf9   :  { %v534_v11 = vadd.f32 %v748_v6, %v666_v4  ;;  %v770_v12 = vadd.f32 %v769_v10, %v768_v8  ;;  %v771_v13 = vpop.f32.mrb[2].mxu1 }
  0xfa   :  { %v772_v14 = vpop.f32.mrb[3].mxu1 }
  0xfb   :  { %v574_v15 = vadd.f32 %v770_v12, %v534_v11 }
 0x115   :  { %v790_v16 = vpop.f32.mrb[4].mxu0 }
 0x116   :  { %v791_v17 = vpop.f32.mrb[5].mxu0 }
 0x117   :  { %v792_v18 = vadd.f32 %v791_v17, %v790_v16  ;;  %v793_v19 = vpop.f32.mrb[6].mxu0  ;;  %v653_v20 = vpop.f32.mrb[4].mxu1 }
 0x118   :  { %v794_v21 = vpop.f32.mrb[7].mxu0  ;;  %v823_v22 = vpop.f32.mrb[5].mxu1 }
 0x119   :  { %v614_v23 = vadd.f32 %v792_v18, %v574_v15  ;;  %v656_v24 = vpop.f32.mrb[6].mxu1 }
 0x11a   :  { %v824_v25 = vpop.f32.mrb[7].mxu1 }
 0x11b   :  { %v654_v26 = vadd.f32 %v653_v20, %v614_v23 }
 0x11d   :  { %v659_v27 = vmax.f32 %v654_v26, 0.0 }
 0x11f   :  { %v660_v28 = vpack.c.bf16 %v659_v27, %v659_v27 }
 0x121   :  { %661 = vst [vmem:[%s1101_s3] sm:$0xf] %v660_v28 }

// kernel: autoencoder4d_forward.7
= control target key start
LH: loop header
LB: loop body
LE: loop exit
PB: predicated region body
PF: predicated region fallthrough
CT: control target
= control target key end

     0   :  { %s6050_s1 = inlined_call_operand.vmem [shape: bf16[5376,128], index: 1, kind: input, shape index: {}]   ;;  %s6051_s0 = inlined_call_operand.vmem [shape: bf16[8,5376], index: 0, kind: input, shape index: {}]   ;;  %s6052_s2 = inlined_call_operand.vmem [shape: f32[1,128], index: 2, kind: input, shape index: {}]   ;;  %s6053_s3 = inlined_call_operand.vmem [shape: bf16[8,128], index: 3, kind: output, shape index: {}]  }
   0x1   :  { %v4566_v0 = vld [vmem:[%s6050_s1 + $0x40] sm:$0xff]   ;;  %v4570_v4 = vld [vmem:[%s6050_s1 + $0x48] sm:$0xff]   ;;  %v4574_v8 = vld [vmem:[%s6050_s1 + $0x50] sm:$0xff]  }
   0x2   :  { %v4567_v1 = vld [vmem:[%s6050_s1] sm:$0xff]   ;;  %4104 = vmatprep.subr.bf16.mxu0 %v4566_v0  ;;  %v4571_v5 = vld [vmem:[%s6050_s1 + $0x8] sm:$0xff]   ;;  %v4575_v9 = vld [vmem:[%s6050_s1 + $0x10] sm:$0xff]  }
   0x3   :  { %v4568_v2 = vld [vmem:[%s6050_s1 + $0xc0] sm:$0xff]   ;;  %4105 = vmatpush3.bf16.msra.mxu0 %v4567_v1  ;;  %v4572_v6 = vld [vmem:[%s6050_s1 + $0xc8] sm:$0xff]   ;;  %v4576_v10 = vld [vmem:[%s6050_s1 + $0xd0] sm:$0xff]  }
   0x4   :  { %v4569_v3 = vld [vmem:[%s6050_s1 + $0x80] sm:$0xff]   ;;  %4126 = vmatprep.subr.bf16.mxu1 %v4568_v2  ;;  %4106 = vmatprep.subr.bf16.mxu0 %v4570_v4  ;;  %v4573_v7 = vld [vmem:[%s6050_s1 + $0x88] sm:$0xff]   ;;  %v4577_v11 = vld [vmem:[%s6050_s1 + $0x90] sm:$0xff]  }
   0x5   :  { %4127 = vmatpush3.bf16.msra.mxu1 %v4569_v3  ;;  %v4578_v12 = vld [vmem:[%s6050_s1 + $0x58] sm:$0xff]   ;;  %v4582_v16 = vld [vmem:[%s6050_s1 + $0x60] sm:$0xff]   ;;  %v4586_v20 = vld [vmem:[%s6050_s1 + $0x68] sm:$0xff]  }
   0x6   :  { %4128 = vmatprep.subr.bf16.mxu1 %v4572_v6  ;;  %v4579_v13 = vld [vmem:[%s6050_s1 + $0x18] sm:$0xff]   ;;  %v4583_v17 = vld [vmem:[%s6050_s1 + $0x20] sm:$0xff]   ;;  %v4587_v21 = vld [vmem:[%s6050_s1 + $0x28] sm:$0xff]  }
   0x7   :  { %4107 = vmatpush3.bf16.msra.mxu0 %v4571_v5  ;;  %v4580_v14 = vld [vmem:[%s6050_s1 + $0xd8] sm:$0xff]   ;;  %v4584_v18 = vld [vmem:[%s6050_s1 + $0xe0] sm:$0xff]   ;;  %v4588_v22 = vld [vmem:[%s6050_s1 + $0xe8] sm:$0xff]  }
   0x8   :  { %4108 = vmatprep.subr.bf16.mxu0 %v4574_v8  ;;  %v4581_v15 = vld [vmem:[%s6050_s1 + $0x98] sm:$0xff]   ;;  %v4585_v19 = vld [vmem:[%s6050_s1 + $0xa0] sm:$0xff]   ;;  %v4589_v23 = vld [vmem:[%s6050_s1 + $0xa8] sm:$0xff]  }
   0x9   :  { %4129 = vmatpush3.bf16.msra.mxu1 %v4573_v7  ;;  %v4590_v24 = vld [vmem:[%s6050_s1 + $0x70] sm:$0xff]   ;;  %v4594_v28 = vld [vmem:[%s6050_s1 + $0x78] sm:$0xff]   ;;  %v15_v31 = vld [vmem:[%s6051_s0] sm:$0xff] }
   0xa   :  { %4130 = vmatprep.subr.bf16.mxu1 %v4576_v10  ;;  %v4591_v25 = vld [vmem:[%s6050_s1 + $0x30] sm:$0xff]   ;;  %v4595_v29 = vld [vmem:[%s6050_s1 + $0x38] sm:$0xff]   ;;  %v3726_v32 = vcombine.low %v15_v31, %v15_v31  ;;  %v3727_v33 = vcombine.high %v15_v31, %v15_v31  ;;  %v4600_v35 = vld [vmem:[%s6050_s1 + $0x140] sm:$0xff]  }
   0xb   :  { %4109 = vmatpush3.bf16.msra.mxu0 %v4575_v9  ;;  %v4592_v26 = vld [vmem:[%s6050_s1 + $0xf0] sm:$0xff]   ;;  %v4596_v30 = vld [vmem:[%s6050_s1 + $0xf8] sm:$0xff]   ;;  %v16_v36 = vld [vmem:[%s6051_s0 + $0x8] sm:$0xff] }
   0xc   :  { %4110 = vmatprep.subr.bf16.mxu0 %v4578_v12  ;;  %v4593_v27 = vld [vmem:[%s6050_s1 + $0xb0] sm:$0xff]   ;;  %v4599_v34 = vld [vmem:[%s6050_s1 + $0xb8] sm:$0xff]   ;;  %2910 = vmatprep.mubr.bf16.mxu0 %v3727_v33  ;;  %v3728_v37 = vcombine.low %v16_v36, %v16_v36  ;;  %v3729_v38 = vcombine.high %v16_v36, %v16_v36  ;;  %v4603_v39 = vld [vmem:[%s6050_s1 + $0x100] sm:$0xff]  }
   0xd   :  { %4131 = vmatpush3.bf16.msra.mxu1 %v4577_v11  ;;  %v4604_v40 = vld [vmem:[%s6050_s1 + $0x1c0] sm:$0xff]   ;;  %v4606_v42 = vld [vmem:[%s6050_s1 + $0x148] sm:$0xff]   ;;  %v4610_v46 = vld [vmem:[%s6050_s1 + $0x150] sm:$0xff]  }
   0xe   :  { %4132 = vmatprep.subr.bf16.mxu1 %v4580_v14  ;;  %2950 = vmatprep.mubr.bf16.mxu1 %v3729_v38  ;;  %v4605_v41 = vld [vmem:[%s6050_s1 + $0x180] sm:$0xff]   ;;  %v4607_v43 = vld [vmem:[%s6050_s1 + $0x108] sm:$0xff]   ;;  %v4611_v47 = vld [vmem:[%s6050_s1 + $0x110] sm:$0xff]  }
   0xf   :  { %4111 = vmatpush3.bf16.msra.mxu0 %v4579_v13  ;;  %v4608_v44 = vld [vmem:[%s6050_s1 + $0x1c8] sm:$0xff]   ;;  %v4612_v48 = vld [vmem:[%s6050_s1 + $0x1d0] sm:$0xff]   ;;  %v4614_v50 = vld [vmem:[%s6050_s1 + $0x158] sm:$0xff]  }
  0x10   :  { %4112 = vmatprep.subr.bf16.mxu0 %v4582_v16  ;;  %v4609_v45 = vld [vmem:[%s6050_s1 + $0x188] sm:$0xff]   ;;  %v4613_v49 = vld [vmem:[%s6050_s1 + $0x190] sm:$0xff]   ;;  %v4615_v51 = vld [vmem:[%s6050_s1 + $0x118] sm:$0xff]  }
  0x11   :  { %4133 = vmatpush3.bf16.msra.mxu1 %v4581_v15  ;;  %v4616_v52 = vld [vmem:[%s6050_s1 + $0x1d8] sm:$0xff]   ;;  %v4618_v54 = vld [vmem:[%s6050_s1 + $0x160] sm:$0xff]   ;;  %v4622_v58 = vld [vmem:[%s6050_s1 + $0x168] sm:$0xff]  }
  0x12   :  { %4134 = vmatprep.subr.bf16.mxu1 %v4584_v18  ;;  %v4617_v53 = vld [vmem:[%s6050_s1 + $0x198] sm:$0xff]   ;;  %v4619_v55 = vld [vmem:[%s6050_s1 + $0x120] sm:$0xff]   ;;  %v4623_v59 = vld [vmem:[%s6050_s1 + $0x128] sm:$0xff]  }
  0x13   :  { %4113 = vmatpush3.bf16.msra.mxu0 %v4583_v17  ;;  %v4620_v56 = vld [vmem:[%s6050_s1 + $0x1e0] sm:$0xff]   ;;  %v4624_v60 = vld [vmem:[%s6050_s1 + $0x1e8] sm:$0xff]   ;;  %v4626_v62 = vld [vmem:[%s6050_s1 + $0x170] sm:$0xff]  }
  0x14   :  { %4114 = vmatprep.subr.bf16.mxu0 %v4586_v20  ;;  %v4621_v57 = vld [vmem:[%s6050_s1 + $0x1a0] sm:$0xff]   ;;  %v4625_v61 = vld [vmem:[%s6050_s1 + $0x1a8] sm:$0xff]   ;;  %v4627_v63 = vld [vmem:[%s6050_s1 + $0x130] sm:$0xff]  }
  0x15   :  { %4135 = vmatpush3.bf16.msra.mxu1 %v4585_v19  ;;  %v4628_v0 = vld [vmem:[%s6050_s1 + $0x1f0] sm:$0xff]   ;;  %v4630_v2 = vld [vmem:[%s6050_s1 + $0x178] sm:$0xff]   ;;  %v4636_v9 = vld [vmem:[%s6050_s1 + $0x240] sm:$0xff]  }
  0x16   :  { %4136 = vmatprep.subr.bf16.mxu1 %v4588_v22  ;;  %v4629_v1 = vld [vmem:[%s6050_s1 + $0x1b0] sm:$0xff]   ;;  %v4631_v3 = vld [vmem:[%s6050_s1 + $0x138] sm:$0xff]   ;;  %v4639_v13 = vld [vmem:[%s6050_s1 + $0x200] sm:$0xff]  }
  0x17   :  { %4115 = vmatpush3.bf16.msra.mxu0 %v4587_v21  ;;  %v4632_v4 = vld [vmem:[%s6050_s1 + $0x1f8] sm:$0xff]   ;;  %v17_v5 = vld [vmem:[%s6051_s0 + $0x10] sm:$0xff]  ;;  %v4640_v14 = vld [vmem:[%s6050_s1 + $0x2c0] sm:$0xff]  }
  0x18   :  { %4116 = vmatprep.subr.bf16.mxu0 %v4590_v24  ;;  %v3730_v6 = vcombine.low %v17_v5, %v17_v5  ;;  %v3731_v7 = vcombine.high %v17_v5, %v17_v5  ;;  %v4635_v8 = vld [vmem:[%s6050_s1 + $0x1b8] sm:$0xff]   ;;  %v4641_v15 = vld [vmem:[%s6050_s1 + $0x280] sm:$0xff]   ;;  %v4642_v16 = vld [vmem:[%s6050_s1 + $0x248] sm:$0xff]  }
  0x19   :  { %4137 = vmatpush3.bf16.msra.mxu1 %v4589_v23  ;;  %v18_v10 = vld [vmem:[%s6051_s0 + $0x18] sm:$0xff]  ;;  %v4643_v17 = vld [vmem:[%s6050_s1 + $0x208] sm:$0xff]   ;;  %v4646_v20 = vld [vmem:[%s6050_s1 + $0x250] sm:$0xff]  }
  0x1a   :  { %4138 = vmatprep.subr.bf16.mxu1 %v4592_v26  ;;  %v3732_v11 = vcombine.low %v18_v10, %v18_v10  ;;  %v3733_v12 = vcombine.high %v18_v10, %v18_v10  ;;  %v4644_v18 = vld [vmem:[%s6050_s1 + $0x2c8] sm:$0xff]   ;;  %v4647_v21 = vld [vmem:[%s6050_s1 + $0x210] sm:$0xff]   ;;  %v4650_v24 = vld [vmem:[%s6050_s1 + $0x258] sm:$0xff]  }
  0x1b   :  { %4117 = vmatpush3.bf16.msra.mxu0 %v4591_v25  ;;  %v4645_v19 = vld [vmem:[%s6050_s1 + $0x288] sm:$0xff]   ;;  %v4648_v22 = vld [vmem:[%s6050_s1 + $0x2d0] sm:$0xff]   ;;  %v4651_v25 = vld [vmem:[%s6050_s1 + $0x218] sm:$0xff]  }
  0x1c   :  { %4118 = vmatprep.subr.bf16.mxu0 %v4594_v28  ;;  %v4649_v23 = vld [vmem:[%s6050_s1 + $0x290] sm:$0xff]   ;;  %v4652_v26 = vld [vmem:[%s6050_s1 + $0x2d8] sm:$0xff]   ;;  %v4654_v28 = vld [vmem:[%s6050_s1 + $0x260] sm:$0xff]  }
  0x1d   :  { %4139 = vmatpush3.bf16.msra.mxu1 %v4593_v27  ;;  %v4653_v27 = vld [vmem:[%s6050_s1 + $0x298] sm:$0xff]   ;;  %v4657_v31 = vld [vmem:[%s6050_s1 + $0x2a0] sm:$0xff]   ;;  %v4659_v33 = vld [vmem:[%s6050_s1 + $0x228] sm:$0xff]  }
  0x1e   :  { %4140 = vmatprep.subr.bf16.mxu1 %v4596_v30  ;;  %v4656_v30 = vld [vmem:[%s6050_s1 + $0x2e0] sm:$0xff]   ;;  %v4662_v36 = vld [vmem:[%s6050_s1 + $0x270] sm:$0xff]  }
  0x1f   :  { %4119 = vmatpush3.bf16.msra.mxu0 %v4595_v29  ;;  %v4655_v29 = vld [vmem:[%s6050_s1 + $0x220] sm:$0xff]   ;;  %v4664_v38 = vld [vmem:[%s6050_s1 + $0x2f0] sm:$0xff]  }
  0x20   :  { %4148 = vmatprep.subr.bf16.mxu0 %v4600_v35  ;;  %v4661_v35 = vld [vmem:[%s6050_s1 + $0x2a8] sm:$0xff]   ;;  %v4693_v5 = vld [vmem:[%s6050_s1 + $0x3a0] sm:$0xff]   ;;  %v4698_v10 = vld [vmem:[%s6050_s1 + $0x370] sm:$0xff]  }
  0x21   :  { %4141 = vmatpush3.bf16.msra.mxu1 %v4599_v34  ;;  %v4660_v34 = vld [vmem:[%s6050_s1 + $0x2e8] sm:$0xff]  }
  0x22   :  { %2911 = vmatmul.mubr.bf16.vlgmr.msra.gmra.mrb[0].mxu0 %v3726_v32  ;;  %4170 = vmatprep.subr.bf16.mxu1 %v4604_v40  ;;  %v4658_v32 = vld [vmem:[%s6050_s1 + $0x268] sm:$0xff]   ;;  %v4666_v40 = vld [vmem:[%s6050_s1 + $0x278] sm:$0xff]  }
  0x23   :  { %4149 = vmatpush3.bf16.msra.mxu0 %v4603_v39  ;;  %2990 = vmatprep.mubr.bf16.mxu0 %v3731_v7  ;;  %v4665_v39 = vld [vmem:[%s6050_s1 + $0x2b0] sm:$0xff]   ;;  %v4695_v7 = vld [vmem:[%s6050_s1 + $0x328] sm:$0xff]  }
  0x24   :  { %2951 = vmatmul.mubr.bf16.vlgmr.msra.gmra.mrb[0].mxu1 %v3728_v37  ;;  %4150 = vmatprep.subr.bf16.mxu0 %v4606_v42  ;;  %v4663_v37 = vld [vmem:[%s6050_s1 + $0x230] sm:$0xff]   ;;  %v4668_v42 = vld [vmem:[%s6050_s1 + $0x2f8] sm:$0xff]  }
  0x25   :  { %4171 = vmatpush3.bf16.msra.mxu1 %v4605_v41  ;;  %3030 = vmatprep.mubr.bf16.mxu1 %v3733_v12  ;;  %v4667_v41 = vld [vmem:[%s6050_s1 + $0x238] sm:$0xff]   ;;  %v4700_v12 = vld [vmem:[%s6050_s1 + $0x3f0] sm:$0xff]  }
  0x26   :  { %4172 = vmatprep.subr.bf16.mxu1 %v4608_v44 }
  0x27   :  { %4151 = vmatpush3.bf16.msra.mxu0 %v4607_v43  ;;  %v19_v43 = vld [vmem:[%s6051_s0 + $0x20] sm:$0xff] }
  0x28   :  { %4152 = vmatprep.subr.bf16.mxu0 %v4610_v46  ;;  %v3734_v44 = vcombine.low %v19_v43, %v19_v43  ;;  %v4671_v46 = vld [vmem:[%s6050_s1 + $0x2b8] sm:$0xff]  }
  0x29   :  { %4173 = vmatpush3.bf16.msra.mxu1 %v4609_v45  ;;  %v3735_v45 = vcombine.high %v19_v43, %v19_v43  ;;  %v4729_v43 = vld [vmem:[%s6050_s1 + $0x4a0] sm:$0xff]  }
  0x2a   :  { %4174 = vmatprep.subr.bf16.mxu1 %v4612_v48  ;;  %v20_v48 = vld [vmem:[%s6051_s0 + $0x28] sm:$0xff] }
  0x2b   :  { %4153 = vmatpush3.bf16.msra.mxu0 %v4611_v47  ;;  %v4672_v47 = vld [vmem:[%s6050_s1 + $0x340] sm:$0xff]  }
  0x2c   :  { %4154 = vmatprep.subr.bf16.mxu0 %v4614_v50  ;;  %v3737_v50 = vcombine.high %v20_v48, %v20_v48 }
  0x2d   :  { %4175 = vmatpush3.bf16.msra.mxu1 %v4613_v49  ;;  %v3736_v49 = vcombine.low %v20_v48, %v20_v48  ;;  %v4734_v48 = vld [vmem:[%s6050_s1 + $0x470] sm:$0xff]  }
  0x2e   :  { %4176 = vmatprep.subr.bf16.mxu1 %v4616_v52  ;;  %v4676_v52 = vld [vmem:[%s6050_s1 + $0x3c0] sm:$0xff]  }
  0x2f   :  { %4155 = vmatpush3.bf16.msra.mxu0 %v4615_v51  ;;  %v4675_v51 = vld [vmem:[%s6050_s1 + $0x300] sm:$0xff]  }
  0x30   :  { %4156 = vmatprep.subr.bf16.mxu0 %v4618_v54  ;;  %v4678_v54 = vld [vmem:[%s6050_s1 + $0x348] sm:$0xff]  }
  0x31   :  { %4177 = vmatpush3.bf16.msra.mxu1 %v4617_v53  ;;  %v4677_v53 = vld [vmem:[%s6050_s1 + $0x380] sm:$0xff]  }
  0x32   :  { %4178 = vmatprep.subr.bf16.mxu1 %v4620_v56  ;;  %v4680_v56 = vld [vmem:[%s6050_s1 + $0x3c8] sm:$0xff]  }
  0x33   :  { %4157 = vmatpush3.bf16.msra.mxu0 %v4619_v55  ;;  %v4679_v55 = vld [vmem:[%s6050_s1 + $0x308] sm:$0xff]  }
  0x34   :  { %4158 = vmatprep.subr.bf16.mxu0 %v4622_v58  ;;  %v4682_v58 = vld [vmem:[%s6050_s1 + $0x350] sm:$0xff]  }
  0x35   :  { %4179 = vmatpush3.bf16.msra.mxu1 %v4621_v57  ;;  %v4681_v57 = vld [vmem:[%s6050_s1 + $0x388] sm:$0xff]  }
  0x36   :  { %4180 = vmatprep.subr.bf16.mxu1 %v4624_v60  ;;  %v4684_v60 = vld [vmem:[%s6050_s1 + $0x3d0] sm:$0xff]  }
  0x37   :  { %4159 = vmatpush3.bf16.msra.mxu0 %v4623_v59  ;;  %v4683_v59 = vld [vmem:[%s6050_s1 + $0x310] sm:$0xff]  }
  0x38   :  { %4160 = vmatprep.subr.bf16.mxu0 %v4626_v62  ;;  %v4686_v62 = vld [vmem:[%s6050_s1 + $0x358] sm:$0xff]  }
  0x39   :  { %4181 = vmatpush3.bf16.msra.mxu1 %v4625_v61  ;;  %v4685_v61 = vld [vmem:[%s6050_s1 + $0x390] sm:$0xff]  }
  0x3a   :  { %4182 = vmatprep.subr.bf16.mxu1 %v4628_v0  ;;  %v4688_v0 = vld [vmem:[%s6050_s1 + $0x3d8] sm:$0xff]  }
  0x3b   :  { %4161 = vmatpush3.bf16.msra.mxu0 %v4627_v63  ;;  %v4687_v63 = vld [vmem:[%s6050_s1 + $0x318] sm:$0xff]  }
  0x3c   :  { %4162 = vmatprep.subr.bf16.mxu0 %v4630_v2  ;;  %v4690_v2 = vld [vmem:[%s6050_s1 + $0x360] sm:$0xff]  }
  0x3d   :  { %4183 = vmatpush3.bf16.msra.mxu1 %v4629_v1  ;;  %v4689_v1 = vld [vmem:[%s6050_s1 + $0x398] sm:$0xff]  }
  0x3e   :  { %4184 = vmatprep.subr.bf16.mxu1 %v4632_v4  ;;  %v4692_v4 = vld [vmem:[%s6050_s1 + $0x3e0] sm:$0xff]  }
  0x3f   :  { %4163 = vmatpush3.bf16.msra.mxu0 %v4631_v3  ;;  %v4691_v3 = vld [vmem:[%s6050_s1 + $0x320] sm:$0xff]  }
  0x40   :  { %4192 = vmatprep.subr.bf16.mxu0 %v4636_v9  ;;  %v4697_v9 = vld [vmem:[%s6050_s1 + $0x3a8] sm:$0xff]  }
  0x41   :  { %4185 = vmatpush3.bf16.msra.mxu1 %v4635_v8  ;;  %v4696_v8 = vld [vmem:[%s6050_s1 + $0x3e8] sm:$0xff]  }
  0x42   :  { %2991 = vmatmul.mubr.bf16.vlgmr.msra.gmra.mrb[4].mxu0 %v3730_v6  ;;  %4214 = vmatprep.subr.bf16.mxu1 %v4640_v14  ;;  %v4694_v6 = vld [vmem:[%s6050_s1 + $0x368] sm:$0xff]   ;;  %v4702_v14 = vld [vmem:[%s6050_s1 + $0x378] sm:$0xff]  }
  0x43   :  { %4193 = vmatpush3.bf16.msra.mxu0 %v4639_v13  ;;  %3070 = vmatprep.mubr.bf16.mxu0 %v3735_v45  ;;  %v4701_v13 = vld [vmem:[%s6050_s1 + $0x3b0] sm:$0xff]   ;;  %v4731_v45 = vld [vmem:[%s6050_s1 + $0x428] sm:$0xff]  }
  0x44   :  { %3031 = vmatmul.mubr.bf16.vlgmr.msra.gmra.mrb[4].mxu1 %v3732_v11  ;;  %4194 = vmatprep.subr.bf16.mxu0 %v4642_v16  ;;  %v4699_v11 = vld [vmem:[%s6050_s1 + $0x330] sm:$0xff]   ;;  %v4704_v16 = vld [vmem:[%s6050_s1 + $0x3f8] sm:$0xff]  }
  0x45   :  { %4215 = vmatpush3.bf16.msra.mxu1 %v4641_v15  ;;  %3110 = vmatprep.mubr.bf16.mxu1 %v3737_v50  ;;  %v4703_v15 = vld [vmem:[%s6050_s1 + $0x338] sm:$0xff]   ;;  %v4736_v50 = vld [vmem:[%s6050_s1 + $0x4f0] sm:$0xff]  }
  0x46   :  { %4216 = vmatprep.subr.bf16.mxu1 %v4644_v18 }
  0x47   :  { %4195 = vmatpush3.bf16.msra.mxu0 %v4643_v17  ;;  %v21_v17 = vld [vmem:[%s6051_s0 + $0x30] sm:$0xff] }
  0x48   :  { %4196 = vmatprep.subr.bf16.mxu0 %v4646_v20  ;;  %v3738_v18 = vcombine.low %v21_v17, %v21_v17  ;;  %v4707_v20 = vld [vmem:[%s6050_s1 + $0x3b8] sm:$0xff]  }
  0x49   :  { %4217 = vmatpush3.bf16.msra.mxu1 %v4645_v19  ;;  %v3739_v19 = vcombine.high %v21_v17, %v21_v17  ;;  %v4765_v17 = vld [vmem:[%s6050_s1 + $0x5a0] sm:$0xff]  }
  0x4a   :  { %4218 = vmatprep.subr.bf16.mxu1 %v4648_v22  ;;  %v22_v22 = vld [vmem:[%s6051_s0 + $0x38] sm:$0xff] }
  0x4b   :  { %4197 = vmatpush3.bf16.msra.mxu0 %v4647_v21  ;;  %v4708_v21 = vld [vmem:[%s6050_s1 + $0x440] sm:$0xff]  }
  0x4c   :  { %4198 = vmatprep.subr.bf16.mxu0 %v4650_v24  ;;  %v3741_v24 = vcombine.high %v22_v22, %v22_v22 }
  0x4d   :  { %4219 = vmatpush3.bf16.msra.mxu1 %v4649_v23  ;;  %v3740_v23 = vcombine.low %v22_v22, %v22_v22  ;;  %v4770_v22 = vld [vmem:[%s6050_s1 + $0x570] sm:$0xff]  }
  0x4e   :  { %4220 = vmatprep.subr.bf16.mxu1 %v4652_v26  ;;  %v4712_v26 = vld [vmem:[%s6050_s1 + $0x4c0] sm:$0xff]  }
  0x4f   :  { %4199 = vmatpush3.bf16.msra.mxu0 %v4651_v25  ;;  %v4711_v25 = vld [vmem:[%s6050_s1 + $0x400] sm:$0xff]  }
  0x50   :  { %4200 = vmatprep.subr.bf16.mxu0 %v4654_v28  ;;  %v4714_v28 = vld [vmem:[%s6050_s1 + $0x448] sm:$0xff]  }
  0x51   :  { %4221 = vmatpush3.bf16.msra.mxu1 %v4653_v27  ;;  %v4713_v27 = vld [vmem:[%s6050_s1 + $0x480] sm:$0xff]  }
  0x52   :  { %4222 = vmatprep.subr.bf16.mxu1 %v4656_v30  ;;  %v4716_v30 = vld [vmem:[%s6050_s1 + $0x4c8] sm:$0xff]  }
  0x53   :  { %4201 = vmatpush3.bf16.msra.mxu0 %v4655_v29  ;;  %v4715_v29 = vld [vmem:[%s6050_s1 + $0x408] sm:$0xff]  }
  0x54   :  { %4202 = vmatprep.subr.bf16.mxu0 %v4658_v32  ;;  %v4718_v32 = vld [vmem:[%s6050_s1 + $0x450] sm:$0xff]  }
  0x55   :  { %4223 = vmatpush3.bf16.msra.mxu1 %v4657_v31  ;;  %v4717_v31 = vld [vmem:[%s6050_s1 + $0x488] sm:$0xff]  }
  0x56   :  { %4224 = vmatprep.subr.bf16.mxu1 %v4660_v34  ;;  %v4720_v34 = vld [vmem:[%s6050_s1 + $0x4d0] sm:$0xff]  }
  0x57   :  { %4203 = vmatpush3.bf16.msra.mxu0 %v4659_v33  ;;  %v4719_v33 = vld [vmem:[%s6050_s1 + $0x410] sm:$0xff]  }
  0x58   :  { %4204 = vmatprep.subr.bf16.mxu0 %v4662_v36  ;;  %v4722_v36 = vld [vmem:[%s6050_s1 + $0x458] sm:$0xff]  }
  0x59   :  { %4225 = vmatpush3.bf16.msra.mxu1 %v4661_v35  ;;  %v4721_v35 = vld [vmem:[%s6050_s1 + $0x490] sm:$0xff]  }
  0x5a   :  { %4226 = vmatprep.subr.bf16.mxu1 %v4664_v38  ;;  %v4724_v38 = vld [vmem:[%s6050_s1 + $0x4d8] sm:$0xff]  }
  0x5b   :  { %4205 = vmatpush3.bf16.msra.mxu0 %v4663_v37  ;;  %v4723_v37 = vld [vmem:[%s6050_s1 + $0x418] sm:$0xff]  }
  0x5c   :  { %4206 = vmatprep.subr.bf16.mxu0 %v4666_v40  ;;  %v4726_v40 = vld [vmem:[%s6050_s1 + $0x460] sm:$0xff]  }
  0x5d   :  { %4227 = vmatpush3.bf16.msra.mxu1 %v4665_v39  ;;  %v4725_v39 = vld [vmem:[%s6050_s1 + $0x498] sm:$0xff]  }
  0x5e   :  { %4228 = vmatprep.subr.bf16.mxu1 %v4668_v42  ;;  %v4728_v42 = vld [vmem:[%s6050_s1 + $0x4e0] sm:$0xff]  }
  0x5f   :  { %4207 = vmatpush3.bf16.msra.mxu0 %v4667_v41  ;;  %v4727_v41 = vld [vmem:[%s6050_s1 + $0x420] sm:$0xff]  }
  0x60   :  { %4236 = vmatprep.subr.bf16.mxu0 %v4672_v47  ;;  %v4733_v47 = vld [vmem:[%s6050_s1 + $0x4a8] sm:$0xff]  }
  0x61   :  { %4229 = vmatpush3.bf16.msra.mxu1 %v4671_v46  ;;  %v4732_v46 = vld [vmem:[%s6050_s1 + $0x4e8] sm:$0xff]  }
  0x62   :  { %3071 = vmatmul.mubr.bf16.vlgmr.msra.gmra.mrb[8].mxu0 %v3734_v44  ;;  %4258 = vmatprep.subr.bf16.mxu1 %v4676_v52  ;;  %v4730_v44 = vld [vmem:[%s6050_s1 + $0x468] sm:$0xff]   ;;  %v4738_v52 = vld [vmem:[%s6050_s1 + $0x478] sm:$0xff]  }
  0x63   :  { %4237 = vmatpush3.bf16.msra.mxu0 %v4675_v51  ;;  %3150 = vmatprep.mubr.bf16.mxu0 %v3739_v19  ;;  %v4737_v51 = vld [vmem:[%s6050_s1 + $0x4b0] sm:$0xff]   ;;  %v4767_v19 = vld [vmem:[%s6050_s1 + $0x528] sm:$0xff]  }
  0x64   :  { %3111 = vmatmul.mubr.bf16.vlgmr.msra.gmra.mrb[8].mxu1 %v3736_v49  ;;  %4238 = vmatprep.subr.bf16.mxu0 %v4678_v54  ;;  %v4735_v49 = vld [vmem:[%s6050_s1 + $0x430] sm:$0xff]   ;;  %v4740_v54 = vld [vmem:[%s6050_s1 + $0x4f8] sm:$0xff]  }
  0x65   :  { %4259 = vmatpush3.bf16.msra.mxu1 %v4677_v53  ;;  %3190 = vmatprep.mubr.bf16.mxu1 %v3741_v24  ;;  %v4739_v53 = vld [vmem:[%s6050_s1 + $0x438] sm:$0xff]   ;;  %v4772_v24 = vld [vmem:[%s6050_s1 + $0x5f0] sm:$0xff]  }
  0x66   :  { %4260 = vmatprep.subr.bf16.mxu1 %v4680_v56 }
  0x67   :  { %4239 = vmatpush3.bf16.msra.mxu0 %v4679_v55  ;;  %v23_v55 = vld [vmem:[%s6051_s0 + $0x40] sm:$0xff] }
  0x68   :  { %4240 = vmatprep.subr.bf16.mxu0 %v4682_v58  ;;  %v3742_v56 = vcombine.low %v23_v55, %v23_v55  ;;  %v4743_v58 = vld [vmem:[%s6050_s1 + $0x4b8] sm:$0xff]  }
  0x69   :  { %4261 = vmatpush3.bf16.msra.mxu1 %v4681_v57  ;;  %v3743_v57 = vcombine.high %v23_v55, %v23_v55  ;;  %v4801_v55 = vld [vmem:[%s6050_s1 + $0x6a0] sm:$0xff]  }
  0x6a   :  { %4262 = vmatprep.subr.bf16.mxu1 %v4684_v60  ;;  %v24_v60 = vld [vmem:[%s6051_s0 + $0x48] sm:$0xff] }
  0x6b   :  { %4241 = vmatpush3.bf16.msra.mxu0 %v4683_v59  ;;  %v4744_v59 = vld [vmem:[%s6050_s1 + $0x540] sm:$0xff]  }
  0x6c   :  { %4242 = vmatprep.subr.bf16.mxu0 %v4686_v62  ;;  %v3745_v62 = vcombine.high %v24_v60, %v24_v60 }
  0x6d   :  { %4263 = vmatpush3.bf16.msra.mxu1 %v4685_v61  ;;  %v3744_v61 = vcombine.low %v24_v60, %v24_v60  ;;  %v4806_v60 = vld [vmem:[%s6050_s1 + $0x670] sm:$0xff]  }
  0x6e   :  { %4264 = vmatprep.subr.bf16.mxu1 %v4688_v0  ;;  %v4748_v0 = vld [vmem:[%s6050_s1 + $0x5c0] sm:$0xff]  }
  0x6f   :  { %4243 = vmatpush3.bf16.msra.mxu0 %v4687_v63  ;;  %v4747_v63 = vld [vmem:[%s6050_s1 + $0x500] sm:$0xff]  }
  0x70   :  { %4244 = vmatprep.subr.bf16.mxu0 %v4690_v2  ;;  %v4750_v2 = vld [vmem:[%s6050_s1 + $0x548] sm:$0xff]  }
  0x71   :  { %4265 = vmatpush3.bf16.msra.mxu1 %v4689_v1  ;;  %v4749_v1 = vld [vmem:[%s6050_s1 + $0x580] sm:$0xff]  }
  0x72   :  { %4266 = vmatprep.subr.bf16.mxu1 %v4692_v4  ;;  %v4752_v4 = vld [vmem:[%s6050_s1 + $0x5c8] sm:$0xff]  }
  0x73   :  { %4245 = vmatpush3.bf16.msra.mxu0 %v4691_v3  ;;  %v4751_v3 = vld [vmem:[%s6050_s1 + $0x508] sm:$0xff]  }
  0x74   :  { %4246 = vmatprep.subr.bf16.mxu0 %v4694_v6  ;;  %v4754_v6 = vld [vmem:[%s6050_s1 + $0x550] sm:$0xff]  }
  0x75   :  { %4267 = vmatpush3.bf16.msra.mxu1 %v4693_v5  ;;  %v4753_v5 = vld [vmem:[%s6050_s1 + $0x588] sm:$0xff]  }
  0x76   :  { %4268 = vmatprep.subr.bf16.mxu1 %v4696_v8  ;;  %v4756_v8 = vld [vmem:[%s6050_s1 + $0x5d0] sm:$0xff]  }
  0x77   :  { %4247 = vmatpush3.bf16.msra.mxu0 %v4695_v7  ;;  %v4755_v7 = vld [vmem:[%s6050_s1 + $0x510] sm:$0xff]  }
  0x78   :  { %4248 = vmatprep.subr.bf16.mxu0 %v4698_v10  ;;  %v4758_v10 = vld [vmem:[%s6050_s1 + $0x558] sm:$0xff]  }
  0x79   :  { %4269 = vmatpush3.bf16.msra.mxu1 %v4697_v9  ;;  %v4757_v9 = vld [vmem:[%s6050_s1 + $0x590] sm:$0xff]  }
  0x7a   :  { %4270 = vmatprep.subr.bf16.mxu1 %v4700_v12  ;;  %v4760_v12 = vld [vmem:[%s6050_s1 + $0x5d8] sm:$0xff]  }
  0x7b   :  { %4249 = vmatpush3.bf16.msra.mxu0 %v4699_v11  ;;  %v4759_v11 = vld [vmem:[%s6050_s1 + $0x518] sm:$0xff]  }
  0x7c   :  { %4250 = vmatprep.subr.bf16.mxu0 %v4702_v14  ;;  %v4762_v14 = vld [vmem:[%s6050_s1 + $0x560] sm:$0xff]  }
  0x7d   :  { %4271 = vmatpush3.bf16.msra.mxu1 %v4701_v13  ;;  %v4761_v13 = vld [vmem:[%s6050_s1 + $0x598] sm:$0xff]  }
  0x7e   :  { %4272 = vmatprep.subr.bf16.mxu1 %v4704_v16  ;;  %v4764_v16 = vld [vmem:[%s6050_s1 + $0x5e0] sm:$0xff]  }
  0x7f   :  { %4251 = vmatpush3.bf16.msra.mxu0 %v4703_v15  ;;  %v4763_v15 = vld [vmem:[%s6050_s1 + $0x520] sm:$0xff]  }
  0x80   :  { %4280 = vmatprep.subr.bf16.mxu0 %v4708_v21  ;;  %v4769_v21 = vld [vmem:[%s6050_s1 + $0x5a8] sm:$0xff]  }
  0x81   :  { %4273 = vmatpush3.bf16.msra.mxu1 %v4707_v20  ;;  %v4768_v20 = vld [vmem:[%s6050_s1 + $0x5e8] sm:$0xff]  }
  0x82   :  { %3151 = vmatmul.mubr.bf16.vlgmr.msra.gmra.mrb[12].mxu0 %v3738_v18  ;;  %4302 = vmatprep.subr.bf16.mxu1 %v4712_v26  ;;  %v4766_v18 = vld [vmem:[%s6050_s1 + $0x568] sm:$0xff]   ;;  %v4774_v26 = vld [vmem:[%s6050_s1 + $0x578] sm:$0xff]  }
  0x83   :  { %4281 = vmatpush3.bf16.msra.mxu0 %v4711_v25  ;;  %3230 = vmatprep.mubr.bf16.mxu0 %v3743_v57  ;;  %v4773_v25 = vld [vmem:[%s6050_s1 + $0x5b0] sm:$0xff]   ;;  %v4803_v57 = vld [vmem:[%s6050_s1 + $0x628] sm:$0xff]  }
  0x84   :  { %3191 = vmatmul.mubr.bf16.vlgmr.msra.gmra.mrb[12].mxu1 %v3740_v23  ;;  %4282 = vmatprep.subr.bf16.mxu0 %v4714_v28  ;;  %v4771_v23 = vld [vmem:[%s6050_s1 + $0x530] sm:$0xff]   ;;  %v4776_v28 = vld [vmem:[%s6050_s1 + $0x5f8] sm:$0xff]  }
  0x85   :  { %4303 = vmatpush3.bf16.msra.mxu1 %v4713_v27  ;;  %3270 = vmatprep.mubr.bf16.mxu1 %v3745_v62  ;;  %v4775_v27 = vld [vmem:[%s6050_s1 + $0x538] sm:$0xff]   ;;  %v4808_v62 = vld [vmem:[%s6050_s1 + $0x6f0] sm:$0xff]  }
  0x86   :  { %4304 = vmatprep.subr.bf16.mxu1 %v4716_v30 }
  0x87   :  { %4283 = vmatpush3.bf16.msra.mxu0 %v4715_v29  ;;  %v25_v29 = vld [vmem:[%s6051_s0 + $0x50] sm:$0xff] }
  0x88   :  { %4284 = vmatprep.subr.bf16.mxu0 %v4718_v32  ;;  %v3746_v30 = vcombine.low %v25_v29, %v25_v29  ;;  %v4779_v32 = vld [vmem:[%s6050_s1 + $0x5b8] sm:$0xff]  }
  0x89   :  { %4305 = vmatpush3.bf16.msra.mxu1 %v4717_v31  ;;  %v3747_v31 = vcombine.high %v25_v29, %v25_v29  ;;  %v4836_v29 = vld [vmem:[%s6050_s1 + $0x7e0] sm:$0xff]  }
  0x8a   :  { %4306 = vmatprep.subr.bf16.mxu1 %v4720_v34  ;;  %v26_v34 = vld [vmem:[%s6051_s0 + $0x58] sm:$0xff] }
  0x8b   :  { %4285 = vmatpush3.bf16.msra.mxu0 %v4719_v33  ;;  %v4780_v33 = vld [vmem:[%s6050_s1 + $0x640] sm:$0xff]  }
  0x8c   :  { %4286 = vmatprep.subr.bf16.mxu0 %v4722_v36  ;;  %v3749_v36 = vcombine.high %v26_v34, %v26_v34 }
  0x8d   :  { %4307 = vmatpush3.bf16.msra.mxu1 %v4721_v35  ;;  %v3748_v35 = vcombine.low %v26_v34, %v26_v34 }
  0x8e   :  { %4308 = vmatprep.subr.bf16.mxu1 %v4724_v38  ;;  %v4784_v38 = vld [vmem:[%s6050_s1 + $0x6c0] sm:$0xff]  }
  0x8f   :  { %4287 = vmatpush3.bf16.msra.mxu0 %v4723_v37  ;;  %v4783_v37 = vld [vmem:[%s6050_s1 + $0x600] sm:$0xff]  }
  0x90   :  { %4288 = vmatprep.subr.bf16.mxu0 %v4726_v40  ;;  %v4786_v40 = vld [vmem:[%s6050_s1 + $0x648] sm:$0xff]  }
  0x91   :  { %4309 = vmatpush3.bf16.msra.mxu1 %v4725_v39  ;;  %v4785_v39 = vld [vmem:[%s6050_s1 + $0x680] sm:$0xff]  }
  0x92   :  { %4310 = vmatprep.subr.bf16.mxu1 %v4728_v42  ;;  %v4788_v42 = vld [vmem:[%s6050_s1 + $0x6c8] sm:$0xff]  }
  0x93   :  { %4289 = vmatpush3.bf16.msra.mxu0 %v4727_v41  ;;  %v4787_v41 = vld [vmem:[%s6050_s1 + $0x608] sm:$0xff]  }
  0x94   :  { %4290 = vmatprep.subr.bf16.mxu0 %v4730_v44  ;;  %v4790_v44 = vld [vmem:[%s6050_s1 + $0x650] sm:$0xff]  }
  0x95   :  { %4311 = vmatpush3.bf16.msra.mxu1 %v4729_v43  ;;  %v4789_v43 = vld [vmem:[%s6050_s1 + $0x688] sm:$0xff]  }
  0x96   :  { %4312 = vmatprep.subr.bf16.mxu1 %v4732_v46  ;;  %v4792_v46 = vld [vmem:[%s6050_s1 + $0x6d0] sm:$0xff]  }
  0x97   :  { %4291 = vmatpush3.bf16.msra.mxu0 %v4731_v45  ;;  %v4791_v45 = vld [vmem:[%s6050_s1 + $0x610] sm:$0xff]  }
  0x98   :  { %4292 = vmatprep.subr.bf16.mxu0 %v4734_v48  ;;  %v4794_v48 = vld [vmem:[%s6050_s1 + $0x658] sm:$0xff]  }
  0x99   :  { %4313 = vmatpush3.bf16.msra.mxu1 %v4733_v47  ;;  %v4793_v47 = vld [vmem:[%s6050_s1 + $0x690] sm:$0xff]  }
  0x9a   :  { %4314 = vmatprep.subr.bf16.mxu1 %v4736_v50  ;;  %v4796_v50 = vld [vmem:[%s6050_s1 + $0x6d8] sm:$0xff]  }
  0x9b   :  { %4293 = vmatpush3.bf16.msra.mxu0 %v4735_v49  ;;  %v4795_v49 = vld [vmem:[%s6050_s1 + $0x618] sm:$0xff]  }
  0x9c   :  { %4294 = vmatprep.subr.bf16.mxu0 %v4738_v52  ;;  %v4798_v52 = vld [vmem:[%s6050_s1 + $0x660] sm:$0xff]  }
  0x9d   :  { %4315 = vmatpush3.bf16.msra.mxu1 %v4737_v51  ;;  %v4797_v51 = vld [vmem:[%s6050_s1 + $0x698] sm:$0xff]  }
  0x9e   :  { %4316 = vmatprep.subr.bf16.mxu1 %v4740_v54  ;;  %v4800_v54 = vld [vmem:[%s6050_s1 + $0x6e0] sm:$0xff]  }
  0x9f   :  { %4295 = vmatpush3.bf16.msra.mxu0 %v4739_v53  ;;  %v4799_v53 = vld [vmem:[%s6050_s1 + $0x620] sm:$0xff]  }
  0xa0   :  { %4324 = vmatprep.subr.bf16.mxu0 %v4744_v59  ;;  %v4805_v59 = vld [vmem:[%s6050_s1 + $0x6a8] sm:$0xff]  }
  0xa1   :  { %4317 = vmatpush3.bf16.msra.mxu1 %v4743_v58  ;;  %v4804_v58 = vld [vmem:[%s6050_s1 + $0x6e8] sm:$0xff]  }
  0xa2   :  { %3231 = vmatmul.mubr.bf16.vlgmr.msra.gmra.mrb[16].mxu0 %v3742_v56  ;;  %4346 = vmatprep.subr.bf16.mxu1 %v4748_v0  ;;  %v4802_v56 = vld [vmem:[%s6050_s1 + $0x668] sm:$0xff]   ;;  %v4810_v0 = vld [vmem:[%s6050_s1 + $0x678] sm:$0xff]  }
  0xa3   :  { %4325 = vmatpush3.bf16.msra.mxu0 %v4747_v63  ;;  %3310 = vmatprep.mubr.bf16.mxu0 %v3747_v31  ;;  %v4809_v63 = vld [vmem:[%s6050_s1 + $0x6b0] sm:$0xff]   ;;  %v4837_v31 = vld [vmem:[%s6050_s1 + $0x7a0] sm:$0xff]  }
  0xa4   :  { %3271 = vmatmul.mubr.bf16.vlgmr.msra.gmra.mrb[16].mxu1 %v3744_v61  ;;  %4326 = vmatprep.subr.bf16.mxu0 %v4750_v2  ;;  %v4807_v61 = vld [vmem:[%s6050_s1 + $0x630] sm:$0xff]   ;;  %v4812_v2 = vld [vmem:[%s6050_s1 + $0x6f8] sm:$0xff]  }
  0xa5   :  { %4347 = vmatpush3.bf16.msra.mxu1 %v4749_v1  ;;  %3350 = vmatprep.mubr.bf16.mxu1 %v3749_v36  ;;  %v4811_v1 = vld [vmem:[%s6050_s1 + $0x638] sm:$0xff]  }
  0xa6   :  { %4348 = vmatprep.subr.bf16.mxu1 %v4752_v4 }
  0xa7   :  { %4327 = vmatpush3.bf16.msra.mxu0 %v4751_v3  ;;  %v27_v3 = vld [vmem:[%s6051_s0 + $0x60] sm:$0xff] }
  0xa8   :  { %4328 = vmatprep.subr.bf16.mxu0 %v4754_v6  ;;  %v3750_v4 = vcombine.low %v27_v3, %v27_v3  ;;  %v4815_v6 = vld [vmem:[%s6050_s1 + $0x6b8] sm:$0xff]  }
  0xa9   :  { %4349 = vmatpush3.bf16.msra.mxu1 %v4753_v5  ;;  %v3751_v5 = vcombine.high %v27_v3, %v27_v3  ;;  %v4860_v3 = vld [vmem:[%s6050_s1 + $0x8c8] sm:$0xff]  }
  0xaa   :  { %4350 = vmatprep.subr.bf16.mxu1 %v4756_v8  ;;  %v28_v8 = vld [vmem:[%s6051_s0 + $0x68] sm:$0xff] }
  0xab   :  { %4329 = vmatpush3.bf16.msra.mxu0 %v4755_v7  ;;  %v4816_v7 = vld [vmem:[%s6050_s1 + $0x740] sm:$0xff]  }
  0xac   :  { %4330 = vmatprep.subr.bf16.mxu0 %v4758_v10  ;;  %v3753_v10 = vcombine.high %v28_v8, %v28_v8 }
  0xad   :  { %4351 = vmatpush3.bf16.msra.mxu1 %v4757_v9  ;;  %v3752_v9 = vcombine.low %v28_v8, %v28_v8  ;;  %v4865_v8 = vld [vmem:[%s6050_s1 + $0x890] sm:$0xff]  }
  0xae   :  { %4352 = vmatprep.subr.bf16.mxu1 %v4760_v12  ;;  %v4820_v12 = vld [vmem:[%s6050_s1 + $0x7c0] sm:$0xff]  }
  0xaf   :  { %4331 = vmatpush3.bf16.msra.mxu0 %v4759_v11  ;;  %v4819_v11 = vld [vmem:[%s6050_s1 + $0x700] sm:$0xff]  }
  0xb0   :  { %4332 = vmatprep.subr.bf16.mxu0 %v4762_v14  ;;  %v4822_v14 = vld [vmem:[%s6050_s1 + $0x748] sm:$0xff]  }
  0xb1   :  { %4353 = vmatpush3.bf16.msra.mxu1 %v4761_v13  ;;  %v4821_v13 = vld [vmem:[%s6050_s1 + $0x780] sm:$0xff]  }
  0xb2   :  { %4354 = vmatprep.subr.bf16.mxu1 %v4764_v16  ;;  %v4824_v16 = vld [vmem:[%s6050_s1 + $0x7c8] sm:$0xff]  }
  0xb3   :  { %4333 = vmatpush3.bf16.msra.mxu0 %v4763_v15  ;;  %v4823_v15 = vld [vmem:[%s6050_s1 + $0x708] sm:$0xff]  }
  0xb4   :  { %4334 = vmatprep.subr.bf16.mxu0 %v4766_v18  ;;  %v4826_v18 = vld [vmem:[%s6050_s1 + $0x750] sm:$0xff]  }
  0xb5   :  { %4355 = vmatpush3.bf16.msra.mxu1 %v4765_v17  ;;  %v4825_v17 = vld [vmem:[%s6050_s1 + $0x788] sm:$0xff]  }
  0xb6   :  { %4356 = vmatprep.subr.bf16.mxu1 %v4768_v20  ;;  %v4828_v20 = vld [vmem:[%s6050_s1 + $0x7d0] sm:$0xff]  }
  0xb7   :  { %4335 = vmatpush3.bf16.msra.mxu0 %v4767_v19  ;;  %v4827_v19 = vld [vmem:[%s6050_s1 + $0x710] sm:$0xff]  }
  0xb8   :  { %4336 = vmatprep.subr.bf16.mxu0 %v4770_v22  ;;  %v4830_v22 = vld [vmem:[%s6050_s1 + $0x758] sm:$0xff]  }
  0xb9   :  { %4357 = vmatpush3.bf16.msra.mxu1 %v4769_v21  ;;  %v4829_v21 = vld [vmem:[%s6050_s1 + $0x790] sm:$0xff]  }
  0xba   :  { %4358 = vmatprep.subr.bf16.mxu1 %v4772_v24  ;;  %v4832_v24 = vld [vmem:[%s6050_s1 + $0x7d8] sm:$0xff]  }
  0xbb   :  { %4337 = vmatpush3.bf16.msra.mxu0 %v4771_v23  ;;  %v4831_v23 = vld [vmem:[%s6050_s1 + $0x718] sm:$0xff]  }
  0xbc   :  { %4338 = vmatprep.subr.bf16.mxu0 %v4774_v26  ;;  %v4834_v26 = vld [vmem:[%s6050_s1 + $0x760] sm:$0xff]  }
  0xbd   :  { %4359 = vmatpush3.bf16.msra.mxu1 %v4773_v25  ;;  %v4833_v25 = vld [vmem:[%s6050_s1 + $0x798] sm:$0xff]  }
  0xbe   :  { %4360 = vmatprep.subr.bf16.mxu1 %v4776_v28 }
  0xbf   :  { %4339 = vmatpush3.bf16.msra.mxu0 %v4775_v27  ;;  %v4835_v27 = vld [vmem:[%s6050_s1 + $0x720] sm:$0xff]  }
  0xc0   :  { %4368 = vmatprep.subr.bf16.mxu0 %v4780_v33 }
  0xc1   :  { %4361 = vmatpush3.bf16.msra.mxu1 %v4779_v32  ;;  %v3725_v32 = vld [vmem:[%s6052_s2] ss:$0 sm:$0xff] }
  0xc2   :  { %3311 = vmatmul.mubr.bf16.vlgmr.msra.gmra.mrb[20].mxu0 %v3746_v30  ;;  %4390 = vmatprep.subr.bf16.mxu1 %v4784_v38  ;;  %v4839_v38 = vld [vmem:[%s6050_s1 + $0x728] sm:$0xff]  }
  0xc3   :  { %4369 = vmatpush3.bf16.msra.mxu0 %v4783_v37  ;;  %3390 = vmatprep.mubr.bf16.mxu0 %v3751_v5  ;;  %v4862_v5 = vld [vmem:[%s6050_s1 + $0x850] sm:$0xff]  }
  0xc4   :  { %3351 = vmatmul.mubr.bf16.vlgmr.msra.gmra.mrb[20].mxu1 %v3748_v35  ;;  %4370 = vmatprep.subr.bf16.mxu0 %v4786_v40  ;;  %v4838_v35 = vld [vmem:[%s6050_s1 + $0x768] sm:$0xff]  }
  0xc5   :  { %4391 = vmatpush3.bf16.msra.mxu1 %v4785_v39  ;;  %3430 = vmatprep.mubr.bf16.mxu1 %v3753_v10  ;;  %v4867_v10 = vld [vmem:[%s6050_s1 + $0x818] sm:$0xff]  }
  0xc6   :  { %4392 = vmatprep.subr.bf16.mxu1 %v4788_v42 }
  0xc7   :  { %4371 = vmatpush3.bf16.msra.mxu0 %v4787_v41  ;;  %v4840_v41 = vld [vmem:[%s6050_s1 + $0x7e8] sm:$0xff]  }
  0xc8   :  { %4372 = vmatprep.subr.bf16.mxu0 %v4790_v44 }
  0xc9   :  { %4393 = vmatpush3.bf16.msra.mxu1 %v4789_v43  ;;  %v4841_v43 = vld [vmem:[%s6050_s1 + $0x7a8] sm:$0xff]  }
  0xca   :  { %4394 = vmatprep.subr.bf16.mxu1 %v4792_v46 }
  0xcb   :  { %4373 = vmatpush3.bf16.msra.mxu0 %v4791_v45  ;;  %v4842_v45 = vld [vmem:[%s6050_s1 + $0x770] sm:$0xff]  }
  0xcc   :  { %4374 = vmatprep.subr.bf16.mxu0 %v4794_v48  ;;  %v4843_v48 = vld [vmem:[%s6050_s1 + $0x730] sm:$0xff]  }
  0xcd   :  { %4395 = vmatpush3.bf16.msra.mxu1 %v4793_v47 }
  0xce   :  { %4396 = vmatprep.subr.bf16.mxu1 %v4796_v50  ;;  %v4845_v50 = vld [vmem:[%s6050_s1 + $0x7b0] sm:$0xff]  }
  0xcf   :  { %4375 = vmatpush3.bf16.msra.mxu0 %v4795_v49  ;;  %v4844_v49 = vld [vmem:[%s6050_s1 + $0x7f0] sm:$0xff]  }
  0xd0   :  { %4376 = vmatprep.subr.bf16.mxu0 %v4798_v52  ;;  %v4847_v52 = vld [vmem:[%s6050_s1 + $0x738] sm:$0xff]  }
  0xd1   :  { %4397 = vmatpush3.bf16.msra.mxu1 %v4797_v51  ;;  %v4846_v51 = vld [vmem:[%s6050_s1 + $0x778] sm:$0xff]  }
  0xd2   :  { %4398 = vmatprep.subr.bf16.mxu1 %v4800_v54  ;;  %v29_v54 = vld [vmem:[%s6051_s0 + $0x70] sm:$0xff] }
  0xd3   :  { %4377 = vmatpush3.bf16.msra.mxu0 %v4799_v53  ;;  %v4848_v53 = vld [vmem:[%s6050_s1 + $0x7f8] sm:$0xff]  }
  0xd4   :  { %4378 = vmatprep.subr.bf16.mxu0 %v4802_v56  ;;  %v3755_v56 = vcombine.high %v29_v54, %v29_v54 }
  0xd5   :  { %4399 = vmatpush3.bf16.msra.mxu1 %v4801_v55  ;;  %v3754_v55 = vcombine.low %v29_v54, %v29_v54  ;;  %v4897_v54 = vld [vmem:[%s6050_s1 + $0x988] sm:$0xff]  }
  0xd6   :  { %4400 = vmatprep.subr.bf16.mxu1 %v4804_v58  ;;  %v4852_v58 = vld [vmem:[%s6050_s1 + $0x840] sm:$0xff]  }
  0xd7   :  { %4379 = vmatpush3.bf16.msra.mxu0 %v4803_v57  ;;  %v4851_v57 = vld [vmem:[%s6050_s1 + $0x7b8] sm:$0xff]  }
  0xd8   :  { %4380 = vmatprep.subr.bf16.mxu0 %v4806_v60 }
  0xd9   :  { %4401 = vmatpush3.bf16.msra.mxu1 %v4805_v59  ;;  %v30_v59 = vld [vmem:[%s6051_s0 + $0x78] sm:$0xff] }
  0xda   :  { %4402 = vmatprep.subr.bf16.mxu1 %v4808_v62  ;;  %v3756_v60 = vcombine.low %v30_v59, %v30_v59  ;;  %v4855_v62 = vld [vmem:[%s6050_s1 + $0x800] sm:$0xff]  }
  0xdb   :  { %4381 = vmatpush3.bf16.msra.mxu0 %v4807_v61  ;;  %v3757_v61 = vcombine.high %v30_v59, %v30_v59  ;;  %v4902_v59 = vld [vmem:[%s6050_s1 + $0x958] sm:$0xff]  }
  0xdc   :  { %4382 = vmatprep.subr.bf16.mxu0 %v4810_v0  ;;  %v4857_v0 = vld [vmem:[%s6050_s1 + $0x880] sm:$0xff]  }
  0xdd   :  { %4403 = vmatpush3.bf16.msra.mxu1 %v4809_v63  ;;  %v4856_v63 = vld [vmem:[%s6050_s1 + $0x8c0] sm:$0xff]  }
  0xde   :  { %4404 = vmatprep.subr.bf16.mxu1 %v4812_v2  ;;  %v4859_v2 = vld [vmem:[%s6050_s1 + $0x808] sm:$0xff]  }
  0xdf   :  { %4383 = vmatpush3.bf16.msra.mxu0 %v4811_v1  ;;  %v4858_v1 = vld [vmem:[%s6050_s1 + $0x848] sm:$0xff]  }
  0xe0   :  { %4412 = vmatprep.subr.bf16.mxu0 %v4816_v7  ;;  %v4864_v7 = vld [vmem:[%s6050_s1 + $0x8d0] sm:$0xff]  }
  0xe1   :  { %4405 = vmatpush3.bf16.msra.mxu1 %v4815_v6  ;;  %v4863_v6 = vld [vmem:[%s6050_s1 + $0x810] sm:$0xff]  }
  0xe2   :  { %3391 = vmatmul.mubr.bf16.vlgmr.msra.gmra.mrb[24].mxu0 %v3750_v4  ;;  %4434 = vmatprep.subr.bf16.mxu1 %v4820_v12  ;;  %v4861_v4 = vld [vmem:[%s6050_s1 + $0x888] sm:$0xff]   ;;  %v4869_v12 = vld [vmem:[%s6050_s1 + $0x898] sm:$0xff]  }
  0xe3   :  { %4413 = vmatpush3.bf16.msra.mxu0 %v4819_v11  ;;  %3470 = vmatprep.mubr.bf16.mxu0 %v3755_v56  ;;  %v4868_v11 = vld [vmem:[%s6050_s1 + $0x8d8] sm:$0xff]   ;;  %v4899_v56 = vld [vmem:[%s6050_s1 + $0x910] sm:$0xff]  }
  0xe4   :  { %3431 = vmatmul.mubr.bf16.vlgmr.msra.gmra.mrb[24].mxu1 %v3752_v9  ;;  %4414 = vmatprep.subr.bf16.mxu0 %v4822_v14  ;;  %v4866_v9 = vld [vmem:[%s6050_s1 + $0x858] sm:$0xff]  }
  0xe5   :  { %4435 = vmatpush3.bf16.msra.mxu1 %v4821_v13  ;;  %3510 = vmatprep.mubr.bf16.mxu1 %v3757_v61  ;;  %v4870_v13 = vld [vmem:[%s6050_s1 + $0x860] sm:$0xff]   ;;  %v4904_v61 = vld [vmem:[%s6050_s1 + $0x9d8] sm:$0xff]  }
  0xe6   :  { %4436 = vmatprep.subr.bf16.mxu1 %v4824_v16 }
  0xe7   :  { %4415 = vmatpush3.bf16.msra.mxu0 %v4823_v15  ;;  %v4871_v15 = vld [vmem:[%s6050_s1 + $0x820] sm:$0xff]  }
  0xe8   :  { %4416 = vmatprep.subr.bf16.mxu0 %v4826_v18 }
  0xe9   :  { %4437 = vmatpush3.bf16.msra.mxu1 %v4825_v17  ;;  %v4872_v17 = vld [vmem:[%s6050_s1 + $0x8e0] sm:$0xff]  }
  0xea   :  { %4438 = vmatprep.subr.bf16.mxu1 %v4828_v20  ;;  %v4873_v20 = vld [vmem:[%s6050_s1 + $0x8a0] sm:$0xff]  }
  0xeb   :  { %4417 = vmatpush3.bf16.msra.mxu0 %v4827_v19 }
  0xec   :  { %4418 = vmatprep.subr.bf16.mxu0 %v4830_v22 }
  0xed   :  { %4439 = vmatpush3.bf16.msra.mxu1 %v4829_v21 }
  0xee   :  { %4440 = vmatprep.subr.bf16.mxu1 %v4832_v24 }
  0xef   :  { %4419 = vmatpush3.bf16.msra.mxu0 %v4831_v23  ;;  %v4874_v23 = vld [vmem:[%s6050_s1 + $0x868] sm:$0xff]  }
  0xf0   :  { %4420 = vmatprep.subr.bf16.mxu0 %v4834_v26 }
  0xf1   :  { %4441 = vmatpush3.bf16.msra.mxu1 %v4833_v25  ;;  %v4875_v25 = vld [vmem:[%s6050_s1 + $0x828] sm:$0xff]  }
  0xf2   :  { %4442 = vmatprep.subr.bf16.mxu1 %v4836_v29 }
  0xf3   :  { %4421 = vmatpush3.bf16.msra.mxu0 %v4835_v27 }
  0xf4   :  { %4422 = vmatprep.subr.bf16.mxu0 %v4838_v35  ;;  %v4880_v35 = vld [vmem:[%s6050_s1 + $0x8f0] sm:$0xff]  }
  0xf5   :  { %v4120_v28 = vpop.f32.mrb[0].mxu0  ;;  %4443 = vmatpush3.bf16.msra.mxu1 %v4837_v31 }
  0xf6   :  { %v4121_v30 = vpop.f32.mrb[1].mxu0  ;;  %4444 = vmatprep.subr.bf16.mxu1 %v4840_v41 }
  0xf7   :  { %v4122_v33 = vadd.f32 %v4121_v30, %v4120_v28  ;;  %v4123_v34 = vpop.f32.mrb[2].mxu0  ;;  %v4142_v36 = vpop.f32.mrb[0].mxu1  ;;  %4423 = vmatpush3.bf16.msra.mxu0 %v4839_v38  ;;  %v4876_v28 = vld [vmem:[%s6050_s1 + $0x8e8] sm:$0xff]   ;;  %v4883_v38 = vld [vmem:[%s6050_s1 + $0x838] sm:$0xff]  }
  0xf8   :  { %v4124_v39 = vpop.f32.mrb[3].mxu0  ;;  %v4143_v40 = vpop.f32.mrb[1].mxu1  ;;  %4424 = vmatprep.subr.bf16.mxu0 %v4842_v45  ;;  %v4877_v30 = vld [vmem:[%s6050_s1 + $0x8a8] sm:$0xff]   ;;  %v4879_v34 = vld [vmem:[%s6050_s1 + $0x830] sm:$0xff]  }
  0xf9   :  { %v2913_v37 = vadd.f32 %v4122_v33, %v3725_v32  ;;  %v4144_v42 = vadd.f32 %v4143_v40, %v4142_v36  ;;  %v4145_v44 = vpop.f32.mrb[2].mxu1  ;;  %4445 = vmatpush3.bf16.msra.mxu1 %v4841_v43  ;;  %v4878_v33 = vld [vmem:[%s6050_s1 + $0x870] sm:$0xff]   ;;  %v4884_v39 = vld [vmem:[%s6050_s1 + $0x8f8] sm:$0xff]   ;;  %v31_v40 = vld [vmem:[%s6051_s0 + $0x80] sm:$0xff] }
  0xfa   :  { %v4146_v46 = vpop.f32.mrb[3].mxu1  ;;  %4446 = vmatprep.subr.bf16.mxu1 %v4844_v49  ;;  %v4881_v36 = vld [vmem:[%s6050_s1 + $0x8b0] sm:$0xff]   ;;  %v3758_v41 = vcombine.low %v31_v40, %v31_v40  ;;  %v4887_v43 = vld [vmem:[%s6050_s1 + $0x8b8] sm:$0xff]   ;;  %v4888_v44 = vld [vmem:[%s6050_s1 + $0x940] sm:$0xff]  }
  0xfb   :  { %v5756_v47 = vadd.f32 %v4144_v42, %v2913_v37  ;;  %4425 = vmatpush3.bf16.msra.mxu0 %v4843_v48  ;;  %v4882_v37 = vld [vmem:[%s6050_s1 + $0x878] sm:$0xff]   ;;  %v3759_v42 = vcombine.high %v31_v40, %v31_v40  ;;  %v32_v45 = vld [vmem:[%s6051_s0 + $0x88] sm:$0xff]  ;;  %v4891_v48 = vld [vmem:[%s6050_s1 + $0x900] sm:$0xff]  }
  0xfc   :  { %4426 = vmatprep.subr.bf16.mxu0 %v4846_v51  ;;  %v3760_v46 = vcombine.low %v32_v45, %v32_v45  ;;  %v4892_v49 = vld [vmem:[%s6050_s1 + $0x9c0] sm:$0xff]   ;;  %v4894_v51 = vld [vmem:[%s6050_s1 + $0x948] sm:$0xff]   ;;  %v4933_v40 = vld [vmem:[%s6050_s1 + $0xa18] sm:$0xff]  }
  0xfd   :  { %4447 = vmatpush3.bf16.msra.mxu1 %v4845_v50  ;;  %v4893_v50 = vld [vmem:[%s6050_s1 + $0x980] sm:$0xff]  }
  0xfe   :  { %4448 = vmatprep.subr.bf16.mxu1 %v4848_v53  ;;  %v4896_v53 = vld [vmem:[%s6050_s1 + $0x9c8] sm:$0xff]  }
  0xff   :  { %4427 = vmatpush3.bf16.msra.mxu0 %v4847_v52  ;;  %v4895_v52 = vld [vmem:[%s6050_s1 + $0x908] sm:$0xff]  }
 0x100   :  { %4456 = vmatprep.subr.bf16.mxu0 %v4852_v58  ;;  %v4901_v58 = vld [vmem:[%s6050_s1 + $0x990] sm:$0xff]  }
 0x101   :  { %4449 = vmatpush3.bf16.msra.mxu1 %v4851_v57  ;;  %v4900_v57 = vld [vmem:[%s6050_s1 + $0x9d0] sm:$0xff]  }
 0x102   :  { %3471 = vmatmul.mubr.bf16.vlgmr.msra.gmra.mrb[28].mxu0 %v3754_v55  ;;  %4478 = vmatprep.subr.bf16.mxu1 %v4856_v63  ;;  %v4898_v55 = vld [vmem:[%s6050_s1 + $0x950] sm:$0xff]   ;;  %v4906_v63 = vld [vmem:[%s6050_s1 + $0x960] sm:$0xff]  }
 0x103   :  { %4457 = vmatpush3.bf16.msra.mxu0 %v4855_v62  ;;  %3550 = vmatprep.mubr.bf16.mxu0 %v3759_v42  ;;  %v4905_v62 = vld [vmem:[%s6050_s1 + $0x998] sm:$0xff]   ;;  %v4935_v42 = vld [vmem:[%s6050_s1 + $0xa20] sm:$0xff]  }
 0x104   :  { %3511 = vmatmul.mubr.bf16.vlgmr.msra.gmra.mrb[28].mxu1 %v3756_v60  ;;  %4458 = vmatprep.subr.bf16.mxu0 %v4858_v1  ;;  %v4903_v60 = vld [vmem:[%s6050_s1 + $0x918] sm:$0xff]   ;;  %v4907_v1 = vld [vmem:[%s6050_s1 + $0x920] sm:$0xff]  }
 0x105   :  { %4479 = vmatpush3.bf16.msra.mxu1 %v4857_v0 }
 0x106   :  { %4480 = vmatprep.subr.bf16.mxu1 %v4860_v3  ;;  %v4908_v3 = vld [vmem:[%s6050_s1 + $0x9e0] sm:$0xff]  }
 0x107   :  { %4459 = vmatpush3.bf16.msra.mxu0 %v4859_v2 }
 0x108   :  { %4460 = vmatprep.subr.bf16.mxu0 %v4862_v5 }
 0x109   :  { %4481 = vmatpush3.bf16.msra.mxu1 %v4861_v4 }
 0x10a   :  { %4482 = vmatprep.subr.bf16.mxu1 %v4864_v7 }
 0x10b   :  { %4461 = vmatpush3.bf16.msra.mxu0 %v4863_v6  ;;  %v4909_v6 = vld [vmem:[%s6050_s1 + $0x9a0] sm:$0xff]  }
 0x10c   :  { %4462 = vmatprep.subr.bf16.mxu0 %v4866_v9  ;;  %v4910_v9 = vld [vmem:[%s6050_s1 + $0x968] sm:$0xff]  }
 0x10d   :  { %4483 = vmatpush3.bf16.msra.mxu1 %v4865_v8 }
 0x10e   :  { %4484 = vmatprep.subr.bf16.mxu1 %v4868_v11  ;;  %v4911_v11 = vld [vmem:[%s6050_s1 + $0x928] sm:$0xff]  }
 0x10f   :  { %4463 = vmatpush3.bf16.msra.mxu0 %v4867_v10 }
 0x110   :  { %4464 = vmatprep.subr.bf16.mxu0 %v4870_v13 }
 0x111   :  { %4485 = vmatpush3.bf16.msra.mxu1 %v4869_v12 }
 0x112   :  { %4486 = vmatprep.subr.bf16.mxu1 %v4872_v17 }
 0x113   :  { %4465 = vmatpush3.bf16.msra.mxu0 %v4871_v15 }
 0x114   :  { %4466 = vmatprep.subr.bf16.mxu0 %v4874_v23  ;;  %v4918_v23 = vld [vmem:[%s6050_s1 + $0x978] sm:$0xff]  }
 0x115   :  { %v4164_v14 = vpop.f32.mrb[4].mxu0  ;;  %4487 = vmatpush3.bf16.msra.mxu1 %v4873_v20  ;;  %v4915_v20 = vld [vmem:[%s6050_s1 + $0x930] sm:$0xff]  }
 0x116   :  { %v4165_v16 = vpop.f32.mrb[5].mxu0  ;;  %4488 = vmatprep.subr.bf16.mxu1 %v4876_v28 }
 0x117   :  { %v4166_v18 = vadd.f32 %v4165_v16, %v4164_v14  ;;  %v4167_v19 = vpop.f32.mrb[6].mxu0  ;;  %v4186_v21 = vpop.f32.mrb[4].mxu1  ;;  %4467 = vmatpush3.bf16.msra.mxu0 %v4875_v25  ;;  %v4912_v14 = vld [vmem:[%s6050_s1 + $0x9e8] sm:$0xff]   ;;  %v4920_v25 = vld [vmem:[%s6050_s1 + $0x9f8] sm:$0xff]  }
 0x118   :  { %v4168_v24 = vpop.f32.mrb[7].mxu0  ;;  %v4187_v26 = vpop.f32.mrb[5].mxu1  ;;  %4468 = vmatprep.subr.bf16.mxu0 %v4878_v33  ;;  %v4913_v16 = vld [vmem:[%s6050_s1 + $0x9a8] sm:$0xff]   ;;  %v4914_v19 = vld [vmem:[%s6050_s1 + $0x970] sm:$0xff]  }
 0x119   :  { %v2993_v22 = vadd.f32 %v4166_v18, %v5756_v47  ;;  %v4188_v27 = vadd.f32 %v4187_v26, %v4186_v21  ;;  %v4189_v29 = vpop.f32.mrb[6].mxu1  ;;  %4489 = vmatpush3.bf16.msra.mxu1 %v4877_v30  ;;  %v3761_v47 = vcombine.high %v32_v45, %v32_v45  ;;  %v4916_v21 = vld [vmem:[%s6050_s1 + $0x9f0] sm:$0xff]   ;;  %v4919_v24 = vld [vmem:[%s6050_s1 + $0x938] sm:$0xff]   ;;  %v4924_v30 = vld [vmem:[%s6050_s1 + $0xa40] sm:$0xff]  }
 0x11a   :  { %v4190_v31 = vpop.f32.mrb[7].mxu1  ;;  %4490 = vmatprep.subr.bf16.mxu1 %v4880_v35  ;;  %v33_v26 = vld [vmem:[%s6051_s0 + $0x90] sm:$0xff]  ;;  %v4923_v29 = vld [vmem:[%s6050_s1 + $0x9b8] sm:$0xff]   ;;  %v4928_v35 = vld [vmem:[%s6050_s1 + $0xa48] sm:$0xff]  }
 0x11b   :  { %v5858_v32 = vadd.f32 %v4188_v27, %v2993_v22  ;;  %4469 = vmatpush3.bf16.msra.mxu0 %v4879_v34  ;;  %3590 = vmatprep.mubr.bf16.mxu1 %v3761_v47  ;;  %v4917_v22 = vld [vmem:[%s6050_s1 + $0x9b0] sm:$0xff]   ;;  %v3762_v27 = vcombine.low %v33_v26, %v33_v26  ;;  %v3763_v28 = vcombine.high %v33_v26, %v33_v26  ;;  %v34_v31 = vld [vmem:[%s6051_s0 + $0x98] sm:$0xff]  ;;  %v4927_v34 = vld [vmem:[%s6050_s1 + $0xa00] sm:$0xff]  }
 0x11c   :  { %4470 = vmatprep.subr.bf16.mxu0 %v4882_v37  ;;  %v3765_v33 = vcombine.high %v34_v31, %v34_v31  ;;  %v4930_v37 = vld [vmem:[%s6050_s1 + $0xa50] sm:$0xff]  }
 0x11d   :  { %4491 = vmatpush3.bf16.msra.mxu1 %v4881_v36  ;;  %v4929_v36 = vld [vmem:[%s6050_s1 + $0xa08] sm:$0xff]  }
 0x11e   :  { %4492 = vmatprep.subr.bf16.mxu1 %v4884_v39  ;;  %v4932_v39 = vld [vmem:[%s6050_s1 + $0xa58] sm:$0xff]  }
 0x11f   :  { %4471 = vmatpush3.bf16.msra.mxu0 %v4883_v38  ;;  %v4931_v38 = vld [vmem:[%s6050_s1 + $0xa10] sm:$0xff]  }
 0x120   :  { %4500 = vmatprep.subr.bf16.mxu0 %v4888_v44  ;;  %v35_v44 = vld [vmem:[%s6051_s0 + $0xa0] sm:$0xff] }
 0x121   :  { %4493 = vmatpush3.bf16.msra.mxu1 %v4887_v43  ;;  %v4936_v43 = vld [vmem:[%s6050_s1 + $0xa68] sm:$0xff]  }
 0x122   :  { %3551 = vmatmul.mubr.bf16.vlgmr.msra.gmra.mrb[32].mxu0 %v3758_v41  ;;  %4522 = vmatprep.subr.bf16.mxu1 %v4892_v49  ;;  %v4934_v41 = vld [vmem:[%s6050_s1 + $0xa60] sm:$0xff]  }
 0x123   :  { %4501 = vmatpush3.bf16.msra.mxu0 %v4891_v48  ;;  %3630 = vmatprep.mubr.bf16.mxu0 %v3763_v28 }
 0x124   :  { %3591 = vmatmul.mubr.bf16.vlgmr.msra.gmra.mrb[32].mxu1 %v3760_v46  ;;  %4502 = vmatprep.subr.bf16.mxu0 %v4894_v51  ;;  %v3767_v46 = vcombine.high %v35_v44, %v35_v44  ;;  %v4937_v51 = vld [vmem:[%s6050_s1 + $0xa28] sm:$0xff]  }
 0x125   :  { %4523 = vmatpush3.bf16.msra.mxu1 %v4893_v50  ;;  %3670 = vmatprep.mubr.bf16.mxu1 %v3765_v33 }
 0x126   :  { %4524 = vmatprep.subr.bf16.mxu1 %v4896_v53 }
 0x127   :  { %4503 = vmatpush3.bf16.msra.mxu0 %v4895_v52 }
 0x128   :  { %4504 = vmatprep.subr.bf16.mxu0 %v4898_v55 }
 0x129   :  { %4525 = vmatpush3.bf16.msra.mxu1 %v4897_v54  ;;  %v4938_v54 = vld [vmem:[%s6050_s1 + $0xa70] sm:$0xff]  }
 0x12a   :  { %4526 = vmatprep.subr.bf16.mxu1 %v4900_v57 }
 0x12b   :  { %4505 = vmatpush3.bf16.msra.mxu0 %v4899_v56 }
 0x12c   :  { %4506 = vmatprep.subr.bf16.mxu0 %v4902_v59 }
 0x12d   :  { %4527 = vmatpush3.bf16.msra.mxu1 %v4901_v58 }
 0x12e   :  { %4528 = vmatprep.subr.bf16.mxu1 %v4904_v61  ;;  %v4940_v61 = vld [vmem:[%s6050_s1 + $0xa78] sm:$0xff]  }
 0x12f   :  { %4507 = vmatpush3.bf16.msra.mxu0 %v4903_v60  ;;  %v4939_v60 = vld [vmem:[%s6050_s1 + $0xa30] sm:$0xff]  }
 0x130   :  { %4508 = vmatprep.subr.bf16.mxu0 %v4906_v63  ;;  %v3766_v63 = vcombine.low %v35_v44, %v35_v44 }
 0x131   :  { %4529 = vmatpush3.bf16.msra.mxu1 %v4905_v62  ;;  %v4941_v62 = vld [vmem:[%s6050_s1 + $0xa38] sm:$0xff]  }
 0x132   :  { %4530 = vmatprep.subr.bf16.mxu1 %v4908_v3 }
 0x133   :  { %4509 = vmatpush3.bf16.msra.mxu0 %v4907_v1 }
 0x134   :  { %4510 = vmatprep.subr.bf16.mxu0 %v4910_v9 }
 0x135   :  { %v4208_v0 = vpop.f32.mrb[8].mxu0  ;;  %4531 = vmatpush3.bf16.msra.mxu1 %v4909_v6 }
 0x136   :  { %v4209_v2 = vpop.f32.mrb[9].mxu0  ;;  %4532 = vmatprep.subr.bf16.mxu1 %v4912_v14 }
 0x137   :  { %v4210_v4 = vadd.f32 %v4209_v2, %v4208_v0  ;;  %v4211_v5 = vpop.f32.mrb[10].mxu0  ;;  %v4230_v7 = vpop.f32.mrb[8].mxu1  ;;  %4511 = vmatpush3.bf16.msra.mxu0 %v4911_v11 }
 0x138   :  { %v4212_v10 = vpop.f32.mrb[11].mxu0  ;;  %v4231_v12 = vpop.f32.mrb[9].mxu1  ;;  %4512 = vmatprep.subr.bf16.mxu0 %v4914_v19 }
 0x139   :  { %v3073_v8 = vadd.f32 %v4210_v4, %v5858_v32  ;;  %v4232_v13 = vadd.f32 %v4231_v12, %v4230_v7  ;;  %v4233_v15 = vpop.f32.mrb[10].mxu1  ;;  %4533 = vmatpush3.bf16.msra.mxu1 %v4913_v16  ;;  %v3764_v32 = vcombine.low %v34_v31, %v34_v31 }
 0x13a   :  { %v4234_v17 = vpop.f32.mrb[11].mxu1  ;;  %4534 = vmatprep.subr.bf16.mxu1 %v4916_v21 }
 0x13b   :  { %v5963_v18 = vadd.f32 %v4232_v13, %v3073_v8  ;;  %4513 = vmatpush3.bf16.msra.mxu0 %v4915_v20 }
 0x13c   :  { %4514 = vmatprep.subr.bf16.mxu0 %v4918_v23 }
 0x13d   :  { %4535 = vmatpush3.bf16.msra.mxu1 %v4917_v22 }
 0x13e   :  { %4536 = vmatprep.subr.bf16.mxu1 %v4920_v25 }
 0x13f   :  { %4515 = vmatpush3.bf16.msra.mxu0 %v4919_v24 }
 0x140   :  { %4544 = vmatprep.subr.bf16.mxu0 %v4924_v30 }
 0x141   :  { %4537 = vmatpush3.bf16.msra.mxu1 %v4923_v29 }
 0x142   :  { %3631 = vmatmul.mubr.bf16.vlgmr.msra.gmra.mrb[36].mxu0 %v3762_v27 }
 0x143   :  { %4545 = vmatpush3.bf16.msra.mxu0 %v4927_v34  ;;  %3710 = vmatprep.mubr.bf16.mxu0 %v3767_v46 }
 0x144   :  { %3671 = vmatmul.mubr.bf16.vlgmr.msra.gmra.mrb[36].mxu1 %v3764_v32  ;;  %4546 = vmatprep.subr.bf16.mxu0 %v4928_v35 }
 0x147   :  { %4547 = vmatpush3.bf16.msra.mxu0 %v4929_v36 }
 0x148   :  { %4548 = vmatprep.subr.bf16.mxu0 %v4930_v37 }
 0x14b   :  { %4549 = vmatpush3.bf16.msra.mxu0 %v4931_v38 }
 0x14c   :  { %4550 = vmatprep.subr.bf16.mxu0 %v4932_v39 }
 0x14f   :  { %4551 = vmatpush3.bf16.msra.mxu0 %v4933_v40 }
 0x150   :  { %4552 = vmatprep.subr.bf16.mxu0 %v4934_v41 }
 0x153   :  { %4553 = vmatpush3.bf16.msra.mxu0 %v4935_v42 }
 0x154   :  { %4554 = vmatprep.subr.bf16.mxu0 %v4936_v43 }
 0x155   :  { %v4252_v45 = vpop.f32.mrb[12].mxu0 }
 0x156   :  { %v4253_v47 = vpop.f32.mrb[13].mxu0 }
 0x157   :  { %v4254_v48 = vadd.f32 %v4253_v47, %v4252_v45  ;;  %v4255_v49 = vpop.f32.mrb[14].mxu0  ;;  %v4274_v50 = vpop.f32.mrb[12].mxu1  ;;  %4555 = vmatpush3.bf16.msra.mxu0 %v4937_v51 }
 0x158   :  { %v4256_v52 = vpop.f32.mrb[15].mxu0  ;;  %v4275_v53 = vpop.f32.mrb[13].mxu1  ;;  %4556 = vmatprep.subr.bf16.mxu0 %v4938_v54 }
 0x159   :  { %v3153_v55 = vadd.f32 %v4254_v48, %v5963_v18  ;;  %v4276_v56 = vadd.f32 %v4275_v53, %v4274_v50  ;;  %v4277_v57 = vpop.f32.mrb[14].mxu1 }
 0x15a   :  { %v4278_v58 = vpop.f32.mrb[15].mxu1 }
 0x15b   :  { %v3193_v59 = vadd.f32 %v4276_v56, %v3153_v55  ;;  %4557 = vmatpush3.bf16.msra.mxu0 %v4939_v60 }
 0x15c   :  { %4558 = vmatprep.subr.bf16.mxu0 %v4940_v61 }
 0x15f   :  { %4559 = vmatpush3.bf16.msra.mxu0 %v4941_v62 }
 0x162   :  { %3711 = vmatmul.mubr.bf16.vlgmr.msra.gmra.mrb[40].mxu0 %v3766_v63 }
 0x175   :  { %v4296_v0 = vpop.f32.mrb[16].mxu0 }
 0x176   :  { %v4297_v1 = vpop.f32.mrb[17].mxu0 }
 0x177   :  { %v4298_v2 = vadd.f32 %v4297_v1, %v4296_v0  ;;  %v4299_v3 = vpop.f32.mrb[18].mxu0  ;;  %v4318_v4 = vpop.f32.mrb[16].mxu1 }
 0x178   :  { %v4300_v5 = vpop.f32.mrb[19].mxu0  ;;  %v4319_v7 = vpop.f32.mrb[17].mxu1 }
 0x179   :  { %v3233_v6 = vadd.f32 %v4298_v2, %v3193_v59  ;;  %v4320_v8 = vadd.f32 %v4319_v7, %v4318_v4  ;;  %v4321_v9 = vpop.f32.mrb[18].mxu1 }
 0x17a   :  { %v4322_v10 = vpop.f32.mrb[19].mxu1 }
 0x17b   :  { %v3273_v11 = vadd.f32 %v4320_v8, %v3233_v6 }
 0x195   :  { %v4340_v12 = vpop.f32.mrb[20].mxu0 }
 0x196   :  { %v4341_v13 = vpop.f32.mrb[21].mxu0 }
 0x197   :  { %v4342_v14 = vadd.f32 %v4341_v13, %v4340_v12  ;;  %v4343_v15 = vpop.f32.mrb[22].mxu0  ;;  %v4362_v16 = vpop.f32.mrb[20].mxu1 }
 0x198   :  { %v4344_v17 = vpop.f32.mrb[23].mxu0  ;;  %v4363_v18 = vpop.f32.mrb[21].mxu1 }
 0x199   :  { %v3313_v19 = vadd.f32 %v4342_v14, %v3273_v11  ;;  %v4364_v20 = vadd.f32 %v4363_v18, %v4362_v16  ;;  %v4365_v21 = vpop.f32.mrb[22].mxu1 }
 0x19a   :  { %v4366_v22 = vpop.f32.mrb[23].mxu1 }
 0x19b   :  { %v3353_v23 = vadd.f32 %v4364_v20, %v3313_v19 }
 0x1b5   :  { %v4384_v24 = vpop.f32.mrb[24].mxu0 }
 0x1b6   :  { %v4385_v25 = vpop.f32.mrb[25].mxu0 }
 0x1b7   :  { %v4386_v26 = vadd.f32 %v4385_v25, %v4384_v24  ;;  %v4387_v27 = vpop.f32.mrb[26].mxu0  ;;  %v4406_v28 = vpop.f32.mrb[24].mxu1 }
 0x1b8   :  { %v4388_v29 = vpop.f32.mrb[27].mxu0  ;;  %v4407_v30 = vpop.f32.mrb[25].mxu1 }
 0x1b9   :  { %v3393_v31 = vadd.f32 %v4386_v26, %v3353_v23  ;;  %v4408_v32 = vadd.f32 %v4407_v30, %v4406_v28  ;;  %v4409_v33 = vpop.f32.mrb[26].mxu1 }
 0x1ba   :  { %v4410_v34 = vpop.f32.mrb[27].mxu1 }
 0x1bb   :  { %v3433_v35 = vadd.f32 %v4408_v32, %v3393_v31 }
 0x1d5   :  { %v4428_v36 = vpop.f32.mrb[28].mxu0 }
 0x1d6   :  { %v4429_v37 = vpop.f32.mrb[29].mxu0 }
 0x1d7   :  { %v4430_v38 = vadd.f32 %v4429_v37, %v4428_v36  ;;  %v4431_v39 = vpop.f32.mrb[30].mxu0  ;;  %v4450_v40 = vpop.f32.mrb[28].mxu1 }
 0x1d8   :  { %v4432_v41 = vpop.f32.mrb[31].mxu0  ;;  %v4451_v42 = vpop.f32.mrb[29].mxu1 }
 0x1d9   :  { %v3473_v43 = vadd.f32 %v4430_v38, %v3433_v35  ;;  %v4452_v44 = vadd.f32 %v4451_v42, %v4450_v40  ;;  %v4453_v45 = vpop.f32.mrb[30].mxu1 }
 0x1da   :  { %v4454_v46 = vpop.f32.mrb[31].mxu1 }
 0x1db   :  { %v3513_v47 = vadd.f32 %v4452_v44, %v3473_v43 }
 0x1f5   :  { %v4472_v48 = vpop.f32.mrb[32].mxu0 }
 0x1f6   :  { %v4473_v49 = vpop.f32.mrb[33].mxu0 }
 0x1f7   :  { %v4474_v50 = vadd.f32 %v4473_v49, %v4472_v48  ;;  %v4475_v51 = vpop.f32.mrb[34].mxu0  ;;  %v4494_v52 = vpop.f32.mrb[32].mxu1 }
 0x1f8   :  { %v4476_v53 = vpop.f32.mrb[35].mxu0  ;;  %v4495_v55 = vpop.f32.mrb[33].mxu1 }
 0x1f9   :  { %v3553_v54 = vadd.f32 %v4474_v50, %v3513_v47  ;;  %v4496_v56 = vadd.f32 %v4495_v55, %v4494_v52  ;;  %v4497_v57 = vpop.f32.mrb[34].mxu1 }
 0x1fa   :  { %v4498_v58 = vpop.f32.mrb[35].mxu1 }
 0x1fb   :  { %v3593_v59 = vadd.f32 %v4496_v56, %v3553_v54 }
 0x215   :  { %v4516_v60 = vpop.f32.mrb[36].mxu0 }
 0x216   :  { %v4517_v61 = vpop.f32.mrb[37].mxu0 }
 0x217   :  { %v4518_v62 = vadd.f32 %v4517_v61, %v4516_v60  ;;  %v4519_v63 = vpop.f32.mrb[38].mxu0  ;;  %v4538_v0 = vpop.f32.mrb[36].mxu1 }
 0x218   :  { %v4520_v1 = vpop.f32.mrb[39].mxu0  ;;  %v4539_v2 = vpop.f32.mrb[37].mxu1 }
 0x219   :  { %v3633_v3 = vadd.f32 %v4518_v62, %v3593_v59  ;;  %v4540_v4 = vadd.f32 %v4539_v2, %v4538_v0  ;;  %v4541_v5 = vpop.f32.mrb[38].mxu1 }
 0x21a   :  { %v4542_v6 = vpop.f32.mrb[39].mxu1 }
 0x21b   :  { %v3673_v7 = vadd.f32 %v4540_v4, %v3633_v3 }
 0x235   :  { %v4560_v8 = vpop.f32.mrb[40].mxu0 }
 0x236   :  { %v4561_v9 = vpop.f32.mrb[41].mxu0 }
 0x237   :  { %v4562_v10 = vadd.f32 %v4561_v9, %v4560_v8  ;;  %v4563_v11 = vpop.f32.mrb[42].mxu0 }
 0x238   :  { %v4564_v12 = vpop.f32.mrb[43].mxu0 }
 0x239   :  { %v3713_v13 = vadd.f32 %v4562_v10, %v3673_v7 }
 0x23b   :  { %v3718_v14 = vmax.f32 %v3713_v13, 0.0 }
 0x23d   :  { %v3719_v15 = vpack.c.bf16 %v3718_v14, %v3718_v14 }
 0x23f   :  { %3720 = vst [vmem:[%s6053_s3] sm:$0xf] %v3719_v15 }

// kernel: autoencoder4d_forward.9
= control target key start
LH: loop header
LB: loop body
LE: loop exit
PB: predicated region body
PF: predicated region fallthrough
CT: control target
= control target key end

     0   :  { %s626_s1 = inlined_call_operand.vmem [shape: bf16[512,128], index: 1, kind: input, shape index: {}]   ;;  %s627_s0 = inlined_call_operand.vmem [shape: bf16[8,512], index: 0, kind: input, shape index: {}]   ;;  %s628_s2 = inlined_call_operand.vmem [shape: f32[1,128], index: 2, kind: input, shape index: {}]   ;;  %s629_s3 = inlined_call_operand.vmem [shape: bf16[8,128], index: 3, kind: output, shape index: {}]  }
   0x1   :  { %v462_v0 = vld [vmem:[%s626_s1 + $0x40] sm:$0xff]   ;;  %v466_v4 = vld [vmem:[%s626_s1 + $0x48] sm:$0xff]   ;;  %v470_v8 = vld [vmem:[%s626_s1 + $0x50] sm:$0xff]  }
   0x2   :  { %v463_v1 = vld [vmem:[%s626_s1 + $0xc0] sm:$0xff]   ;;  %418 = vmatprep.subr.bf16.mxu0 %v462_v0  ;;  %v467_v5 = vld [vmem:[%s626_s1 + $0xc8] sm:$0xff]   ;;  %v471_v9 = vld [vmem:[%s626_s1 + $0xd0] sm:$0xff]  }
   0x3   :  { %v464_v2 = vld [vmem:[%s626_s1] sm:$0xff]   ;;  %440 = vmatprep.subr.bf16.mxu1 %v463_v1  ;;  %v468_v6 = vld [vmem:[%s626_s1 + $0x8] sm:$0xff]   ;;  %v472_v10 = vld [vmem:[%s626_s1 + $0x10] sm:$0xff]  }
   0x4   :  { %v465_v3 = vld [vmem:[%s626_s1 + $0x80] sm:$0xff]   ;;  %419 = vmatpush3.bf16.msra.mxu0 %v464_v2  ;;  %v469_v7 = vld [vmem:[%s626_s1 + $0x88] sm:$0xff]   ;;  %v473_v11 = vld [vmem:[%s626_s1 + $0x90] sm:$0xff]  }
   0x5   :  { %441 = vmatpush3.bf16.msra.mxu1 %v465_v3  ;;  %420 = vmatprep.subr.bf16.mxu0 %v466_v4  ;;  %v474_v12 = vld [vmem:[%s626_s1 + $0x58] sm:$0xff]   ;;  %v478_v16 = vld [vmem:[%s626_s1 + $0x60] sm:$0xff]   ;;  %v482_v20 = vld [vmem:[%s626_s1 + $0x68] sm:$0xff]  }
   0x6   :  { %442 = vmatprep.subr.bf16.mxu1 %v467_v5  ;;  %v475_v13 = vld [vmem:[%s626_s1 + $0xd8] sm:$0xff]   ;;  %v479_v17 = vld [vmem:[%s626_s1 + $0xe0] sm:$0xff]   ;;  %v483_v21 = vld [vmem:[%s626_s1 + $0xe8] sm:$0xff]  }
   0x7   :  { %v476_v14 = vld [vmem:[%s626_s1 + $0x18] sm:$0xff]   ;;  %v480_v18 = vld [vmem:[%s626_s1 + $0x20] sm:$0xff]   ;;  %v484_v22 = vld [vmem:[%s626_s1 + $0x28] sm:$0xff]  }
   0x8   :  { %421 = vmatpush3.bf16.msra.mxu0 %v468_v6  ;;  %v477_v15 = vld [vmem:[%s626_s1 + $0x98] sm:$0xff]   ;;  %v481_v19 = vld [vmem:[%s626_s1 + $0xa0] sm:$0xff]   ;;  %v485_v23 = vld [vmem:[%s626_s1 + $0xa8] sm:$0xff]  }
   0x9   :  { %443 = vmatpush3.bf16.msra.mxu1 %v469_v7  ;;  %422 = vmatprep.subr.bf16.mxu0 %v470_v8  ;;  %v486_v24 = vld [vmem:[%s626_s1 + $0x70] sm:$0xff]   ;;  %v490_v28 = vld [vmem:[%s626_s1 + $0x78] sm:$0xff]   ;;  %v15_v32 = vld [vmem:[%s627_s0] sm:$0xff] }
   0xa   :  { %444 = vmatprep.subr.bf16.mxu1 %v471_v9  ;;  %v487_v25 = vld [vmem:[%s626_s1 + $0xf0] sm:$0xff]   ;;  %v491_v29 = vld [vmem:[%s626_s1 + $0xf8] sm:$0xff]   ;;  %v16_v33 = vld [vmem:[%s627_s0 + $0x8] sm:$0xff]  ;;  %v382_v34 = vcombine.low %v15_v32, %v15_v32  ;;  %v383_v35 = vcombine.high %v15_v32, %v15_v32 }
   0xb   :  { %v488_v26 = vld [vmem:[%s626_s1 + $0x30] sm:$0xff]   ;;  %v492_v30 = vld [vmem:[%s626_s1 + $0x38] sm:$0xff]   ;;  %v384_v36 = vcombine.low %v16_v33, %v16_v33  ;;  %v385_v37 = vcombine.high %v16_v33, %v16_v33  ;;  %v381_v40 = vld [vmem:[%s628_s2] ss:$0 sm:$0xff] }
   0xc   :  { %423 = vmatpush3.bf16.msra.mxu0 %v472_v10  ;;  %v489_v27 = vld [vmem:[%s626_s1 + $0xb0] sm:$0xff]   ;;  %v493_v31 = vld [vmem:[%s626_s1 + $0xb8] sm:$0xff]   ;;  %326 = vmatprep.mubr.bf16.mxu0 %v383_v35 }
   0xd   :  { %445 = vmatpush3.bf16.msra.mxu1 %v473_v11  ;;  %424 = vmatprep.subr.bf16.mxu0 %v474_v12 }
   0xe   :  { %446 = vmatprep.subr.bf16.mxu1 %v475_v13  ;;  %366 = vmatprep.mubr.bf16.mxu1 %v385_v37 }
  0x10   :  { %425 = vmatpush3.bf16.msra.mxu0 %v476_v14 }
  0x11   :  { %447 = vmatpush3.bf16.msra.mxu1 %v477_v15  ;;  %426 = vmatprep.subr.bf16.mxu0 %v478_v16 }
  0x12   :  { %448 = vmatprep.subr.bf16.mxu1 %v479_v17 }
  0x14   :  { %427 = vmatpush3.bf16.msra.mxu0 %v480_v18 }
  0x15   :  { %449 = vmatpush3.bf16.msra.mxu1 %v481_v19  ;;  %428 = vmatprep.subr.bf16.mxu0 %v482_v20 }
  0x16   :  { %450 = vmatprep.subr.bf16.mxu1 %v483_v21 }
  0x18   :  { %429 = vmatpush3.bf16.msra.mxu0 %v484_v22 }
  0x19   :  { %451 = vmatpush3.bf16.msra.mxu1 %v485_v23  ;;  %430 = vmatprep.subr.bf16.mxu0 %v486_v24 }
  0x1a   :  { %452 = vmatprep.subr.bf16.mxu1 %v487_v25 }
  0x1c   :  { %431 = vmatpush3.bf16.msra.mxu0 %v488_v26 }
  0x1d   :  { %453 = vmatpush3.bf16.msra.mxu1 %v489_v27  ;;  %432 = vmatprep.subr.bf16.mxu0 %v490_v28 }
  0x1e   :  { %454 = vmatprep.subr.bf16.mxu1 %v491_v29 }
  0x20   :  { %433 = vmatpush3.bf16.msra.mxu0 %v492_v30 }
  0x21   :  { %455 = vmatpush3.bf16.msra.mxu1 %v493_v31 }
  0x23   :  { %327 = vmatmul.mubr.bf16.vlgmr.msra.gmra.mrb[0].mxu0 %v382_v34 }
  0x24   :  { %367 = vmatmul.mubr.bf16.vlgmr.msra.gmra.mrb[0].mxu1 %v384_v36 }
  0xf6   :  { %v434_v38 = vpop.f32.mrb[0].mxu0 }
  0xf7   :  { %v456_v39 = vpop.f32.mrb[0].mxu1  ;;  %v435_v41 = vpop.f32.mrb[1].mxu0 }
  0xf8   :  { %v457_v42 = vpop.f32.mrb[1].mxu1  ;;  %v436_v43 = vadd.f32 %v435_v41, %v434_v38  ;;  %v437_v45 = vpop.f32.mrb[2].mxu0 }
  0xf9   :  { %v458_v44 = vadd.f32 %v457_v42, %v456_v39  ;;  %v459_v46 = vpop.f32.mrb[2].mxu1  ;;  %v438_v47 = vpop.f32.mrb[3].mxu0 }
  0xfa   :  { %v460_v48 = vpop.f32.mrb[3].mxu1  ;;  %v329_v49 = vadd.f32 %v436_v43, %v381_v40 }
  0xfc   :  { %v369_v50 = vadd.f32 %v458_v44, %v329_v49 }
  0xfe   :  { %v374_v51 = vmax.f32 %v369_v50, 0.0 }
 0x100   :  { %v375_v52 = vpack.c.bf16 %v374_v51, %v374_v51 }
 0x102   :  { %376 = vst [vmem:[%s629_s3] sm:$0xf] %v375_v52 }

// kernel: autoencoder4d_forward.10
= control target key start
LH: loop header
LB: loop body
LE: loop exit
PB: predicated region body
PF: predicated region fallthrough
CT: control target
= control target key end

     0   :  { %s1325_s12 = smov 0   ;;  %s1535_s0 = inlined_call_operand.vmem [shape: bf16[64,896], index: 0, kind: input, shape index: {}]   ;;  %s1536_s1 = inlined_call_operand.vmem [shape: bf16[896,128], index: 1, kind: input, shape index: {}]   ;;  %s1537_s2 = inlined_call_operand.vmem [shape: f32[1,128], index: 2, kind: input, shape index: {}]   ;;  %s1538_s3 = inlined_call_operand.vmem [shape: bf16[64,128], index: 3, kind: output, shape index: {}]  }
   0x1 LB: > { %s997_s13 = sadd.s32 4294967295, %s1303_s12   ;;  %p1001_p0 = scmp.ge.s32.totalorder %s1303_s12, 1  ;;  %s1303_s12 = sphi %s1325_s12, %s13_s12  }
   0x2   : > { %p139_p1 = scmp.lt.s32.totalorder %s1303_s12, 3 }
   0x4   : > { %p140_p2 = pnand %p1001_p0, %p139_p1 }
   0x5   : > { %v1221_v0 = vld [vmem:[%s1536_s1 + $0x40] sm:$0xff] (!%p140_p2)   ;;  %v1225_v4 = vld [vmem:[%s1536_s1 + $0x48] sm:$0xff] (!%p140_p2)   ;;  %v1229_v8 = vld [vmem:[%s1536_s1 + $0x50] sm:$0xff] (!%p140_p2)   ;;  %s1002_s17 = sshll.u32 (!%p140_p2), %s997_s13, 2 }
   0x6   : > { %143 = sbr.rel (%p140_p2) target bundleno = 304 (0x130), region = 32  ;;  %v1222_v1 = vld [vmem:[%s1536_s1] sm:$0xff] (!%p140_p2)   ;;  %1098 = vmatprep.subr.bf16.mxu0 (!%p140_p2), %v1221_v0  ;;  %v1226_v5 = vld [vmem:[%s1536_s1 + $0x8] sm:$0xff] (!%p140_p2)   ;;  %v1230_v9 = vld [vmem:[%s1536_s1 + $0x10] sm:$0xff] (!%p140_p2)   ;;  %p165_p3 = scmp.lt.s32.totalorder (!%p140_p2), %s1002_s17, 7 }
   0x7   : > { %v1223_v2 = vld [vmem:[%s1536_s1 + $0xc0] sm:$0xff] (!%p140_p2)   ;;  %1099 = vmatpush3.bf16.msra.mxu0 (!%p140_p2), %v1222_v1  ;;  %v1227_v6 = vld [vmem:[%s1536_s1 + $0xc8] sm:$0xff] (!%p140_p2)   ;;  %v1231_v10 = vld [vmem:[%s1536_s1 + $0xd0] sm:$0xff] (!%p140_p2)  }
   0x8   : > { %v1224_v3 = vld [vmem:[%s1536_s1 + $0x80] sm:$0xff] (!%p140_p2)   ;;  %1126 = vmatprep.subr.bf16.mxu1 (!%p140_p2), %v1223_v2  ;;  %1100 = vmatprep.subr.bf16.mxu0 (!%p140_p2), %v1225_v4  ;;  %v1228_v7 = vld [vmem:[%s1536_s1 + $0x88] sm:$0xff] (!%p140_p2)   ;;  %v1232_v11 = vld [vmem:[%s1536_s1 + $0x90] sm:$0xff] (!%p140_p2)  }
   0x9   : > { %1127 = vmatpush3.bf16.msra.mxu1 (!%p140_p2), %v1224_v3  ;;  %v1233_v12 = vld [vmem:[%s1536_s1 + $0x58] sm:$0xff] (!%p140_p2)   ;;  %v1237_v16 = vld [vmem:[%s1536_s1 + $0x60] sm:$0xff] (!%p140_p2)   ;;  %v1241_v20 = vld [vmem:[%s1536_s1 + $0x68] sm:$0xff] (!%p140_p2)  }
   0xa   : > { %1128 = vmatprep.subr.bf16.mxu1 (!%p140_p2), %v1227_v6  ;;  %v1234_v13 = vld [vmem:[%s1536_s1 + $0x18] sm:$0xff] (!%p140_p2)   ;;  %v1238_v17 = vld [vmem:[%s1536_s1 + $0x20] sm:$0xff] (!%p140_p2)   ;;  %v1242_v21 = vld [vmem:[%s1536_s1 + $0x28] sm:$0xff] (!%p140_p2)  }
   0xb   : > { %1101 = vmatpush3.bf16.msra.mxu0 (!%p140_p2), %v1226_v5  ;;  %v1235_v14 = vld [vmem:[%s1536_s1 + $0xd8] sm:$0xff] (!%p140_p2)   ;;  %v1239_v18 = vld [vmem:[%s1536_s1 + $0xe0] sm:$0xff] (!%p140_p2)   ;;  %v1243_v22 = vld [vmem:[%s1536_s1 + $0xe8] sm:$0xff] (!%p140_p2)  }
   0xc   : > { %1102 = vmatprep.subr.bf16.mxu0 (!%p140_p2), %v1229_v8  ;;  %v1236_v15 = vld [vmem:[%s1536_s1 + $0x98] sm:$0xff] (!%p140_p2)   ;;  %v1240_v19 = vld [vmem:[%s1536_s1 + $0xa0] sm:$0xff] (!%p140_p2)   ;;  %v1244_v23 = vld [vmem:[%s1536_s1 + $0xa8] sm:$0xff] (!%p140_p2)  }
   0xd   : > { %1129 = vmatpush3.bf16.msra.mxu1 %v1228_v7  ;;  %s1540_s17 = smov (!%p165_p3, %s1002_s17), 7  ;;  %v1245_v24 = vld [vmem:[%s1536_s1 + $0x70] sm:$0xff]   ;;  %v1249_v28 = vld [vmem:[%s1536_s1 + $0x78] sm:$0xff]   ;;  %v1256_v34 = vld [vmem:[%s1536_s1 + $0x140] sm:$0xff]  }
   0xe   : > { %1130 = vmatprep.subr.bf16.mxu1 %v1231_v10  ;;  %s1212_s14 = smul.u32 28, %s1540_s17  ;;  %v1246_v25 = vld [vmem:[%s1536_s1 + $0x30] sm:$0xff]   ;;  %v1250_v29 = vld [vmem:[%s1536_s1 + $0x38] sm:$0xff]   ;;  %v1260_v37 = vld [vmem:[%s1536_s1 + $0x100] sm:$0xff]  }
   0xf   : > { %1103 = vmatpush3.bf16.msra.mxu0 %v1230_v9  ;;  %v1247_v26 = vld [vmem:[%s1536_s1 + $0xf0] sm:$0xff]   ;;  %v1251_v30 = vld [vmem:[%s1536_s1 + $0xf8] sm:$0xff]   ;;  %v1261_v38 = vld [vmem:[%s1536_s1 + $0x148] sm:$0xff]  }
  0x10   : > { %1104 = vmatprep.subr.bf16.mxu0 %v1233_v12  ;;  %v1248_v27 = vld [vmem:[%s1536_s1 + $0xb0] sm:$0xff]   ;;  %s1428_s13 = scalar_lea.vmem %s1535_s0, %s1212_s14  ;;  %v1255_v33 = vld [vmem:[%s1536_s1 + $0xb8] sm:$0xff]   ;;  %v1262_v39 = vld [vmem:[%s1536_s1 + $0x180] sm:$0xff]  }
  0x11   : > { %1131 = vmatpush3.bf16.msra.mxu1 %v1232_v11  ;;  %v1252_v31 = vld [vmem:[%s1428_s13] ss:$28 sps:$4 sm:$0xff]   ;;  %v1257_v35 = vld [vmem:[%s1428_s13 + $0x8] ss:$28 sps:$4 sm:$0xff]   ;;  %v1264_v41 = vld [vmem:[%s1536_s1 + $0x150] sm:$0xff]  }
  0x12   : > { %1132 = vmatprep.subr.bf16.mxu1 %v1235_v14  ;;  %v1254_v32 = vld [vmem:[%s1428_s13 + $0x4] ss:$28 sps:$4 sm:$0xff]   ;;  %v1259_v36 = vld [vmem:[%s1428_s13 + $0xc] ss:$28 sps:$4 sm:$0xff]   ;;  %v1266_v43 = vld [vmem:[%s1536_s1 + $0x110] sm:$0xff]  }
  0x13   : > { %1105 = vmatpush3.bf16.msra.mxu0 %v1234_v13  ;;  %753 = vmatprep.mubr.bf16.mxu0 %v1254_v32  ;;  %v1263_v40 = vld [vmem:[%s1536_s1 + $0x108] sm:$0xff]   ;;  %v1267_v44 = vld [vmem:[%s1536_s1 + $0x158] sm:$0xff]   ;;  %v1268_v45 = vld [vmem:[%s1536_s1 + $0x190] sm:$0xff]  }
  0x14   : > { %1106 = vmatprep.subr.bf16.mxu0 %v1237_v16  ;;  %802 = vmatprep.mubr.bf16.mxu1 %v1259_v36  ;;  %v1265_v42 = vld [vmem:[%s1536_s1 + $0x188] sm:$0xff]   ;;  %v1269_v46 = vld [vmem:[%s1536_s1 + $0x118] sm:$0xff]   ;;  %v1270_v47 = vld [vmem:[%s1536_s1 + $0x160] sm:$0xff]  }
  0x15   : > { %1133 = vmatpush3.bf16.msra.mxu1 %v1236_v15  ;;  %v1271_v48 = vld [vmem:[%s1536_s1 + $0x198] sm:$0xff]   ;;  %v1272_v49 = vld [vmem:[%s1536_s1 + $0x120] sm:$0xff]   ;;  %v1275_v51 = vld [vmem:[%s1536_s1 + $0x168] sm:$0xff]  }
  0x16   : > { %1134 = vmatprep.subr.bf16.mxu1 %v1239_v18  ;;  %v1273_v50 = vld [vmem:[%s1428_s13 + $0x3c] ss:$28 sps:$4 sm:$0xff]   ;;  %v1276_v52 = vld [vmem:[%s1536_s1 + $0x1a0] sm:$0xff]   ;;  %v1278_v54 = vld [vmem:[%s1536_s1 + $0x128] sm:$0xff]  }
  0x17   : > { %1107 = vmatpush3.bf16.msra.mxu0 %v1238_v17  ;;  %v1277_v53 = vld [vmem:[%s1428_s13 + $0x38] ss:$28 sps:$4 sm:$0xff]   ;;  %v1279_v55 = vld [vmem:[%s1428_s13 + $0x44] ss:$28 sps:$4 sm:$0xff]   ;;  %v1283_v58 = vld [vmem:[%s1536_s1 + $0x1a8] sm:$0xff]  }
  0x18   : > { %1108 = vmatprep.subr.bf16.mxu0 %v1241_v20  ;;  %v1281_v56 = vld [vmem:[%s1428_s13 + $0x40] ss:$28 sps:$4 sm:$0xff]   ;;  %v1282_v57 = vld [vmem:[%s1536_s1 + $0x170] sm:$0xff]   ;;  %v1294_v3 = vld [vmem:[%s1428_s13 + $0x4c] ss:$28 sps:$4 sm:$0xff]  }
  0x19   : > { %1135 = vmatpush3.bf16.msra.mxu1 %v1240_v19  ;;  %v1284_v59 = vld [vmem:[%s1536_s1 + $0x130] sm:$0xff]   ;;  %v1285_v60 = vld [vmem:[%s1536_s1 + $0x178] sm:$0xff]   ;;  %v1296_v5 = vld [vmem:[%s1428_s13 + $0x48] ss:$28 sps:$4 sm:$0xff]  }
  0x1a   : > { %1136 = vmatprep.subr.bf16.mxu1 %v1243_v22  ;;  %v1286_v61 = vld [vmem:[%s1536_s1 + $0x1b0] sm:$0xff]   ;;  %v1287_v62 = vld [vmem:[%s1536_s1 + $0x138] sm:$0xff]   ;;  %v1006_v7 = vld [vmem:[%s1537_s2] ss:$0 sm:$0xff] }
  0x1b   : > { %1109 = vmatpush3.bf16.msra.mxu0 %v1242_v21  ;;  %v1290_v63 = vld [vmem:[%s1428_s13 + $0x14] ss:$28 sps:$4 sm:$0xff]   ;;  %v1291_v0 = vld [vmem:[%s1536_s1 + $0x1b8] sm:$0xff]  }
  0x1c   : > { %1110 = vmatprep.subr.bf16.mxu0 %v1245_v24  ;;  %v1292_v1 = vld [vmem:[%s1428_s13 + $0x18] ss:$28 sps:$4 sm:$0xff]   ;;  %v1288_v2 = vld [vmem:[%s1428_s13 + $0x10] ss:$28 sps:$4 sm:$0xff]  }
  0x1d   : > { %1137 = vmatpush3.bf16.msra.mxu1 %v1244_v23  ;;  %v1293_v4 = vld [vmem:[%s1428_s13 + $0x50] ss:$28 sps:$4 sm:$0xff]   ;;  %s1005_s13 = sshll.u32 %s1540_s17, 2 }
  0x1e   : > { %1138 = vmatprep.subr.bf16.mxu1 %v1247_v26  ;;  %s175_s9 = scalar_lea.vmem %s1538_s3, %s1005_s13 }
  0x1f   : > { %1111 = vmatpush3.bf16.msra.mxu0 %v1246_v25 }
  0x20   : > { %1112 = vmatprep.subr.bf16.mxu0 %v1249_v28 }
  0x21   : > { %1139 = vmatpush3.bf16.msra.mxu1 %v1248_v27 }
  0x22   : > { %1140 = vmatprep.subr.bf16.mxu1 %v1251_v30 }
  0x23   : > { %1113 = vmatpush3.bf16.msra.mxu0 %v1250_v29 }
  0x24   : > { %1154 = vmatprep.subr.bf16.mxu0 %v1256_v34 }
  0x25   : > { %1141 = vmatpush3.bf16.msra.mxu1 %v1255_v33 }
  0x26   : > { %754 = vmatmul.mubr.bf16.vlgmr.msra.gmra.mrb[0].mxu0 %v1252_v31  ;;  %1192 = vmatprep.subr.bf16.mxu1 %v1262_v39 }
  0x27   : > { %1155 = vmatpush3.bf16.msra.mxu0 %v1260_v37  ;;  %761 = vmatprep.mubr.bf16.mxu0 %v1273_v50 }
  0x28   : > { %803 = vmatmul.mubr.bf16.vlgmr.msra.gmra.mrb[0].mxu1 %v1257_v35  ;;  %1156 = vmatprep.subr.bf16.mxu0 %v1261_v38 }
  0x29   : > { %1193 = vmatpush3.bf16.msra.mxu1 %v1262_v39  ;;  %810 = vmatprep.mubr.bf16.mxu1 %v1279_v55 }
  0x2a   : > { %1194 = vmatprep.subr.bf16.mxu1 %v1265_v42 }
  0x2b   : > { %1157 = vmatpush3.bf16.msra.mxu0 %v1263_v40 }
  0x2c   : > { %1158 = vmatprep.subr.bf16.mxu0 %v1264_v41 }
  0x2d   : > { %1195 = vmatpush3.bf16.msra.mxu1 %v1265_v42 }
  0x2e   : > { %1196 = vmatprep.subr.bf16.mxu1 %v1268_v45  ;;  %762 = vmatmul.mubr.bf16.gmra.mrb[4].mxu0 %v1277_v53 }
  0x2f   : > { %1159 = vmatpush3.bf16.msra.mxu0 %v1266_v43  ;;  %851 = vmatprep.mubr.bf16.mxu0 %v1290_v63 }
  0x30   : > { %1160 = vmatprep.subr.bf16.mxu0 %v1267_v44  ;;  %811 = vmatmul.mubr.bf16.gmra.mrb[4].mxu1 %v1281_v56 }
  0x31   : > { %1197 = vmatpush3.bf16.msra.mxu1 %v1268_v45  ;;  %1208 = vmatprep.mubr.bf16.mxu1 %v1292_v1 }
  0x32   : > { %1198 = vmatprep.subr.bf16.mxu1 %v1271_v48 }
  0x33   : > { %1161 = vmatpush3.bf16.msra.mxu0 %v1269_v46 }
  0x34   : > { %1162 = vmatprep.subr.bf16.mxu0 %v1270_v47 }
  0x35   : > { %1199 = vmatpush3.bf16.msra.mxu1 %v1271_v48 }
  0x36   : > { %1200 = vmatprep.subr.bf16.mxu1 %v1276_v52 }
  0x37   : > { %1163 = vmatpush3.bf16.msra.mxu0 %v1272_v49 }
  0x38   : > { %1164 = vmatprep.subr.bf16.mxu0 %v1275_v51 }
  0x39   : > { %1201 = vmatpush3.bf16.msra.mxu1 %v1276_v52 }
  0x3a   : > { %1202 = vmatprep.subr.bf16.mxu1 %v1283_v58 }
  0x3b   : > { %1165 = vmatpush3.bf16.msra.mxu0 %v1278_v54 }
  0x3c   : > { %1166 = vmatprep.subr.bf16.mxu0 %v1282_v57 }
  0x3d   : > { %1203 = vmatpush3.bf16.msra.mxu1 %v1283_v58 }
  0x3e   : > { %1204 = vmatprep.subr.bf16.mxu1 %v1286_v61 }
  0x3f   : > { %1167 = vmatpush3.bf16.msra.mxu0 %v1284_v59 }
  0x40   : > { %1168 = vmatprep.subr.bf16.mxu0 %v1285_v60 }
  0x41   : > { %1205 = vmatpush3.bf16.msra.mxu1 %v1286_v61 }
  0x42   : > { %1206 = vmatprep.subr.bf16.mxu1 %v1291_v0 }
  0x43   : > { %1169 = vmatpush3.bf16.msra.mxu0 %v1287_v62 }
  0x45   : > { %1207 = vmatpush3.bf16.msra.mxu1 %v1291_v0 }
  0x46   : > { %852 = vmatmul.mubr.bf16.vlgmr.msra.gmra.mrb[8].mxu0 %v1288_v2 }
  0x47   : > { %859 = vmatprep.mubr.bf16.mxu0 %v1294_v3 }
  0x48   : > { %1209 = vmatmul.mubr.bf16.vlgmr.msra.gmra.mrb[8].mxu1 %v1293_v4 }
  0x4e   : > { %860 = vmatmul.mubr.bf16.gmra.mrb[12].mxu0 %v1296_v5 }
  0xf9   : > { %v1114_v6 = vpop.f32.mrb[0].mxu0 }
  0xfa   : > { %v1115_v8 = vpop.f32.mrb[1].mxu0 }
  0xfb   : > { %v1116_v9 = vadd.f32 %v1115_v8, %v1114_v6  ;;  %v1117_v10 = vpop.f32.mrb[2].mxu0  ;;  %v1142_v11 = vpop.f32.mrb[0].mxu1 }
  0xfc   : > { %v1118_v12 = vpop.f32.mrb[3].mxu0  ;;  %v1143_v15 = vpop.f32.mrb[1].mxu1 }
  0xfd   : > { %v756_v13 = vadd.f32 %v1116_v9, %v1006_v7  ;;  %v1119_v14 = vadd.f32 %v1118_v12, %v1117_v10  ;;  %v1144_v16 = vadd.f32 %v1143_v15, %v1142_v11  ;;  %v1145_v17 = vpop.f32.mrb[2].mxu1 }
  0xfe   : > { %v1146_v19 = vpop.f32.mrb[3].mxu1 }
  0xff   : > { %v759_v18 = vadd.f32 %v1119_v14, %v1006_v7  ;;  %v805_v20 = vadd.f32 %v1144_v16, %v756_v13  ;;  %v1147_v21 = vadd.f32 %v1146_v19, %v1145_v17 }
 0x101   : > { %v808_v22 = vadd.f32 %v1147_v21, %v759_v18  ;;  %v1120_v23 = vpop.f32.mrb[4].mxu0 }
 0x102   : > { %v1121_v24 = vpop.f32.mrb[5].mxu0 }
 0x103   : > { %v1122_v25 = vadd.f32 %v1121_v24, %v1120_v23  ;;  %v1123_v26 = vpop.f32.mrb[6].mxu0  ;;  %v1148_v27 = vpop.f32.mrb[4].mxu1 }
 0x104   : > { %v1124_v28 = vpop.f32.mrb[7].mxu0  ;;  %v1149_v31 = vpop.f32.mrb[5].mxu1 }
 0x105   : > { %v764_v29 = vadd.f32 %v1122_v25, %v1006_v7  ;;  %v1125_v30 = vadd.f32 %v1124_v28, %v1123_v26  ;;  %v1150_v32 = vadd.f32 %v1149_v31, %v1148_v27  ;;  %v1151_v33 = vpop.f32.mrb[6].mxu1 }
 0x106   : > { %v1152_v35 = vpop.f32.mrb[7].mxu1 }
 0x107   : > { %v767_v34 = vadd.f32 %v1125_v30, %v1006_v7  ;;  %v813_v36 = vadd.f32 %v1150_v32, %v764_v29  ;;  %v1153_v37 = vadd.f32 %v1152_v35, %v1151_v33 }
 0x109   : > { %v816_v38 = vadd.f32 %v1153_v37, %v767_v34 }
 0x119   : > { %v1170_v39 = vpop.f32.mrb[8].mxu0 }
 0x11a   : > { %v1171_v40 = vpop.f32.mrb[9].mxu0 }
 0x11b   : > { %v1172_v41 = vadd.f32 %v1171_v40, %v1170_v39  ;;  %v1173_v42 = vpop.f32.mrb[10].mxu0  ;;  %v1210_v44 = vpop.f32.mrb[8].mxu1 }
 0x11c   : > { %v1174_v43 = vpop.f32.mrb[11].mxu0  ;;  %v902_v47 = vpop.f32.mrb[9].mxu1 }
 0x11d   : > { %v1175_v45 = vadd.f32 %v1174_v43, %v1173_v42  ;;  %v854_v46 = vadd.f32 %v1172_v41, %v805_v20  ;;  %v1211_v48 = vpop.f32.mrb[10].mxu1 }
 0x11e   : > { %v905_v51 = vpop.f32.mrb[11].mxu1 }
 0x11f   : > { %v903_v49 = vadd.f32 %v902_v47, %v854_v46  ;;  %v857_v50 = vadd.f32 %v1175_v45, %v808_v22 }
 0x121   : > { %v906_v52 = vadd.f32 %v905_v51, %v857_v50  ;;  %v1176_v53 = vpop.f32.mrb[12].mxu0  ;;  %v917_v55 = vmax.f32 %v903_v49, 0.0 }
 0x122   : > { %v1177_v54 = vpop.f32.mrb[13].mxu0 }
 0x123   : > { %v918_v56 = vmax.f32 %v906_v52, 0.0  ;;  %v1178_v57 = vadd.f32 %v1177_v54, %v1176_v53  ;;  %v1179_v58 = vpop.f32.mrb[14].mxu0 }
 0x124   : > { %v1180_v59 = vpop.f32.mrb[15].mxu0 }
 0x125   : > { %v1090_v60 = vpack.c.bf16 %v918_v56, %v917_v55  ;;  %v862_v61 = vadd.f32 %v1178_v57, %v813_v36  ;;  %v1181_v62 = vadd.f32 %v1180_v59, %v1179_v58 }
 0x127   : > { %1091 = vst [vmem:[%s175_s9] sm:$0xff] %v1090_v60   ;;  %v911_v63 = vadd.f32 %v1210_v44, %v862_v61  ;;  %v865_v0 = vadd.f32 %v1181_v62, %v816_v38 }
 0x129   : > { %v914_v1 = vadd.f32 %v1211_v48, %v865_v0  ;;  %v919_v2 = vmax.f32 %v911_v63, 0.0 }
 0x12b   : > { %v920_v3 = vmax.f32 %v914_v1, 0.0 }
 0x12d   : > { %v1095_v4 = vpack.c.bf16 %v920_v3, %v919_v2 }
 0x12f   : > { %1097 = vst [vmem:[%s175_s9 + $0x8] sm:$0xff] %v1095_v4  }
 0x130 PF: > { %s13_s12 = sadd.s32 1, %s1303_s12  }
 0x131   : > { %p10_p4 = scmp.ge.s32.totalorder %s13_s12, 4  }
 0x133   :  { %12 = sbr.rel (!%p10_p4) target bundleno = 1 (0x1), region = 62 }

// kernel: autoencoder4d_forward.11
= control target key start
LH: loop header
LB: loop body
LE: loop exit
PB: predicated region body
PF: predicated region fallthrough
CT: control target
= control target key end

     0   :  { %s5625_s12 = smov 0   ;;  %s6567_s0 = inlined_call_operand.vmem [shape: bf16[512,1792], index: 0, kind: input, shape index: {}]   ;;  %s6568_s1 = inlined_call_operand.vmem [shape: bf16[1792,128], index: 1, kind: input, shape index: {}]   ;;  %s6569_s2 = inlined_call_operand.vmem [shape: f32[1,128], index: 2, kind: input, shape index: {}]   ;;  %s6570_s3 = inlined_call_operand.vmem [shape: f32[512,128], index: 3, kind: output, shape index: {}]  }
   0x1 LB: > { %s3832_s13 = sadd.s32 4294967295, %s5603_s12   ;;  %p3836_p0 = scmp.ge.s32.totalorder %s5603_s12, 1  ;;  %s5603_s12 = sphi %s5625_s12, %s13_s12  }
   0x2   : > { %p139_p1 = scmp.lt.s32.totalorder %s5603_s12, 3 }
   0x4   : > { %p140_p2 = pnand %p3836_p0, %p139_p1 }
   0x5   : > { %v5021_v0 = vld [vmem:[%s6568_s1 + $0x40] sm:$0xff] (!%p140_p2)   ;;  %s3837_s16 = sshll.u32 (!%p140_p2), %s3832_s13, 5  ;;  %v5023_v2 = vld [vmem:[%s6568_s1 + $0x48] sm:$0xff] (!%p140_p2)   ;;  %v5025_v4 = vld [vmem:[%s6568_s1 + $0x50] sm:$0xff] (!%p140_p2)  }
   0x6   : > { %143 = sbr.rel (%p140_p2) target bundleno = 727 (0x2d7), region = 32  ;;  %v5022_v1 = vld [vmem:[%s6568_s1] sm:$0xff] (!%p140_p2)   ;;  %4212 = vmatprep.subr.bf16.mxu0 (!%p140_p2), %v5021_v0  ;;  %4996 = vmatprep.subr.bf16.mxu1 (!%p140_p2), %v5021_v0  ;;  %p165_p3 = scmp.lt.s32.totalorder (!%p140_p2), %s3837_s16, 63  ;;  %v5024_v3 = vld [vmem:[%s6568_s1 + $0x8] sm:$0xff] (!%p140_p2)   ;;  %v5026_v5 = vld [vmem:[%s6568_s1 + $0x10] sm:$0xff] (!%p140_p2)  }
   0x7   : > { %4213 = vmatpush3.bf16.msra.mxu0 (!%p140_p2), %v5022_v1  ;;  %5004 = vmatpush3.bf16.msra.mxu1 (!%p140_p2), %v5022_v1  ;;  %v5027_v6 = vld [vmem:[%s6568_s1 + $0x58] sm:$0xff] (!%p140_p2)   ;;  %v5029_v8 = vld [vmem:[%s6568_s1 + $0x60] sm:$0xff] (!%p140_p2)   ;;  %v5031_v10 = vld [vmem:[%s6568_s1 + $0x68] sm:$0xff] (!%p140_p2)  }
   0x8   : > { %4214 = vmatprep.subr.bf16.mxu0 (!%p140_p2), %v5023_v2  ;;  %4997 = vmatprep.subr.bf16.mxu1 (!%p140_p2), %v5023_v2  ;;  %v5028_v7 = vld [vmem:[%s6568_s1 + $0x18] sm:$0xff] (!%p140_p2)   ;;  %v5030_v9 = vld [vmem:[%s6568_s1 + $0x20] sm:$0xff] (!%p140_p2)   ;;  %v5032_v13 = vld [vmem:[%s6568_s1 + $0x28] sm:$0xff] (!%p140_p2)  }
   0x9   : > { %v5033_v14 = vld [vmem:[%s6568_s1 + $0x70] sm:$0xff] (!%p140_p2)   ;;  %v5035_v16 = vld [vmem:[%s6568_s1 + $0x78] sm:$0xff] (!%p140_p2)   ;;  %v5043_v18 = vld [vmem:[%s6568_s1 + $0xc0] sm:$0xff] (!%p140_p2)  }
   0xa   : > { %v5034_v15 = vld [vmem:[%s6568_s1 + $0x30] sm:$0xff] (!%p140_p2)   ;;  %v5036_v17 = vld [vmem:[%s6568_s1 + $0x38] sm:$0xff] (!%p140_p2)   ;;  %v5045_v20 = vld [vmem:[%s6568_s1 + $0x140] sm:$0xff] (!%p140_p2)  }
   0xb   : > { %4215 = vmatpush3.bf16.msra.mxu0 (!%p140_p2), %v5024_v3  ;;  %5005 = vmatpush3.bf16.msra.mxu1 (!%p140_p2), %v5024_v3  ;;  %v5044_v22 = vld [vmem:[%s6568_s1 + $0x80] sm:$0xff] (!%p140_p2)   ;;  %v5053_v26 = vld [vmem:[%s6568_s1 + $0xc8] sm:$0xff] (!%p140_p2)   ;;  %v5063_v30 = vld [vmem:[%s6568_s1 + $0xd0] sm:$0xff] (!%p140_p2)  }
   0xc   : > { %4216 = vmatprep.subr.bf16.mxu0 (!%p140_p2), %v5025_v4  ;;  %4998 = vmatprep.subr.bf16.mxu1 (!%p140_p2), %v5025_v4  ;;  %v5046_v23 = vld [vmem:[%s6568_s1 + $0x100] sm:$0xff] (!%p140_p2)   ;;  %v5054_v27 = vld [vmem:[%s6568_s1 + $0x88] sm:$0xff] (!%p140_p2)   ;;  %v5065_v33 = vld [vmem:[%s6568_s1 + $0x150] sm:$0xff] (!%p140_p2)  }
   0xd   : > { %s6572_s16 = smov (!%p165_p3, %s3837_s16), 63  ;;  %v5055_v28 = vld [vmem:[%s6568_s1 + $0x148] sm:$0xff]   ;;  %v5064_v36 = vld [vmem:[%s6568_s1 + $0x90] sm:$0xff]   ;;  %v5073_v38 = vld [vmem:[%s6568_s1 + $0xd8] sm:$0xff]  }
   0xe   : > { %s5012_s29 = smul.u32 56, %s6572_s16  ;;  %v5056_v29 = vld [vmem:[%s6568_s1 + $0x108] sm:$0xff]   ;;  %v5066_v37 = vld [vmem:[%s6568_s1 + $0x110] sm:$0xff]   ;;  %v5075_v39 = vld [vmem:[%s6568_s1 + $0x158] sm:$0xff]  }
   0xf   : > { %4217 = vmatpush3.bf16.msra.mxu0 %v5026_v5  ;;  %5006 = vmatpush3.bf16.msra.mxu1 %v5026_v5  ;;  %v5074_v42 = vld [vmem:[%s6568_s1 + $0x98] sm:$0xff]   ;;  %v5083_v46 = vld [vmem:[%s6568_s1 + $0xe0] sm:$0xff]   ;;  %v5093_v52 = vld [vmem:[%s6568_s1 + $0xe8] sm:$0xff]  }
  0x10   : > { %4218 = vmatprep.subr.bf16.mxu0 %v5027_v6  ;;  %4999 = vmatprep.subr.bf16.mxu1 %v5027_v6  ;;  %s5666_s9 = scalar_lea.vmem %s6567_s0, %s5012_s29  ;;  %v5076_v43 = vld [vmem:[%s6568_s1 + $0x118] sm:$0xff]   ;;  %v5084_v47 = vld [vmem:[%s6568_s1 + $0xa0] sm:$0xff]   ;;  %v5094_v55 = vld [vmem:[%s6568_s1 + $0xa8] sm:$0xff]  }
  0x11   : > { %v5039_v11 = vld [vmem:[%s5666_s9 + $0x4] ss:$56 sps:$4 sm:$0xff]   ;;  %v5037_v19 = vld [vmem:[%s5666_s9] ss:$56 sps:$4 sm:$0xff]   ;;  %v5047_v24 = vld [vmem:[%s5666_s9 + $0x74] ss:$56 sps:$4 sm:$0xff]  }
  0x12   : > { %v5042_v12 = vld [vmem:[%s5666_s9 + $0x384] ss:$56 sps:$4 sm:$0xff]   ;;  %2457 = vmatprep.mubr.bf16.mxu0 %v5039_v11  ;;  %v5040_v21 = vld [vmem:[%s5666_s9 + $0x380] ss:$56 sps:$4 sm:$0xff]   ;;  %v5049_v25 = vld [vmem:[%s5666_s9 + $0x3f4] ss:$56 sps:$4 sm:$0xff]  }
  0x13   : > { %4219 = vmatpush3.bf16.msra.mxu0 %v5028_v7  ;;  %5007 = vmatpush3.bf16.msra.mxu1 %v5028_v7  ;;  %v5051_v31 = vld [vmem:[%s5666_s9 + $0x70] ss:$56 sps:$4 sm:$0xff]   ;;  %v5057_v34 = vld [vmem:[%s5666_s9 + $0xe4] ss:$56 sps:$4 sm:$0xff]   ;;  %v5061_v40 = vld [vmem:[%s5666_s9 + $0xe0] ss:$56 sps:$4 sm:$0xff]  }
  0x14   : > { %4220 = vmatprep.subr.bf16.mxu0 %v5029_v8  ;;  %5000 = vmatprep.subr.bf16.mxu1 %v5029_v8  ;;  %v5052_v32 = vld [vmem:[%s5666_s9 + $0x3f0] ss:$56 sps:$4 sm:$0xff]   ;;  %v5059_v35 = vld [vmem:[%s5666_s9 + $0x464] ss:$56 sps:$4 sm:$0xff]   ;;  %v5062_v41 = vld [vmem:[%s5666_s9 + $0x460] ss:$56 sps:$4 sm:$0xff]  }
  0x15   : > { %2521 = vmatprep.mubr.bf16.mxu1 %v5042_v12  ;;  %v5067_v44 = vld [vmem:[%s5666_s9 + $0x154] ss:$56 sps:$4 sm:$0xff]   ;;  %v5085_v48 = vld [vmem:[%s6568_s1 + $0x160] sm:$0xff]   ;;  %v5071_v50 = vld [vmem:[%s5666_s9 + $0x150] ss:$56 sps:$4 sm:$0xff]  }
  0x16   : > { %v5069_v45 = vld [vmem:[%s5666_s9 + $0x4d4] ss:$56 sps:$4 sm:$0xff]   ;;  %v5086_v49 = vld [vmem:[%s6568_s1 + $0x120] sm:$0xff]   ;;  %v5072_v51 = vld [vmem:[%s5666_s9 + $0x4d0] ss:$56 sps:$4 sm:$0xff]  }
  0x17   : > { %4221 = vmatpush3.bf16.msra.mxu0 %v5030_v9  ;;  %5008 = vmatpush3.bf16.msra.mxu1 %v5030_v9  ;;  %v5077_v53 = vld [vmem:[%s5666_s9 + $0x1c4] ss:$56 sps:$4 sm:$0xff]   ;;  %v5095_v56 = vld [vmem:[%s6568_s1 + $0x168] sm:$0xff]   ;;  %v5103_v58 = vld [vmem:[%s6568_s1 + $0xf0] sm:$0xff]  }
  0x18   : > { %4222 = vmatprep.subr.bf16.mxu0 %v5031_v10  ;;  %5001 = vmatprep.subr.bf16.mxu1 %v5031_v10  ;;  %v5079_v54 = vld [vmem:[%s5666_s9 + $0x544] ss:$56 sps:$4 sm:$0xff]   ;;  %v5096_v57 = vld [vmem:[%s6568_s1 + $0x128] sm:$0xff]   ;;  %v5081_v59 = vld [vmem:[%s5666_s9 + $0x1c0] ss:$56 sps:$4 sm:$0xff]  }
  0x19   : > { %v5082_v60 = vld [vmem:[%s5666_s9 + $0x540] ss:$56 sps:$4 sm:$0xff]   ;;  %v5104_v61 = vld [vmem:[%s6568_s1 + $0xb0] sm:$0xff]   ;;  %v5097_v8 = vld [vmem:[%s5666_s9 + $0x2a4] ss:$56 sps:$4 sm:$0xff]  }
  0x1a   : > { %v5087_v62 = vld [vmem:[%s5666_s9 + $0x234] ss:$56 sps:$4 sm:$0xff]   ;;  %v5113_v2 = vld [vmem:[%s6568_s1 + $0xf8] sm:$0xff]   ;;  %v5091_v6 = vld [vmem:[%s5666_s9 + $0x230] ss:$56 sps:$4 sm:$0xff]  }
  0x1b   : > { %4223 = vmatpush3.bf16.msra.mxu0 %v5032_v13  ;;  %5009 = vmatpush3.bf16.msra.mxu1 %v5032_v13  ;;  %v5105_v63 = vld [vmem:[%s6568_s1 + $0x170] sm:$0xff]   ;;  %v5114_v3 = vld [vmem:[%s6568_s1 + $0xb8] sm:$0xff]   ;;  %v5123_v10 = vld [vmem:[%s6568_s1 + $0x1c0] sm:$0xff]  }
  0x1c   : > { %4224 = vmatprep.subr.bf16.mxu0 %v5033_v14  ;;  %5002 = vmatprep.subr.bf16.mxu1 %v5033_v14  ;;  %v5106_v0 = vld [vmem:[%s6568_s1 + $0x130] sm:$0xff]   ;;  %v5115_v4 = vld [vmem:[%s6568_s1 + $0x178] sm:$0xff]   ;;  %v5125_v11 = vld [vmem:[%s6568_s1 + $0x240] sm:$0xff]  }
  0x1d   : > { %v5089_v1 = vld [vmem:[%s5666_s9 + $0x5b4] ss:$56 sps:$4 sm:$0xff]   ;;  %v5116_v5 = vld [vmem:[%s6568_s1 + $0x138] sm:$0xff]   ;;  %v5092_v7 = vld [vmem:[%s5666_s9 + $0x5b0] ss:$56 sps:$4 sm:$0xff]  }
  0x1e   : > { %v5099_v9 = vld [vmem:[%s5666_s9 + $0x624] ss:$56 sps:$4 sm:$0xff]   ;;  %v5101_v12 = vld [vmem:[%s5666_s9 + $0x2a0] ss:$56 sps:$4 sm:$0xff]   ;;  %v5107_v14 = vld [vmem:[%s5666_s9 + $0x314] ss:$56 sps:$4 sm:$0xff]  }
  0x1f   : > { %4225 = vmatpush3.bf16.msra.mxu0 %v5034_v15  ;;  %5010 = vmatpush3.bf16.msra.mxu1 %v5034_v15  ;;  %v5102_v13 = vld [vmem:[%s5666_s9 + $0x620] ss:$56 sps:$4 sm:$0xff]   ;;  %v5109_v15 = vld [vmem:[%s5666_s9 + $0x694] ss:$56 sps:$4 sm:$0xff]  }
  0x20   : > { %4226 = vmatprep.subr.bf16.mxu0 %v5035_v16  ;;  %5003 = vmatprep.subr.bf16.mxu1 %v5035_v16  ;;  %v5111_v16 = vld [vmem:[%s5666_s9 + $0x310] ss:$56 sps:$4 sm:$0xff]  }
  0x23   : > { %4227 = vmatpush3.bf16.msra.mxu0 %v5036_v17  ;;  %5011 = vmatpush3.bf16.msra.mxu1 %v5036_v17  ;;  %v5112_v17 = vld [vmem:[%s5666_s9 + $0x690] ss:$56 sps:$4 sm:$0xff]  }
  0x24   : > { %4324 = vmatprep.subr.bf16.mxu1 %v5043_v18  ;;  %4436 = vmatprep.subr.bf16.mxu0 %v5045_v20  ;;  %v5119_v18 = vld [vmem:[%s5666_s9 + $0xc] ss:$56 sps:$4 sm:$0xff]   ;;  %v5117_v20 = vld [vmem:[%s5666_s9 + $0x8] ss:$56 sps:$4 sm:$0xff]  }
  0x26   : > { %2458 = vmatmul.mubr.bf16.vlgmr.msra.gmra.mrb[0].mxu0 %v5037_v19  ;;  %2522 = vmatmul.mubr.bf16.vlgmr.msra.gmra.mrb[0].mxu1 %v5040_v21  ;;  %v5122_v19 = vld [vmem:[%s5666_s9 + $0x14] ss:$56 sps:$4 sm:$0xff]   ;;  %v5120_v21 = vld [vmem:[%s5666_s9 + $0x10] ss:$56 sps:$4 sm:$0xff]  }
  0x27   : > { %4325 = vmatpush3.bf16.msra.mxu1 %v5044_v22  ;;  %4437 = vmatpush3.bf16.msra.mxu0 %v5046_v23  ;;  %v5124_v22 = vld [vmem:[%s6568_s1 + $0x180] sm:$0xff]  }
  0x28   : > { %2465 = vmatprep.mubr.bf16.mxu0 %v5047_v24  ;;  %2529 = vmatprep.mubr.bf16.mxu1 %v5049_v25  ;;  %v5126_v23 = vld [vmem:[%s6568_s1 + $0x200] sm:$0xff]   ;;  %v5127_v24 = vld [vmem:[%s5666_s9 + $0x7c] ss:$56 sps:$4 sm:$0xff]  }
  0x29   : > { %4326 = vmatprep.subr.bf16.mxu1 %v5053_v26  ;;  %4438 = vmatprep.subr.bf16.mxu0 %v5055_v28  ;;  %v5129_v25 = vld [vmem:[%s5666_s9 + $0x84] ss:$56 sps:$4 sm:$0xff]   ;;  %v5139_v26 = vld [vmem:[%s6568_s1 + $0x1c8] sm:$0xff]  }
  0x2a   : > { %v5140_v28 = vld [vmem:[%s6568_s1 + $0x188] sm:$0xff]  }
  0x2b   : > { %4327 = vmatpush3.bf16.msra.mxu1 %v5054_v27  ;;  %4439 = vmatpush3.bf16.msra.mxu0 %v5056_v29  ;;  %v5141_v27 = vld [vmem:[%s6568_s1 + $0x248] sm:$0xff]  }
  0x2c   : > { %4328 = vmatprep.subr.bf16.mxu1 %v5063_v30  ;;  %4440 = vmatprep.subr.bf16.mxu0 %v5065_v33  ;;  %v5142_v29 = vld [vmem:[%s6568_s1 + $0x208] sm:$0xff]   ;;  %v5155_v30 = vld [vmem:[%s6568_s1 + $0x1d0] sm:$0xff]  }
  0x2d   : > { %v5157_v33 = vld [vmem:[%s6568_s1 + $0x250] sm:$0xff]  }
  0x2e   : > { %2466 = vmatmul.mubr.bf16.gmra.mrb[4].mxu0 %v5051_v31  ;;  %2530 = vmatmul.mubr.bf16.gmra.mrb[4].mxu1 %v5052_v32  ;;  %v5131_v31 = vld [vmem:[%s5666_s9 + $0x78] ss:$56 sps:$4 sm:$0xff]  }
  0x2f   : > { %2473 = vmatprep.mubr.bf16.mxu0 %v5057_v34  ;;  %2537 = vmatprep.mubr.bf16.mxu1 %v5059_v35  ;;  %v5132_v32 = vld [vmem:[%s5666_s9 + $0x80] ss:$56 sps:$4 sm:$0xff]   ;;  %v5133_v34 = vld [vmem:[%s5666_s9 + $0xec] ss:$56 sps:$4 sm:$0xff]  }
  0x30   : > { %4329 = vmatpush3.bf16.msra.mxu1 %v5064_v36  ;;  %4441 = vmatpush3.bf16.msra.mxu0 %v5066_v37  ;;  %v5135_v35 = vld [vmem:[%s5666_s9 + $0xf4] ss:$56 sps:$4 sm:$0xff]  }
  0x31   : > { %4330 = vmatprep.subr.bf16.mxu1 %v5073_v38  ;;  %4442 = vmatprep.subr.bf16.mxu0 %v5075_v39  ;;  %v5156_v36 = vld [vmem:[%s6568_s1 + $0x190] sm:$0xff]   ;;  %v5171_v38 = vld [vmem:[%s6568_s1 + $0x1d8] sm:$0xff]  }
  0x32   : > { %v5158_v37 = vld [vmem:[%s6568_s1 + $0x210] sm:$0xff]   ;;  %v5173_v39 = vld [vmem:[%s6568_s1 + $0x258] sm:$0xff]  }
  0x34   : > { %4331 = vmatpush3.bf16.msra.mxu1 %v5074_v42  ;;  %4443 = vmatpush3.bf16.msra.mxu0 %v5076_v43  ;;  %v5172_v42 = vld [vmem:[%s6568_s1 + $0x198] sm:$0xff]  }
  0x35   : > { %4332 = vmatprep.subr.bf16.mxu1 %v5083_v46  ;;  %4444 = vmatprep.subr.bf16.mxu0 %v5085_v48  ;;  %v5174_v43 = vld [vmem:[%s6568_s1 + $0x218] sm:$0xff]   ;;  %v5187_v46 = vld [vmem:[%s6568_s1 + $0x1e0] sm:$0xff]  }
  0x36   : > { %2474 = vmatmul.mubr.bf16.gmra.mrb[8].mxu0 %v5061_v40  ;;  %2538 = vmatmul.mubr.bf16.gmra.mrb[8].mxu1 %v5062_v41  ;;  %v5137_v40 = vld [vmem:[%s5666_s9 + $0xe8] ss:$56 sps:$4 sm:$0xff]  }
  0x37   : > { %2481 = vmatprep.mubr.bf16.mxu0 %v5067_v44  ;;  %2545 = vmatprep.mubr.bf16.mxu1 %v5069_v45  ;;  %v5138_v41 = vld [vmem:[%s5666_s9 + $0xf0] ss:$56 sps:$4 sm:$0xff]   ;;  %v5143_v44 = vld [vmem:[%s5666_s9 + $0x15c] ss:$56 sps:$4 sm:$0xff]   ;;  %v5189_v48 = vld [vmem:[%s6568_s1 + $0x260] sm:$0xff]  }
  0x38   : > { %4333 = vmatpush3.bf16.msra.mxu1 %v5084_v47  ;;  %4445 = vmatpush3.bf16.msra.mxu0 %v5086_v49  ;;  %v5145_v45 = vld [vmem:[%s5666_s9 + $0x164] ss:$56 sps:$4 sm:$0xff]  }
  0x39   : > { %4334 = vmatprep.subr.bf16.mxu1 %v5093_v52  ;;  %4446 = vmatprep.subr.bf16.mxu0 %v5095_v56  ;;  %v5188_v47 = vld [vmem:[%s6568_s1 + $0x1a0] sm:$0xff]   ;;  %v5205_v56 = vld [vmem:[%s6568_s1 + $0x268] sm:$0xff]  }
  0x3a   : > { %v5190_v49 = vld [vmem:[%s6568_s1 + $0x220] sm:$0xff]  }
  0x3b   : > { %v5149_v52 = vld [vmem:[%s5666_s9 + $0x1cc] ss:$56 sps:$4 sm:$0xff]  }
  0x3c   : > { %4335 = vmatpush3.bf16.msra.mxu1 %v5094_v55  ;;  %4447 = vmatpush3.bf16.msra.mxu0 %v5096_v57  ;;  %v5204_v55 = vld [vmem:[%s6568_s1 + $0x1a8] sm:$0xff]  }
  0x3d   : > { %4336 = vmatprep.subr.bf16.mxu1 %v5103_v58  ;;  %4448 = vmatprep.subr.bf16.mxu0 %v5105_v63  ;;  %v5206_v57 = vld [vmem:[%s6568_s1 + $0x228] sm:$0xff]   ;;  %v5220_v63 = vld [vmem:[%s6568_s1 + $0x1b0] sm:$0xff]  }
  0x3e   : > { %2482 = vmatmul.mubr.bf16.gmra.mrb[12].mxu0 %v5071_v50  ;;  %2546 = vmatmul.mubr.bf16.gmra.mrb[12].mxu1 %v5072_v51  ;;  %v5147_v50 = vld [vmem:[%s5666_s9 + $0x158] ss:$56 sps:$4 sm:$0xff]   ;;  %v5153_v58 = vld [vmem:[%s5666_s9 + $0x1c8] ss:$56 sps:$4 sm:$0xff]  }
  0x3f   : > { %2489 = vmatprep.mubr.bf16.mxu0 %v5077_v53  ;;  %2553 = vmatprep.mubr.bf16.mxu1 %v5079_v54  ;;  %v5148_v51 = vld [vmem:[%s5666_s9 + $0x160] ss:$56 sps:$4 sm:$0xff]   ;;  %v5151_v53 = vld [vmem:[%s5666_s9 + $0x1d4] ss:$56 sps:$4 sm:$0xff]  }
  0x40   : > { %4337 = vmatpush3.bf16.msra.mxu1 %v5104_v61  ;;  %4449 = vmatpush3.bf16.msra.mxu0 %v5106_v0  ;;  %v5203_v54 = vld [vmem:[%s6568_s1 + $0x1e8] sm:$0xff]   ;;  %v5161_v61 = vld [vmem:[%s5666_s9 + $0x244] ss:$56 sps:$4 sm:$0xff]   ;;  %v5221_v0 = vld [vmem:[%s6568_s1 + $0x270] sm:$0xff]  }
  0x41   : > { %4338 = vmatprep.subr.bf16.mxu1 %v5113_v2  ;;  %4450 = vmatprep.subr.bf16.mxu0 %v5115_v4  ;;  %v5163_v2 = vld [vmem:[%s5666_s9 + $0x238] ss:$56 sps:$4 sm:$0xff]   ;;  %v5165_v4 = vld [vmem:[%s5666_s9 + $0x2ac] ss:$56 sps:$4 sm:$0xff]  }
  0x44   : > { %4339 = vmatpush3.bf16.msra.mxu1 %v5114_v3  ;;  %4451 = vmatpush3.bf16.msra.mxu0 %v5116_v5  ;;  %v5164_v3 = vld [vmem:[%s5666_s9 + $0x240] ss:$56 sps:$4 sm:$0xff]   ;;  %v5167_v5 = vld [vmem:[%s5666_s9 + $0x2b4] ss:$56 sps:$4 sm:$0xff]  }
  0x45   : > { %4548 = vmatprep.subr.bf16.mxu1 %v5123_v10  ;;  %4660 = vmatprep.subr.bf16.mxu0 %v5125_v11  ;;  %v5238_v10 = vld [vmem:[%s6568_s1 + $0x238] sm:$0xff]   ;;  %v5170_v11 = vld [vmem:[%s5666_s9 + $0x2b0] ss:$56 sps:$4 sm:$0xff]  }
  0x46   : > { %2490 = vmatmul.mubr.bf16.gmra.mrb[16].mxu0 %v5081_v59  ;;  %2554 = vmatmul.mubr.bf16.gmra.mrb[16].mxu1 %v5082_v60  ;;  %v5154_v59 = vld [vmem:[%s5666_s9 + $0x1d0] ss:$56 sps:$4 sm:$0xff]   ;;  %v5159_v60 = vld [vmem:[%s5666_s9 + $0x23c] ss:$56 sps:$4 sm:$0xff]  }
  0x47   : > { %2497 = vmatprep.mubr.bf16.mxu0 %v5087_v62  ;;  %2561 = vmatprep.mubr.bf16.mxu1 %v5089_v1  ;;  %v5219_v62 = vld [vmem:[%s6568_s1 + $0x1f0] sm:$0xff]  }
  0x48   : > { %v5222_v1 = vld [vmem:[%s6568_s1 + $0x230] sm:$0xff]  }
  0x4e   : > { %2498 = vmatmul.mubr.bf16.gmra.mrb[20].mxu0 %v5091_v6  ;;  %2562 = vmatmul.mubr.bf16.gmra.mrb[20].mxu1 %v5092_v7  ;;  %v5235_v6 = vld [vmem:[%s6568_s1 + $0x1f8] sm:$0xff]  }
  0x4f   : > { %2505 = vmatprep.mubr.bf16.mxu0 %v5097_v8  ;;  %2569 = vmatprep.mubr.bf16.mxu1 %v5099_v9  ;;  %v5236_v7 = vld [vmem:[%s6568_s1 + $0x1b8] sm:$0xff]   ;;  %v5169_v8 = vld [vmem:[%s5666_s9 + $0x2a8] ss:$56 sps:$4 sm:$0xff]  }
  0x50   : > { %v5237_v9 = vld [vmem:[%s6568_s1 + $0x278] sm:$0xff]  }
  0x56   : > { %2506 = vmatmul.mubr.bf16.gmra.mrb[24].mxu0 %v5101_v12  ;;  %2570 = vmatmul.mubr.bf16.gmra.mrb[24].mxu1 %v5102_v13  ;;  %v5175_v12 = vld [vmem:[%s5666_s9 + $0x31c] ss:$56 sps:$4 sm:$0xff]  }
  0x57   : > { %2513 = vmatprep.mubr.bf16.mxu0 %v5107_v14  ;;  %2577 = vmatprep.mubr.bf16.mxu1 %v5109_v15  ;;  %v5177_v13 = vld [vmem:[%s5666_s9 + $0x324] ss:$56 sps:$4 sm:$0xff]   ;;  %v5179_v15 = vld [vmem:[%s5666_s9 + $0x318] ss:$56 sps:$4 sm:$0xff]  }
  0x58   : > { %v5251_v14 = vld [vmem:[%s6568_s1 + $0x2c0] sm:$0xff]  }
  0x5e   : > { %2514 = vmatmul.mubr.bf16.gmra.mrb[28].mxu0 %v5111_v16  ;;  %2578 = vmatmul.mubr.bf16.gmra.mrb[28].mxu1 %v5112_v17  ;;  %v5180_v16 = vld [vmem:[%s5666_s9 + $0x320] ss:$56 sps:$4 sm:$0xff]  }
  0x5f   : > { %2618 = vmatprep.mubr.bf16.mxu1 %v5119_v18  ;;  %2779 = vmatprep.mubr.bf16.mxu0 %v5122_v19  ;;  %v5253_v17 = vld [vmem:[%s6568_s1 + $0x340] sm:$0xff]   ;;  %v5183_v19 = vld [vmem:[%s5666_s9 + $0x394] ss:$56 sps:$4 sm:$0xff]  }
  0x60   : > { %v5181_v18 = vld [vmem:[%s5666_s9 + $0x38c] ss:$56 sps:$4 sm:$0xff]  }
  0x66   : > { %2619 = vmatmul.mubr.bf16.vlgmr.msra.gmra.mrb[32].mxu1 %v5117_v20  ;;  %2780 = vmatmul.mubr.bf16.vlgmr.msra.gmra.mrb[32].mxu0 %v5120_v21  ;;  %v5185_v20 = vld [vmem:[%s5666_s9 + $0x388] ss:$56 sps:$4 sm:$0xff]  }
  0x67   : > { %4549 = vmatpush3.bf16.msra.mxu1 %v5124_v22  ;;  %4661 = vmatpush3.bf16.msra.mxu0 %v5126_v23  ;;  %v5186_v21 = vld [vmem:[%s5666_s9 + $0x390] ss:$56 sps:$4 sm:$0xff]   ;;  %v5191_v22 = vld [vmem:[%s5666_s9 + $0x3fc] ss:$56 sps:$4 sm:$0xff]  }
  0x68   : > { %2626 = vmatprep.mubr.bf16.mxu1 %v5127_v24  ;;  %2787 = vmatprep.mubr.bf16.mxu0 %v5129_v25  ;;  %v5193_v23 = vld [vmem:[%s5666_s9 + $0x404] ss:$56 sps:$4 sm:$0xff]   ;;  %v5195_v24 = vld [vmem:[%s5666_s9 + $0x3f8] ss:$56 sps:$4 sm:$0xff]  }
  0x69   : > { %4550 = vmatprep.subr.bf16.mxu1 %v5139_v26  ;;  %4662 = vmatprep.subr.bf16.mxu0 %v5141_v27  ;;  %v5196_v25 = vld [vmem:[%s5666_s9 + $0x400] ss:$56 sps:$4 sm:$0xff]   ;;  %v5197_v26 = vld [vmem:[%s5666_s9 + $0x46c] ss:$56 sps:$4 sm:$0xff]  }
  0x6a   : > { %v5199_v27 = vld [vmem:[%s5666_s9 + $0x474] ss:$56 sps:$4 sm:$0xff]  }
  0x6b   : > { %4551 = vmatpush3.bf16.msra.mxu1 %v5140_v28  ;;  %4663 = vmatpush3.bf16.msra.mxu0 %v5142_v29  ;;  %v5201_v28 = vld [vmem:[%s5666_s9 + $0x468] ss:$56 sps:$4 sm:$0xff]  }
  0x6c   : > { %4552 = vmatprep.subr.bf16.mxu1 %v5155_v30  ;;  %4664 = vmatprep.subr.bf16.mxu0 %v5157_v33  ;;  %v5202_v29 = vld [vmem:[%s5666_s9 + $0x470] ss:$56 sps:$4 sm:$0xff]   ;;  %v5207_v30 = vld [vmem:[%s5666_s9 + $0x4dc] ss:$56 sps:$4 sm:$0xff]   ;;  %v5212_v33 = vld [vmem:[%s5666_s9 + $0x4e0] ss:$56 sps:$4 sm:$0xff]  }
  0x6e   : > { %2627 = vmatmul.mubr.bf16.gmra.mrb[36].mxu1 %v5131_v31  ;;  %2788 = vmatmul.mubr.bf16.gmra.mrb[36].mxu0 %v5132_v32  ;;  %v5209_v31 = vld [vmem:[%s5666_s9 + $0x4e4] ss:$56 sps:$4 sm:$0xff]   ;;  %v5211_v32 = vld [vmem:[%s5666_s9 + $0x4d8] ss:$56 sps:$4 sm:$0xff]  }
  0x6f   : > { %2634 = vmatprep.mubr.bf16.mxu1 %v5133_v34  ;;  %2795 = vmatprep.mubr.bf16.mxu0 %v5135_v35  ;;  %v5213_v34 = vld [vmem:[%s5666_s9 + $0x54c] ss:$56 sps:$4 sm:$0xff]  }
  0x70   : > { %4553 = vmatpush3.bf16.msra.mxu1 %v5156_v36  ;;  %4665 = vmatpush3.bf16.msra.mxu0 %v5158_v37  ;;  %v5215_v35 = vld [vmem:[%s5666_s9 + $0x554] ss:$56 sps:$4 sm:$0xff]   ;;  %v5217_v36 = vld [vmem:[%s5666_s9 + $0x548] ss:$56 sps:$4 sm:$0xff]  }
  0x71   : > { %4554 = vmatprep.subr.bf16.mxu1 %v5171_v38  ;;  %4666 = vmatprep.subr.bf16.mxu0 %v5173_v39  ;;  %v5218_v37 = vld [vmem:[%s5666_s9 + $0x550] ss:$56 sps:$4 sm:$0xff]   ;;  %v5223_v38 = vld [vmem:[%s5666_s9 + $0x5bc] ss:$56 sps:$4 sm:$0xff]  }
  0x72   : > { %v5225_v39 = vld [vmem:[%s5666_s9 + $0x5c4] ss:$56 sps:$4 sm:$0xff]  }
  0x74   : > { %4555 = vmatpush3.bf16.msra.mxu1 %v5172_v42  ;;  %4667 = vmatpush3.bf16.msra.mxu0 %v5174_v43  ;;  %v5229_v42 = vld [vmem:[%s5666_s9 + $0x62c] ss:$56 sps:$4 sm:$0xff]  }
  0x75   : > { %4556 = vmatprep.subr.bf16.mxu1 %v5187_v46  ;;  %4668 = vmatprep.subr.bf16.mxu0 %v5189_v48  ;;  %v5231_v43 = vld [vmem:[%s5666_s9 + $0x634] ss:$56 sps:$4 sm:$0xff]   ;;  %v5243_v48 = vld [vmem:[%s5666_s9 + $0x698] ss:$56 sps:$4 sm:$0xff]  }
  0x76   : > { %2635 = vmatmul.mubr.bf16.gmra.mrb[40].mxu1 %v5137_v40  ;;  %2796 = vmatmul.mubr.bf16.gmra.mrb[40].mxu0 %v5138_v41  ;;  %v5227_v40 = vld [vmem:[%s5666_s9 + $0x5b8] ss:$56 sps:$4 sm:$0xff]   ;;  %v5239_v46 = vld [vmem:[%s5666_s9 + $0x69c] ss:$56 sps:$4 sm:$0xff]  }
  0x77   : > { %2642 = vmatprep.mubr.bf16.mxu1 %v5143_v44  ;;  %2803 = vmatprep.mubr.bf16.mxu0 %v5145_v45  ;;  %v5228_v41 = vld [vmem:[%s5666_s9 + $0x5c0] ss:$56 sps:$4 sm:$0xff]   ;;  %v5234_v45 = vld [vmem:[%s5666_s9 + $0x630] ss:$56 sps:$4 sm:$0xff]  }
  0x78   : > { %4557 = vmatpush3.bf16.msra.mxu1 %v5188_v47  ;;  %4669 = vmatpush3.bf16.msra.mxu0 %v5190_v49  ;;  %v5233_v44 = vld [vmem:[%s5666_s9 + $0x628] ss:$56 sps:$4 sm:$0xff]   ;;  %v5241_v47 = vld [vmem:[%s5666_s9 + $0x6a4] ss:$56 sps:$4 sm:$0xff]  }
  0x79   : > { %4558 = vmatprep.subr.bf16.mxu1 %v5203_v54  ;;  %4670 = vmatprep.subr.bf16.mxu0 %v5205_v56  ;;  %v5244_v49 = vld [vmem:[%s5666_s9 + $0x6a0] ss:$56 sps:$4 sm:$0xff]   ;;  %v5255_v56 = vld [vmem:[%s5666_s9 + $0x8c] ss:$56 sps:$4 sm:$0xff]  }
  0x7a   : > { %v5252_v54 = vld [vmem:[%s6568_s1 + $0x280] sm:$0xff]  }
  0x7c   : > { %4559 = vmatpush3.bf16.msra.mxu1 %v5204_v55  ;;  %4671 = vmatpush3.bf16.msra.mxu0 %v5206_v57  ;;  %v5254_v55 = vld [vmem:[%s6568_s1 + $0x300] sm:$0xff]   ;;  %v5257_v57 = vld [vmem:[%s5666_s9 + $0x94] ss:$56 sps:$4 sm:$0xff]  }
  0x7d   : > { %4560 = vmatprep.subr.bf16.mxu1 %v5219_v62  ;;  %4672 = vmatprep.subr.bf16.mxu0 %v5221_v0  ;;  %v5283_v62 = vld [vmem:[%s6568_s1 + $0x2d0] sm:$0xff]   ;;  %v5259_v0 = vld [vmem:[%s5666_s9 + $0x88] ss:$56 sps:$4 sm:$0xff]  }
  0x7e   : > { %2643 = vmatmul.mubr.bf16.gmra.mrb[44].mxu1 %v5147_v50  ;;  %2804 = vmatmul.mubr.bf16.gmra.mrb[44].mxu0 %v5148_v51  ;;  %v5247_v50 = vld [vmem:[%s5666_s9 + $0x1c] ss:$56 sps:$4 sm:$0xff]  }
  0x7f   : > { %2650 = vmatprep.mubr.bf16.mxu1 %v5149_v52  ;;  %2811 = vmatprep.mubr.bf16.mxu0 %v5151_v53  ;;  %v5250_v51 = vld [vmem:[%s5666_s9 + $0x24] ss:$56 sps:$4 sm:$0xff]   ;;  %v5245_v52 = vld [vmem:[%s5666_s9 + $0x18] ss:$56 sps:$4 sm:$0xff]  }
  0x80   : > { %4561 = vmatpush3.bf16.msra.mxu1 %v5220_v63  ;;  %4673 = vmatpush3.bf16.msra.mxu0 %v5222_v1  ;;  %v5248_v53 = vld [vmem:[%s5666_s9 + $0x20] ss:$56 sps:$4 sm:$0xff]   ;;  %v5285_v63 = vld [vmem:[%s6568_s1 + $0x350] sm:$0xff]  }
  0x81   : > { %4562 = vmatprep.subr.bf16.mxu1 %v5235_v6  ;;  %4674 = vmatprep.subr.bf16.mxu0 %v5237_v9  ;;  %v5260_v1 = vld [vmem:[%s5666_s9 + $0x90] ss:$56 sps:$4 sm:$0xff]   ;;  %v5299_v6 = vld [vmem:[%s6568_s1 + $0x2d8] sm:$0xff]  }
  0x82   : > { %v5302_v9 = vld [vmem:[%s6568_s1 + $0x318] sm:$0xff]  }
  0x84   : > { %4563 = vmatpush3.bf16.msra.mxu1 %v5236_v7  ;;  %4675 = vmatpush3.bf16.msra.mxu0 %v5238_v10  ;;  %v5301_v7 = vld [vmem:[%s6568_s1 + $0x358] sm:$0xff]   ;;  %v5315_v10 = vld [vmem:[%s6568_s1 + $0x2e0] sm:$0xff]  }
  0x85   : > { %4772 = vmatprep.subr.bf16.mxu1 %v5251_v14  ;;  %4884 = vmatprep.subr.bf16.mxu0 %v5253_v17  ;;  %v5271_v14 = vld [vmem:[%s5666_s9 + $0x16c] ss:$56 sps:$4 sm:$0xff]  }
  0x86   : > { %2651 = vmatmul.mubr.bf16.gmra.mrb[48].mxu1 %v5153_v58  ;;  %2812 = vmatmul.mubr.bf16.gmra.mrb[48].mxu0 %v5154_v59  ;;  %v5267_v58 = vld [vmem:[%s6568_s1 + $0x2c8] sm:$0xff]   ;;  %v5318_v17 = vld [vmem:[%s6568_s1 + $0x320] sm:$0xff]  }
  0x87   : > { %2658 = vmatprep.mubr.bf16.mxu1 %v5159_v60  ;;  %2819 = vmatprep.mubr.bf16.mxu0 %v5161_v61  ;;  %v5269_v59 = vld [vmem:[%s6568_s1 + $0x348] sm:$0xff]  }
  0x88   : > { %v5268_v60 = vld [vmem:[%s6568_s1 + $0x288] sm:$0xff]  }
  0x89   : > { %v5270_v61 = vld [vmem:[%s6568_s1 + $0x308] sm:$0xff]  }
  0x8e   : > { %2659 = vmatmul.mubr.bf16.gmra.mrb[52].mxu1 %v5163_v2  ;;  %2820 = vmatmul.mubr.bf16.gmra.mrb[52].mxu0 %v5164_v3  ;;  %v5261_v2 = vld [vmem:[%s5666_s9 + $0xfc] ss:$56 sps:$4 sm:$0xff]  }
  0x8f   : > { %2666 = vmatprep.mubr.bf16.mxu1 %v5165_v4  ;;  %2827 = vmatprep.mubr.bf16.mxu0 %v5167_v5  ;;  %v5263_v3 = vld [vmem:[%s5666_s9 + $0x104] ss:$56 sps:$4 sm:$0xff]   ;;  %v5284_v4 = vld [vmem:[%s6568_s1 + $0x290] sm:$0xff]  }
  0x90   : > { %v5286_v5 = vld [vmem:[%s6568_s1 + $0x310] sm:$0xff]  }
  0x96   : > { %2667 = vmatmul.mubr.bf16.gmra.mrb[56].mxu1 %v5169_v8  ;;  %2828 = vmatmul.mubr.bf16.gmra.mrb[56].mxu0 %v5170_v11  ;;  %v5300_v8 = vld [vmem:[%s6568_s1 + $0x298] sm:$0xff]   ;;  %v5317_v11 = vld [vmem:[%s6568_s1 + $0x360] sm:$0xff]  }
  0x97   : > { %2674 = vmatprep.mubr.bf16.mxu1 %v5175_v12  ;;  %2835 = vmatprep.mubr.bf16.mxu0 %v5177_v13  ;;  %v5265_v12 = vld [vmem:[%s5666_s9 + $0xf8] ss:$56 sps:$4 sm:$0xff]  }
  0x98   : > { %v5266_v13 = vld [vmem:[%s5666_s9 + $0x100] ss:$56 sps:$4 sm:$0xff]  }
  0x9e   : > { %2675 = vmatmul.mubr.bf16.gmra.mrb[60].mxu1 %v5179_v15  ;;  %2836 = vmatmul.mubr.bf16.gmra.mrb[60].mxu0 %v5180_v16  ;;  %v5273_v15 = vld [vmem:[%s5666_s9 + $0x174] ss:$56 sps:$4 sm:$0xff]   ;;  %v5316_v16 = vld [vmem:[%s6568_s1 + $0x2a0] sm:$0xff]  }
  0x9f   : > { %2682 = vmatprep.mubr.bf16.mxu1 %v5181_v18  ;;  %2843 = vmatprep.mubr.bf16.mxu0 %v5183_v19  ;;  %v5331_v18 = vld [vmem:[%s6568_s1 + $0x2e8] sm:$0xff]  }
  0xa0   : > { %v5333_v19 = vld [vmem:[%s6568_s1 + $0x368] sm:$0xff]  }
  0xa6   : > { %2683 = vmatmul.mubr.bf16.gmra.mrb[64].mxu1 %v5185_v20  ;;  %2844 = vmatmul.mubr.bf16.gmra.mrb[64].mxu0 %v5186_v21  ;;  %v5332_v20 = vld [vmem:[%s6568_s1 + $0x2a8] sm:$0xff]  }
  0xa7   : > { %2690 = vmatprep.mubr.bf16.mxu1 %v5191_v22  ;;  %2851 = vmatprep.mubr.bf16.mxu0 %v5193_v23  ;;  %v5334_v21 = vld [vmem:[%s6568_s1 + $0x328] sm:$0xff]  }
  0xae   : > { %2691 = vmatmul.mubr.bf16.gmra.mrb[68].mxu1 %v5195_v24  ;;  %2852 = vmatmul.mubr.bf16.gmra.mrb[68].mxu0 %v5196_v25  ;;  %v6066_v24 = vld [vmem:[%s6569_s2] ss:$0 sm:$0xff]  ;;  %v5347_v25 = vld [vmem:[%s6568_s1 + $0x2f0] sm:$0xff]  }
  0xaf   : > { %2698 = vmatprep.mubr.bf16.mxu1 %v5197_v26  ;;  %2859 = vmatprep.mubr.bf16.mxu0 %v5199_v27 }
  0xb6   : > { %2699 = vmatmul.mubr.bf16.gmra.mrb[72].mxu1 %v5201_v28  ;;  %2860 = vmatmul.mubr.bf16.gmra.mrb[72].mxu0 %v5202_v29  ;;  %v5275_v28 = vld [vmem:[%s5666_s9 + $0x168] ss:$56 sps:$4 sm:$0xff]  }
  0xb7   : > { %2706 = vmatprep.mubr.bf16.mxu1 %v5207_v30  ;;  %2867 = vmatprep.mubr.bf16.mxu0 %v5209_v31  ;;  %v5276_v29 = vld [vmem:[%s5666_s9 + $0x170] ss:$56 sps:$4 sm:$0xff]  }
  0xbe   : > { %2707 = vmatmul.mubr.bf16.gmra.mrb[76].mxu1 %v5211_v32  ;;  %2868 = vmatmul.mubr.bf16.gmra.mrb[76].mxu0 %v5212_v33 }
  0xbf   : > { %2714 = vmatprep.mubr.bf16.mxu1 %v5213_v34  ;;  %2875 = vmatprep.mubr.bf16.mxu0 %v5215_v35  ;;  %v5277_v34 = vld [vmem:[%s5666_s9 + $0x1dc] ss:$56 sps:$4 sm:$0xff]  }
  0xc0   : > { %v5279_v35 = vld [vmem:[%s5666_s9 + $0x1e4] ss:$56 sps:$4 sm:$0xff]  }
  0xc6   : > { %2715 = vmatmul.mubr.bf16.gmra.mrb[80].mxu1 %v5217_v36  ;;  %2876 = vmatmul.mubr.bf16.gmra.mrb[80].mxu0 %v5218_v37 }
  0xc7   : > { %2722 = vmatprep.mubr.bf16.mxu1 %v5223_v38  ;;  %2883 = vmatprep.mubr.bf16.mxu0 %v5225_v39  ;;  %v5348_v38 = vld [vmem:[%s6568_s1 + $0x2b0] sm:$0xff]  }
  0xc8   : > { %v5349_v39 = vld [vmem:[%s6568_s1 + $0x370] sm:$0xff]  }
  0xce   : > { %2723 = vmatmul.mubr.bf16.gmra.mrb[84].mxu1 %v5227_v40  ;;  %2884 = vmatmul.mubr.bf16.gmra.mrb[84].mxu0 %v5228_v41 }
  0xcf   : > { %2730 = vmatprep.mubr.bf16.mxu1 %v5229_v42  ;;  %2891 = vmatprep.mubr.bf16.mxu0 %v5231_v43  ;;  %v5350_v43 = vld [vmem:[%s6568_s1 + $0x330] sm:$0xff]  }
  0xd6   : > { %2731 = vmatmul.mubr.bf16.gmra.mrb[88].mxu1 %v5233_v44  ;;  %2892 = vmatmul.mubr.bf16.gmra.mrb[88].mxu0 %v5234_v45  ;;  %v5363_v44 = vld [vmem:[%s6568_s1 + $0x2f8] sm:$0xff]  }
  0xd7   : > { %2738 = vmatprep.mubr.bf16.mxu1 %v5239_v46  ;;  %2899 = vmatprep.mubr.bf16.mxu0 %v5241_v47  ;;  %v5365_v45 = vld [vmem:[%s6568_s1 + $0x378] sm:$0xff]  }
  0xd8   : > { %v5364_v47 = vld [vmem:[%s6568_s1 + $0x2b8] sm:$0xff]  }
  0xde   : > { %2739 = vmatmul.mubr.bf16.gmra.mrb[92].mxu1 %v5243_v48  ;;  %2900 = vmatmul.mubr.bf16.gmra.mrb[92].mxu0 %v5244_v49 }
  0xdf   : > { %2940 = vmatprep.mubr.bf16.mxu1 %v5247_v50  ;;  %3101 = vmatprep.mubr.bf16.mxu0 %v5250_v51  ;;  %v5366_v50 = vld [vmem:[%s6568_s1 + $0x338] sm:$0xff]  }
  0xe6   : > { %2941 = vmatmul.mubr.bf16.vlgmr.msra.gmra.mrb[96].mxu1 %v5245_v52  ;;  %3102 = vmatmul.mubr.bf16.vlgmr.msra.gmra.mrb[96].mxu0 %v5248_v53  ;;  %v5281_v53 = vld [vmem:[%s5666_s9 + $0x1d8] ss:$56 sps:$4 sm:$0xff]  }
  0xe7   : > { %4773 = vmatpush3.bf16.msra.mxu1 %v5252_v54  ;;  %4885 = vmatpush3.bf16.msra.mxu0 %v5254_v55  ;;  %v5282_v54 = vld [vmem:[%s5666_s9 + $0x1e0] ss:$56 sps:$4 sm:$0xff]  }
  0xe8   : > { %2948 = vmatprep.mubr.bf16.mxu1 %v5255_v56  ;;  %3109 = vmatprep.mubr.bf16.mxu0 %v5257_v57 }
  0xe9   : > { %4774 = vmatprep.subr.bf16.mxu1 %v5267_v58  ;;  %4886 = vmatprep.subr.bf16.mxu0 %v5269_v59  ;;  %v5287_v59 = vld [vmem:[%s5666_s9 + $0x24c] ss:$56 sps:$4 sm:$0xff]  }
  0xeb   : > { %4775 = vmatpush3.bf16.msra.mxu1 %v5268_v60  ;;  %4887 = vmatpush3.bf16.msra.mxu0 %v5270_v61  ;;  %v5289_v60 = vld [vmem:[%s5666_s9 + $0x254] ss:$56 sps:$4 sm:$0xff]  }
  0xec   : > { %4776 = vmatprep.subr.bf16.mxu1 %v5283_v62  ;;  %4888 = vmatprep.subr.bf16.mxu0 %v5285_v63 }
  0xee   : > { %2949 = vmatmul.mubr.bf16.gmra.mrb[100].mxu1 %v5259_v0  ;;  %3110 = vmatmul.mubr.bf16.gmra.mrb[100].mxu0 %v5260_v1 }
  0xef   : > { %2956 = vmatprep.mubr.bf16.mxu1 %v5261_v2  ;;  %3117 = vmatprep.mubr.bf16.mxu0 %v5263_v3 }
  0xf0   : > { %4777 = vmatpush3.bf16.msra.mxu1 %v5284_v4  ;;  %4889 = vmatpush3.bf16.msra.mxu0 %v5286_v5 }
  0xf1   : > { %4778 = vmatprep.subr.bf16.mxu1 %v5299_v6  ;;  %4890 = vmatprep.subr.bf16.mxu0 %v5301_v7  ;;  %v5291_v7 = vld [vmem:[%s5666_s9 + $0x248] ss:$56 sps:$4 sm:$0xff]  }
  0xf4   : > { %4779 = vmatpush3.bf16.msra.mxu1 %v5300_v8  ;;  %4891 = vmatpush3.bf16.msra.mxu0 %v5302_v9  ;;  %v5292_v8 = vld [vmem:[%s5666_s9 + $0x250] ss:$56 sps:$4 sm:$0xff]  }
  0xf5   : > { %4780 = vmatprep.subr.bf16.mxu1 %v5315_v10  ;;  %4892 = vmatprep.subr.bf16.mxu0 %v5317_v11 }
  0xf6   : > { %2957 = vmatmul.mubr.bf16.gmra.mrb[104].mxu1 %v5265_v12  ;;  %3118 = vmatmul.mubr.bf16.gmra.mrb[104].mxu0 %v5266_v13  ;;  %v5293_v13 = vld [vmem:[%s5666_s9 + $0x2bc] ss:$56 sps:$4 sm:$0xff]  }
  0xf7   : > { %2964 = vmatprep.mubr.bf16.mxu1 %v5271_v14  ;;  %3125 = vmatprep.mubr.bf16.mxu0 %v5273_v15  ;;  %v5295_v14 = vld [vmem:[%s5666_s9 + $0x2c4] ss:$56 sps:$4 sm:$0xff]  }
  0xf8   : > { %4781 = vmatpush3.bf16.msra.mxu1 %v5316_v16  ;;  %4893 = vmatpush3.bf16.msra.mxu0 %v5318_v17 }
  0xf9   : > { %v4228_v22 = vpop.f32.mrb[0].mxu0  ;;  %v4276_v23 = vpop.f32.mrb[0].mxu1  ;;  %4782 = vmatprep.subr.bf16.mxu1 %v5331_v18  ;;  %4894 = vmatprep.subr.bf16.mxu0 %v5333_v19 }
  0xfa   : > { %v4229_v26 = vpop.f32.mrb[1].mxu0  ;;  %v4277_v27 = vpop.f32.mrb[1].mxu1 }
  0xfb   : > { %v6073_v30 = vadd.f32 %v4229_v26, %v4228_v22  ;;  %v4278_v31 = vadd.f32 %v4277_v27, %v4276_v23  ;;  %v4231_v32 = vpop.f32.mrb[2].mxu0  ;;  %v4279_v33 = vpop.f32.mrb[2].mxu1  ;;  %v5297_v26 = vld [vmem:[%s5666_s9 + $0x2b8] ss:$56 sps:$4 sm:$0xff]  }
  0xfc   : > { %v4232_v36 = vpop.f32.mrb[3].mxu0  ;;  %v4280_v37 = vpop.f32.mrb[3].mxu1  ;;  %4783 = vmatpush3.bf16.msra.mxu1 %v5332_v20  ;;  %4895 = vmatpush3.bf16.msra.mxu0 %v5334_v21  ;;  %v5298_v27 = vld [vmem:[%s5666_s9 + $0x2c0] ss:$56 sps:$4 sm:$0xff]  }
  0xfd   : > { %v6084_v40 = vadd.f32 %v4278_v31, %v6066_v24  ;;  %v6086_v41 = vadd.f32 %v4232_v36, %v4231_v32  ;;  %v4281_v42 = vadd.f32 %v4280_v37, %v4279_v33  ;;  %4784 = vmatprep.subr.bf16.mxu1 %v5347_v25  ;;  %4896 = vmatprep.subr.bf16.mxu0 %v5349_v39  ;;  %v5303_v33 = vld [vmem:[%s5666_s9 + $0x32c] ss:$56 sps:$4 sm:$0xff]  }
  0xfe   : > { %2965 = vmatmul.mubr.bf16.gmra.mrb[108].mxu1 %v5275_v28  ;;  %3126 = vmatmul.mubr.bf16.gmra.mrb[108].mxu0 %v5276_v29 }
  0xff   : > { %v6098_v46 = vadd.f32 %v4281_v42, %v6066_v24  ;;  %2972 = vmatprep.mubr.bf16.mxu1 %v5277_v34  ;;  %3133 = vmatprep.mubr.bf16.mxu0 %v5279_v35  ;;  %v5305_v34 = vld [vmem:[%s5666_s9 + $0x334] ss:$56 sps:$4 sm:$0xff]  }
 0x100   : > { %4785 = vmatpush3.bf16.msra.mxu1 %v5348_v38  ;;  %4897 = vmatpush3.bf16.msra.mxu0 %v5350_v43 }
 0x101   : > { %v4234_v48 = vpop.f32.mrb[4].mxu0  ;;  %v4282_v49 = vpop.f32.mrb[4].mxu1  ;;  %4786 = vmatprep.subr.bf16.mxu1 %v5363_v44  ;;  %4898 = vmatprep.subr.bf16.mxu0 %v5365_v45 }
 0x102   : > { %v4235_v51 = vpop.f32.mrb[5].mxu0  ;;  %v4283_v52 = vpop.f32.mrb[5].mxu1 }
 0x103   : > { %v6108_v55 = vadd.f32 %v4235_v51, %v4234_v48  ;;  %v4284_v56 = vadd.f32 %v4283_v52, %v4282_v49  ;;  %v4237_v57 = vpop.f32.mrb[6].mxu0  ;;  %v4285_v58 = vpop.f32.mrb[6].mxu1  ;;  %v5307_v48 = vld [vmem:[%s5666_s9 + $0x328] ss:$56 sps:$4 sm:$0xff]  }
 0x104   : > { %v4238_v61 = vpop.f32.mrb[7].mxu0  ;;  %v4286_v62 = vpop.f32.mrb[7].mxu1  ;;  %4787 = vmatpush3.bf16.msra.mxu1 %v5364_v47  ;;  %4899 = vmatpush3.bf16.msra.mxu0 %v5366_v50  ;;  %v5308_v49 = vld [vmem:[%s5666_s9 + $0x330] ss:$56 sps:$4 sm:$0xff]  }
 0x105   : > { %v6113_v63 = vadd.f32 %v4284_v56, %v6066_v24  ;;  %v6115_v0 = vadd.f32 %v4238_v61, %v4237_v57  ;;  %v4287_v1 = vadd.f32 %v4286_v62, %v4285_v58  ;;  %v5311_v56 = vld [vmem:[%s5666_s9 + $0x3a4] ss:$56 sps:$4 sm:$0xff]  }
 0x106   : > { %2973 = vmatmul.mubr.bf16.gmra.mrb[112].mxu1 %v5281_v53  ;;  %3134 = vmatmul.mubr.bf16.gmra.mrb[112].mxu0 %v5282_v54  ;;  %v5309_v54 = vld [vmem:[%s5666_s9 + $0x39c] ss:$56 sps:$4 sm:$0xff]  }
 0x107   : > { %v6118_v2 = vadd.f32 %v4287_v1, %v6066_v24  ;;  %2980 = vmatprep.mubr.bf16.mxu1 %v5287_v59  ;;  %3141 = vmatprep.mubr.bf16.mxu0 %v5289_v60 }
 0x109   : > { %v4240_v3 = vpop.f32.mrb[8].mxu0  ;;  %v4288_v4 = vpop.f32.mrb[8].mxu1 }
 0x10a   : > { %v4241_v5 = vpop.f32.mrb[9].mxu0  ;;  %v4289_v6 = vpop.f32.mrb[9].mxu1 }
 0x10b   : > { %v6122_v9 = vadd.f32 %v4241_v5, %v4240_v3  ;;  %v4290_v10 = vadd.f32 %v4289_v6, %v4288_v4  ;;  %v4243_v11 = vpop.f32.mrb[10].mxu0  ;;  %v4291_v12 = vpop.f32.mrb[10].mxu1  ;;  %v5313_v6 = vld [vmem:[%s5666_s9 + $0x398] ss:$56 sps:$4 sm:$0xff]  }
 0x10c   : > { %v4244_v15 = vpop.f32.mrb[11].mxu0  ;;  %v4292_v16 = vpop.f32.mrb[11].mxu1 }
 0x10d   : > { %v6127_v17 = vadd.f32 %v4290_v10, %v6066_v24  ;;  %v6129_v18 = vadd.f32 %v4244_v15, %v4243_v11  ;;  %v4293_v19 = vadd.f32 %v4292_v16, %v4291_v12 }
 0x10e   : > { %2981 = vmatmul.mubr.bf16.gmra.mrb[116].mxu1 %v5291_v7  ;;  %3142 = vmatmul.mubr.bf16.gmra.mrb[116].mxu0 %v5292_v8  ;;  %v5314_v7 = vld [vmem:[%s5666_s9 + $0x3a0] ss:$56 sps:$4 sm:$0xff]  }
 0x10f   : > { %v6132_v20 = vadd.f32 %v4293_v19, %v6066_v24  ;;  %2988 = vmatprep.mubr.bf16.mxu1 %v5293_v13  ;;  %3149 = vmatprep.mubr.bf16.mxu0 %v5295_v14  ;;  %v5319_v13 = vld [vmem:[%s5666_s9 + $0x40c] ss:$56 sps:$4 sm:$0xff]  }
 0x110   : > { %v5321_v14 = vld [vmem:[%s5666_s9 + $0x414] ss:$56 sps:$4 sm:$0xff]  }
 0x111   : > { %v4246_v21 = vpop.f32.mrb[12].mxu0  ;;  %v4294_v22 = vpop.f32.mrb[12].mxu1 }
 0x112   : > { %v4247_v23 = vpop.f32.mrb[13].mxu0  ;;  %v4295_v25 = vpop.f32.mrb[13].mxu1 }
 0x113   : > { %v6136_v28 = vadd.f32 %v4247_v23, %v4246_v21  ;;  %v4296_v29 = vadd.f32 %v4295_v25, %v4294_v22  ;;  %v4249_v31 = vpop.f32.mrb[14].mxu0  ;;  %v4297_v32 = vpop.f32.mrb[14].mxu1 }
 0x114   : > { %v4250_v35 = vpop.f32.mrb[15].mxu0  ;;  %v4298_v36 = vpop.f32.mrb[15].mxu1 }
 0x115   : > { %v6141_v37 = vadd.f32 %v4296_v29, %v6066_v24  ;;  %v6143_v38 = vadd.f32 %v4250_v35, %v4249_v31  ;;  %v4299_v39 = vadd.f32 %v4298_v36, %v4297_v32  ;;  %v5323_v31 = vld [vmem:[%s5666_s9 + $0x408] ss:$56 sps:$4 sm:$0xff]  }
 0x116   : > { %2989 = vmatmul.mubr.bf16.gmra.mrb[120].mxu1 %v5297_v26  ;;  %3150 = vmatmul.mubr.bf16.gmra.mrb[120].mxu0 %v5298_v27  ;;  %v5324_v32 = vld [vmem:[%s5666_s9 + $0x410] ss:$56 sps:$4 sm:$0xff]  }
 0x117   : > { %v6146_v42 = vadd.f32 %v4299_v39, %v6066_v24  ;;  %2996 = vmatprep.mubr.bf16.mxu1 %v5303_v33  ;;  %3157 = vmatprep.mubr.bf16.mxu0 %v5305_v34  ;;  %v5325_v39 = vld [vmem:[%s5666_s9 + $0x47c] ss:$56 sps:$4 sm:$0xff]  }
 0x119   : > { %v4252_v43 = vpop.f32.mrb[16].mxu0  ;;  %v4300_v44 = vpop.f32.mrb[16].mxu1 }
 0x11a   : > { %v4253_v45 = vpop.f32.mrb[17].mxu0  ;;  %v4301_v47 = vpop.f32.mrb[17].mxu1 }
 0x11b   : > { %v6150_v50 = vadd.f32 %v4253_v45, %v4252_v43  ;;  %v4302_v51 = vadd.f32 %v4301_v47, %v4300_v44  ;;  %v4255_v52 = vpop.f32.mrb[18].mxu0  ;;  %v4303_v53 = vpop.f32.mrb[18].mxu1  ;;  %v5327_v43 = vld [vmem:[%s5666_s9 + $0x484] ss:$56 sps:$4 sm:$0xff]  }
 0x11c   : > { %v4256_v57 = vpop.f32.mrb[19].mxu0  ;;  %v4304_v58 = vpop.f32.mrb[19].mxu1 }
 0x11d   : > { %v6155_v59 = vadd.f32 %v4302_v51, %v6066_v24  ;;  %v6157_v60 = vadd.f32 %v4256_v57, %v4255_v52  ;;  %v4305_v61 = vadd.f32 %v4304_v58, %v4303_v53  ;;  %v5329_v57 = vld [vmem:[%s5666_s9 + $0x478] ss:$56 sps:$4 sm:$0xff]  }
 0x11e   : > { %2997 = vmatmul.mubr.bf16.gmra.mrb[124].mxu1 %v5307_v48  ;;  %3158 = vmatmul.mubr.bf16.gmra.mrb[124].mxu0 %v5308_v49  ;;  %v5330_v58 = vld [vmem:[%s5666_s9 + $0x480] ss:$56 sps:$4 sm:$0xff]  }
 0x11f   : > { %v6160_v62 = vadd.f32 %v4305_v61, %v6066_v24  ;;  %3004 = vmatprep.mubr.bf16.mxu1 %v5309_v54  ;;  %3165 = vmatprep.mubr.bf16.mxu0 %v5311_v56 }
 0x121   : > { %v4258_v1 = vpop.f32.mrb[20].mxu0  ;;  %v4306_v3 = vpop.f32.mrb[20].mxu1 }
 0x122   : > { %v4259_v4 = vpop.f32.mrb[21].mxu0  ;;  %v4307_v5 = vpop.f32.mrb[21].mxu1 }
 0x123   : > { %v6164_v8 = vadd.f32 %v4259_v4, %v4258_v1  ;;  %v4308_v10 = vadd.f32 %v4307_v5, %v4306_v3  ;;  %v4261_v11 = vpop.f32.mrb[22].mxu0  ;;  %v4309_v12 = vpop.f32.mrb[22].mxu1  ;;  %v5335_v5 = vld [vmem:[%s5666_s9 + $0x4ec] ss:$56 sps:$4 sm:$0xff]  }
 0x124   : > { %v4262_v15 = vpop.f32.mrb[23].mxu0  ;;  %v4310_v16 = vpop.f32.mrb[23].mxu1 }
 0x125   : > { %v6169_v19 = vadd.f32 %v4308_v10, %v6066_v24  ;;  %v6171_v21 = vadd.f32 %v4262_v15, %v4261_v11  ;;  %v4311_v22 = vadd.f32 %v4310_v16, %v4309_v12 }
 0x126   : > { %3005 = vmatmul.mubr.bf16.gmra.mrb[128].mxu1 %v5313_v6  ;;  %3166 = vmatmul.mubr.bf16.gmra.mrb[128].mxu0 %v5314_v7  ;;  %v5337_v6 = vld [vmem:[%s5666_s9 + $0x4f4] ss:$56 sps:$4 sm:$0xff]  }
 0x127   : > { %v6174_v23 = vadd.f32 %v4311_v22, %v6066_v24  ;;  %3012 = vmatprep.mubr.bf16.mxu1 %v5319_v13  ;;  %3173 = vmatprep.mubr.bf16.mxu0 %v5321_v14 }
 0x129   : > { %v4264_v25 = vpop.f32.mrb[24].mxu0  ;;  %v4312_v26 = vpop.f32.mrb[24].mxu1 }
 0x12a   : > { %v4265_v27 = vpop.f32.mrb[25].mxu0  ;;  %v4313_v29 = vpop.f32.mrb[25].mxu1 }
 0x12b   : > { %v6178_v33 = vadd.f32 %v4265_v27, %v4264_v25  ;;  %v4314_v34 = vadd.f32 %v4313_v29, %v4312_v26  ;;  %v4267_v35 = vpop.f32.mrb[26].mxu0  ;;  %v4315_v36 = vpop.f32.mrb[26].mxu1  ;;  %v5339_v26 = vld [vmem:[%s5666_s9 + $0x4e8] ss:$56 sps:$4 sm:$0xff]   ;;  %v2460_v29 = vadd.f32 %v6073_v30, %v6066_v24 }
 0x12c   : > { %v4268_v44 = vpop.f32.mrb[27].mxu0  ;;  %v4316_v45 = vpop.f32.mrb[27].mxu1  ;;  %v5340_v27 = vld [vmem:[%s5666_s9 + $0x4f0] ss:$56 sps:$4 sm:$0xff]  }
 0x12d   : > { %v6183_v47 = vadd.f32 %v4314_v34, %v6066_v24  ;;  %v6185_v48 = vadd.f32 %v4268_v44, %v4267_v35  ;;  %v4317_v49 = vadd.f32 %v4316_v45, %v4315_v36  ;;  %v5341_v36 = vld [vmem:[%s5666_s9 + $0x55c] ss:$56 sps:$4 sm:$0xff]   ;;  %v2463_v45 = vadd.f32 %v6086_v41, %v6066_v24  ;;  %v5345_v41 = vld [vmem:[%s5666_s9 + $0x558] ss:$56 sps:$4 sm:$0xff]  }
 0x12e   : > { %3013 = vmatmul.mubr.bf16.gmra.mrb[132].mxu1 %v5323_v31  ;;  %3174 = vmatmul.mubr.bf16.gmra.mrb[132].mxu0 %v5324_v32 }
 0x12f   : > { %v6188_v51 = vadd.f32 %v4317_v49, %v6066_v24  ;;  %3020 = vmatprep.mubr.bf16.mxu1 %v5325_v39  ;;  %3181 = vmatprep.mubr.bf16.mxu0 %v5327_v43  ;;  %v5343_v39 = vld [vmem:[%s5666_s9 + $0x564] ss:$56 sps:$4 sm:$0xff]  }
 0x131   : > { %v4270_v52 = vpop.f32.mrb[28].mxu0  ;;  %v4318_v53 = vpop.f32.mrb[28].mxu1 }
 0x132   : > { %v4271_v54 = vpop.f32.mrb[29].mxu0  ;;  %v4319_v56 = vpop.f32.mrb[29].mxu1 }
 0x133   : > { %v6192_v61 = vadd.f32 %v4271_v54, %v4270_v52  ;;  %v4320_v1 = vadd.f32 %v4319_v56, %v4318_v53  ;;  %v4273_v3 = vpop.f32.mrb[30].mxu0  ;;  %v4321_v4 = vpop.f32.mrb[30].mxu1 }
 0x134   : > { %v4274_v7 = vpop.f32.mrb[31].mxu0  ;;  %v4322_v10 = vpop.f32.mrb[31].mxu1 }
 0x135   : > { %v6197_v11 = vadd.f32 %v4320_v1, %v6066_v24  ;;  %v6199_v12 = vadd.f32 %v4274_v7, %v4273_v3  ;;  %v4323_v13 = vadd.f32 %v4322_v10, %v4321_v4  ;;  %v5346_v4 = vld [vmem:[%s5666_s9 + $0x560] ss:$56 sps:$4 sm:$0xff]  }
 0x136   : > { %3021 = vmatmul.mubr.bf16.gmra.mrb[136].mxu1 %v5329_v57  ;;  %3182 = vmatmul.mubr.bf16.gmra.mrb[136].mxu0 %v5330_v58 }
 0x137   : > { %v6202_v14 = vadd.f32 %v4323_v13, %v6066_v24  ;;  %3028 = vmatprep.mubr.bf16.mxu1 %v5335_v5  ;;  %3189 = vmatprep.mubr.bf16.mxu0 %v5337_v6  ;;  %v2468_v5 = vadd.f32 %v6108_v55, %v6066_v24 }
 0x139   : > { %v4340_v15 = vpop.f32.mrb[32].mxu1  ;;  %v4452_v16 = vpop.f32.mrb[32].mxu0 }
 0x13a   : > { %v4341_v22 = vpop.f32.mrb[33].mxu1  ;;  %v4453_v25 = vpop.f32.mrb[33].mxu0 }
 0x13b   : > { %v4342_v31 = vadd.f32 %v4341_v22, %v4340_v15  ;;  %v4454_v32 = vadd.f32 %v4453_v25, %v4452_v16  ;;  %v4343_v34 = vpop.f32.mrb[34].mxu1  ;;  %v4455_v35 = vpop.f32.mrb[34].mxu0  ;;  %v5351_v15 = vld [vmem:[%s5666_s9 + $0x5cc] ss:$56 sps:$4 sm:$0xff]  }
 0x13c   : > { %v4344_v43 = vpop.f32.mrb[35].mxu1  ;;  %v4456_v44 = vpop.f32.mrb[35].mxu0  ;;  %v5353_v16 = vld [vmem:[%s5666_s9 + $0x5d4] ss:$56 sps:$4 sm:$0xff]  }
 0x13d   : > { %v2621_v49 = vadd.f32 %v4342_v31, %v2460_v29  ;;  %v4345_v52 = vadd.f32 %v4344_v43, %v4343_v34  ;;  %v4457_v53 = vadd.f32 %v4456_v44, %v4455_v35  ;;  %v5356_v44 = vld [vmem:[%s5666_s9 + $0x5d0] ss:$56 sps:$4 sm:$0xff]  }
 0x13e   : > { %3029 = vmatmul.mubr.bf16.gmra.mrb[140].mxu1 %v5339_v26  ;;  %3190 = vmatmul.mubr.bf16.gmra.mrb[140].mxu0 %v5340_v27  ;;  %v2471_v26 = vadd.f32 %v6115_v0, %v6066_v24  ;;  %v5355_v0 = vld [vmem:[%s5666_s9 + $0x5c8] ss:$56 sps:$4 sm:$0xff]  }
 0x13f   : > { %v6212_v54 = vadd.f32 %v4454_v32, %v2621_v49  ;;  %v2624_v30 = vadd.f32 %v4345_v52, %v2463_v45  ;;  %3036 = vmatprep.mubr.bf16.mxu1 %v5341_v36  ;;  %3197 = vmatprep.mubr.bf16.mxu0 %v5343_v39  ;;  %v2476_v45 = vadd.f32 %v6122_v9, %v6066_v24 }
 0x141   : > { %v6214_v56 = vadd.f32 %v4457_v53, %v2624_v30  ;;  %v4346_v57 = vpop.f32.mrb[36].mxu1  ;;  %v4458_v58 = vpop.f32.mrb[36].mxu0 }
 0x142   : > { %v4347_v1 = vpop.f32.mrb[37].mxu1  ;;  %v4459_v3 = vpop.f32.mrb[37].mxu0 }
 0x143   : > { %v4348_v6 = vadd.f32 %v4347_v1, %v4346_v57  ;;  %v4460_v7 = vadd.f32 %v4459_v3, %v4458_v58  ;;  %v4349_v10 = vpop.f32.mrb[38].mxu1  ;;  %v4461_v13 = vpop.f32.mrb[38].mxu0  ;;  %v5357_v57 = vld [vmem:[%s5666_s9 + $0x63c] ss:$56 sps:$4 sm:$0xff]  }
 0x144   : > { %v4350_v22 = vpop.f32.mrb[39].mxu1  ;;  %v4462_v25 = vpop.f32.mrb[39].mxu0  ;;  %v5359_v58 = vld [vmem:[%s5666_s9 + $0x644] ss:$56 sps:$4 sm:$0xff]  }
 0x145   : > { %v2629_v27 = vadd.f32 %v4348_v6, %v2468_v5  ;;  %v4351_v29 = vadd.f32 %v4350_v22, %v4349_v10  ;;  %v4463_v31 = vadd.f32 %v4462_v25, %v4461_v13  ;;  %v5362_v25 = vld [vmem:[%s5666_s9 + $0x640] ss:$56 sps:$4 sm:$0xff]  }
 0x146   : > { %3037 = vmatmul.mubr.bf16.gmra.mrb[144].mxu1 %v5345_v41  ;;  %3198 = vmatmul.mubr.bf16.gmra.mrb[144].mxu0 %v5346_v4  ;;  %v2479_v41 = vadd.f32 %v6129_v18, %v6066_v24  ;;  %v5361_v18 = vld [vmem:[%s5666_s9 + $0x638] ss:$56 sps:$4 sm:$0xff]  }
 0x147   : > { %v6224_v32 = vadd.f32 %v4460_v7, %v2629_v27  ;;  %v2632_v55 = vadd.f32 %v4351_v29, %v2471_v26  ;;  %3044 = vmatprep.mubr.bf16.mxu1 %v5351_v15  ;;  %3205 = vmatprep.mubr.bf16.mxu0 %v5353_v16  ;;  %v2484_v26 = vadd.f32 %v6136_v28, %v6066_v24 }
 0x149   : > { %v6226_v34 = vadd.f32 %v4463_v31, %v2632_v55  ;;  %v4352_v35 = vpop.f32.mrb[40].mxu1  ;;  %v4464_v36 = vpop.f32.mrb[40].mxu0 }
 0x14a   : > { %v4353_v39 = vpop.f32.mrb[41].mxu1  ;;  %v4465_v43 = vpop.f32.mrb[41].mxu0 }
 0x14b   : > { %v4354_v49 = vadd.f32 %v4353_v39, %v4352_v35  ;;  %v4466_v52 = vadd.f32 %v4465_v43, %v4464_v36  ;;  %v4355_v53 = vpop.f32.mrb[42].mxu1  ;;  %v4467_v30 = vpop.f32.mrb[42].mxu0  ;;  %v5367_v35 = vld [vmem:[%s5666_s9 + $0x6ac] ss:$56 sps:$4 sm:$0xff]  }
 0x14c   : > { %v4356_v1 = vpop.f32.mrb[43].mxu1  ;;  %v4468_v3 = vpop.f32.mrb[43].mxu0  ;;  %v5369_v36 = vld [vmem:[%s5666_s9 + $0x6b4] ss:$56 sps:$4 sm:$0xff]  }
 0x14d   : > { %v2637_v4 = vadd.f32 %v4354_v49, %v2476_v45  ;;  %v4357_v5 = vadd.f32 %v4356_v1, %v4355_v53  ;;  %v4469_v6 = vadd.f32 %v4468_v3, %v4467_v30  ;;  %v5372_v3 = vld [vmem:[%s5666_s9 + $0x6b0] ss:$56 sps:$4 sm:$0xff]  }
 0x14e   : > { %3045 = vmatmul.mubr.bf16.gmra.mrb[148].mxu1 %v5355_v0  ;;  %3206 = vmatmul.mubr.bf16.gmra.mrb[148].mxu0 %v5356_v44  ;;  %v2487_v0 = vadd.f32 %v6143_v38, %v6066_v24  ;;  %v5371_v38 = vld [vmem:[%s5666_s9 + $0x6a8] ss:$56 sps:$4 sm:$0xff]  }
 0x14f   : > { %v6236_v7 = vadd.f32 %v4466_v52, %v2637_v4  ;;  %v2640_v9 = vadd.f32 %v4357_v5, %v2479_v41  ;;  %3052 = vmatprep.mubr.bf16.mxu1 %v5357_v57  ;;  %3213 = vmatprep.mubr.bf16.mxu0 %v5359_v58  ;;  %v2492_v41 = vadd.f32 %v6150_v50, %v6066_v24 }
 0x151   : > { %v6238_v10 = vadd.f32 %v4469_v6, %v2640_v9  ;;  %v4358_v13 = vpop.f32.mrb[44].mxu1  ;;  %v4470_v15 = vpop.f32.mrb[44].mxu0 }
 0x152   : > { %v4359_v16 = vpop.f32.mrb[45].mxu1  ;;  %v4471_v22 = vpop.f32.mrb[45].mxu0 }
 0x153   : > { %v4360_v27 = vadd.f32 %v4359_v16, %v4358_v13  ;;  %v4472_v29 = vadd.f32 %v4471_v22, %v4470_v15  ;;  %v4361_v31 = vpop.f32.mrb[46].mxu1  ;;  %v4473_v55 = vpop.f32.mrb[46].mxu0  ;;  %v5375_v13 = vld [vmem:[%s5666_s9 + $0x2c] ss:$56 sps:$4 sm:$0xff]  }
 0x154   : > { %v4362_v39 = vpop.f32.mrb[47].mxu1  ;;  %v4474_v43 = vpop.f32.mrb[47].mxu0  ;;  %v5378_v15 = vld [vmem:[%s5666_s9 + $0x34] ss:$56 sps:$4 sm:$0xff]  }
 0x155   : > { %v2645_v44 = vadd.f32 %v4360_v27, %v2484_v26  ;;  %v4363_v45 = vadd.f32 %v4362_v39, %v4361_v31  ;;  %v4475_v49 = vadd.f32 %v4474_v43, %v4473_v55  ;;  %v5376_v43 = vld [vmem:[%s5666_s9 + $0x30] ss:$56 sps:$4 sm:$0xff]  }
 0x156   : > { %3053 = vmatmul.mubr.bf16.gmra.mrb[152].mxu1 %v5361_v18  ;;  %3214 = vmatmul.mubr.bf16.gmra.mrb[152].mxu0 %v5362_v25  ;;  %v2495_v18 = vadd.f32 %v6157_v60, %v6066_v24  ;;  %v5373_v60 = vld [vmem:[%s5666_s9 + $0x28] ss:$56 sps:$4 sm:$0xff]  }
 0x157   : > { %v6248_v52 = vadd.f32 %v4472_v29, %v2645_v44  ;;  %v2648_v28 = vadd.f32 %v4363_v45, %v2487_v0  ;;  %3060 = vmatprep.mubr.bf16.mxu1 %v5367_v35  ;;  %3221 = vmatprep.mubr.bf16.mxu0 %v5369_v36  ;;  %v2500_v0 = vadd.f32 %v6164_v8, %v6066_v24 }
 0x159   : > { %v6250_v53 = vadd.f32 %v4475_v49, %v2648_v28  ;;  %v4364_v30 = vpop.f32.mrb[48].mxu1  ;;  %v4476_v57 = vpop.f32.mrb[48].mxu0 }
 0x15a   : > { %v4365_v58 = vpop.f32.mrb[49].mxu1  ;;  %v4477_v1 = vpop.f32.mrb[49].mxu0 }
 0x15b   : > { %v4366_v4 = vadd.f32 %v4365_v58, %v4364_v30  ;;  %v4478_v5 = vadd.f32 %v4477_v1, %v4476_v57  ;;  %v4367_v6 = vpop.f32.mrb[50].mxu1  ;;  %v4479_v9 = vpop.f32.mrb[50].mxu0  ;;  %v5379_v30 = vld [vmem:[%s5666_s9 + $0x9c] ss:$56 sps:$4 sm:$0xff]  }
 0x15c   : > { %v4368_v16 = vpop.f32.mrb[51].mxu1  ;;  %v4480_v22 = vpop.f32.mrb[51].mxu0  ;;  %v5381_v57 = vld [vmem:[%s5666_s9 + $0xa4] ss:$56 sps:$4 sm:$0xff]  }
 0x15d   : > { %v2653_v25 = vadd.f32 %v4366_v4, %v2492_v41  ;;  %v4369_v26 = vadd.f32 %v4368_v16, %v4367_v6  ;;  %v4481_v27 = vadd.f32 %v4480_v22, %v4479_v9  ;;  %v5384_v22 = vld [vmem:[%s5666_s9 + $0xa0] ss:$56 sps:$4 sm:$0xff]  }
 0x15e   : > { %3061 = vmatmul.mubr.bf16.gmra.mrb[156].mxu1 %v5371_v38  ;;  %3222 = vmatmul.mubr.bf16.gmra.mrb[156].mxu0 %v5372_v3  ;;  %v2503_v38 = vadd.f32 %v6171_v21, %v6066_v24  ;;  %v5383_v21 = vld [vmem:[%s5666_s9 + $0x98] ss:$56 sps:$4 sm:$0xff]  }
 0x15f   : > { %v6260_v29 = vadd.f32 %v4478_v5, %v2653_v25  ;;  %v2656_v50 = vadd.f32 %v4369_v26, %v2495_v18  ;;  %3262 = vmatprep.mubr.bf16.mxu1 %v5375_v13  ;;  %3423 = vmatprep.mubr.bf16.mxu0 %v5378_v15  ;;  %v2508_v18 = vadd.f32 %v6178_v33, %v6066_v24 }
 0x161   : > { %v6262_v31 = vadd.f32 %v4481_v27, %v2656_v50  ;;  %v4370_v55 = vpop.f32.mrb[52].mxu1  ;;  %v4482_v35 = vpop.f32.mrb[52].mxu0 }
 0x162   : > { %v4371_v36 = vpop.f32.mrb[53].mxu1  ;;  %v4483_v39 = vpop.f32.mrb[53].mxu0 }
 0x163   : > { %v4372_v44 = vadd.f32 %v4371_v36, %v4370_v55  ;;  %v4484_v45 = vadd.f32 %v4483_v39, %v4482_v35  ;;  %v4373_v49 = vpop.f32.mrb[54].mxu1  ;;  %v4485_v28 = vpop.f32.mrb[54].mxu0  ;;  %v5385_v55 = vld [vmem:[%s5666_s9 + $0x10c] ss:$56 sps:$4 sm:$0xff]  }
 0x164   : > { %v4374_v58 = vpop.f32.mrb[55].mxu1  ;;  %v4486_v1 = vpop.f32.mrb[55].mxu0  ;;  %v5387_v35 = vld [vmem:[%s5666_s9 + $0x114] ss:$56 sps:$4 sm:$0xff]  }
 0x165   : > { %v2661_v3 = vadd.f32 %v4372_v44, %v2500_v0  ;;  %v4375_v41 = vadd.f32 %v4374_v58, %v4373_v49  ;;  %v4487_v4 = vadd.f32 %v4486_v1, %v4485_v28  ;;  %v5390_v1 = vld [vmem:[%s5666_s9 + $0x110] ss:$56 sps:$4 sm:$0xff]  }
 0x166   : > { %3263 = vmatmul.mubr.bf16.vlgmr.msra.gmra.mrb[160].mxu1 %v5373_v60  ;;  %3424 = vmatmul.mubr.bf16.vlgmr.msra.gmra.mrb[160].mxu0 %v5376_v43  ;;  %v2511_v60 = vadd.f32 %v6185_v48, %v6066_v24  ;;  %v5389_v48 = vld [vmem:[%s5666_s9 + $0x108] ss:$56 sps:$4 sm:$0xff]  }
 0x167   : > { %v6272_v5 = vadd.f32 %v4484_v45, %v2661_v3  ;;  %v2664_v8 = vadd.f32 %v4375_v41, %v2503_v38  ;;  %3270 = vmatprep.mubr.bf16.mxu1 %v5379_v30  ;;  %3431 = vmatprep.mubr.bf16.mxu0 %v5381_v57  ;;  %v2516_v38 = vadd.f32 %v6192_v61, %v6066_v24 }
 0x169   : > { %v6274_v6 = vadd.f32 %v4487_v4, %v2664_v8  ;;  %v4376_v9 = vpop.f32.mrb[56].mxu1  ;;  %v4488_v13 = vpop.f32.mrb[56].mxu0 }
 0x16a   : > { %v4377_v15 = vpop.f32.mrb[57].mxu1  ;;  %v4489_v16 = vpop.f32.mrb[57].mxu0 }
 0x16b   : > { %v4378_v25 = vadd.f32 %v4377_v15, %v4376_v9  ;;  %v4490_v26 = vadd.f32 %v4489_v16, %v4488_v13  ;;  %v4379_v27 = vpop.f32.mrb[58].mxu1  ;;  %v4491_v50 = vpop.f32.mrb[58].mxu0  ;;  %v5391_v9 = vld [vmem:[%s5666_s9 + $0x17c] ss:$56 sps:$4 sm:$0xff]  }
 0x16c   : > { %v4380_v36 = vpop.f32.mrb[59].mxu1  ;;  %v4492_v39 = vpop.f32.mrb[59].mxu0  ;;  %v5393_v13 = vld [vmem:[%s5666_s9 + $0x184] ss:$56 sps:$4 sm:$0xff]  }
 0x16d   : > { %v2669_v43 = vadd.f32 %v4378_v25, %v2508_v18  ;;  %v4381_v0 = vadd.f32 %v4380_v36, %v4379_v27  ;;  %v4493_v44 = vadd.f32 %v4492_v39, %v4491_v50 }
 0x16e   : > { %3271 = vmatmul.mubr.bf16.gmra.mrb[164].mxu1 %v5383_v21  ;;  %3432 = vmatmul.mubr.bf16.gmra.mrb[164].mxu0 %v5384_v22  ;;  %v2519_v21 = vadd.f32 %v6199_v12, %v6066_v24  ;;  %v5395_v24 = vld [vmem:[%s5666_s9 + $0x178] ss:$56 sps:$4 sm:$0xff]  }
 0x16f   : > { %v6284_v45 = vadd.f32 %v4490_v26, %v2669_v43  ;;  %v2672_v33 = vadd.f32 %v4381_v0, %v2511_v60  ;;  %3278 = vmatprep.mubr.bf16.mxu1 %v5385_v55  ;;  %3439 = vmatprep.mubr.bf16.mxu0 %v5387_v35  ;;  %v5396_v12 = vld [vmem:[%s5666_s9 + $0x180] ss:$56 sps:$4 sm:$0xff]  }
 0x171   : > { %v6286_v49 = vadd.f32 %v4493_v44, %v2672_v33  ;;  %v4382_v28 = vpop.f32.mrb[60].mxu1  ;;  %v4494_v30 = vpop.f32.mrb[60].mxu0  ;;  %v5397_v44 = vld [vmem:[%s5666_s9 + $0x1ec] ss:$56 sps:$4 sm:$0xff]  }
 0x172   : > { %v4383_v57 = vpop.f32.mrb[61].mxu1  ;;  %v4495_v58 = vpop.f32.mrb[61].mxu0  ;;  %v5399_v33 = vld [vmem:[%s5666_s9 + $0x1f4] ss:$56 sps:$4 sm:$0xff]  }
 0x173   : > { %v4384_v3 = vadd.f32 %v4383_v57, %v4382_v28  ;;  %v4496_v41 = vadd.f32 %v4495_v58, %v4494_v30  ;;  %v4385_v4 = vpop.f32.mrb[62].mxu1  ;;  %v4497_v8 = vpop.f32.mrb[62].mxu0 }
 0x174   : > { %v4386_v15 = vpop.f32.mrb[63].mxu1  ;;  %v4498_v16 = vpop.f32.mrb[63].mxu0 }
 0x175   : > { %v2677_v22 = vadd.f32 %v4384_v3, %v2516_v38  ;;  %v4387_v18 = vadd.f32 %v4386_v15, %v4385_v4  ;;  %v4499_v25 = vadd.f32 %v4498_v16, %v4497_v8 }
 0x176   : > { %3279 = vmatmul.mubr.bf16.gmra.mrb[168].mxu1 %v5389_v48  ;;  %3440 = vmatmul.mubr.bf16.gmra.mrb[168].mxu0 %v5390_v1 }
 0x177   : > { %v6296_v61 = vadd.f32 %v4496_v41, %v2677_v22  ;;  %v2680_v26 = vadd.f32 %v4387_v18, %v2519_v21  ;;  %3286 = vmatprep.mubr.bf16.mxu1 %v5391_v9  ;;  %3447 = vmatprep.mubr.bf16.mxu0 %v5393_v13  ;;  %v5401_v13 = vld [vmem:[%s5666_s9 + $0x1e8] ss:$56 sps:$4 sm:$0xff]   ;;  %v5403_v18 = vld [vmem:[%s5666_s9 + $0x25c] ss:$56 sps:$4 sm:$0xff]  }
 0x179   : > { %v6298_v27 = vadd.f32 %v4499_v25, %v2680_v26  ;;  %v4388_v50 = vpop.f32.mrb[64].mxu1  ;;  %v4500_v55 = vpop.f32.mrb[64].mxu0  ;;  %v5405_v25 = vld [vmem:[%s5666_s9 + $0x264] ss:$56 sps:$4 sm:$0xff]  }
 0x17a   : > { %v4389_v35 = vpop.f32.mrb[65].mxu1  ;;  %v4501_v36 = vpop.f32.mrb[65].mxu0 }
 0x17b   : > { %v4390_v39 = vadd.f32 %v4389_v35, %v4388_v50  ;;  %v4502_v60 = vadd.f32 %v4501_v36, %v4500_v55  ;;  %v4391_v43 = vpop.f32.mrb[66].mxu1  ;;  %v4503_v0 = vpop.f32.mrb[66].mxu0 }
 0x17c   : > { %v4392_v28 = vpop.f32.mrb[67].mxu1  ;;  %v4504_v30 = vpop.f32.mrb[67].mxu0 }
 0x17d   : > { %v2685_v57 = vadd.f32 %v4390_v39, %v6084_v40  ;;  %v4393_v58 = vadd.f32 %v4392_v28, %v4391_v43  ;;  %v4505_v48 = vadd.f32 %v4504_v30, %v4503_v0  ;;  %v5402_v40 = vld [vmem:[%s5666_s9 + $0x1f0] ss:$56 sps:$4 sm:$0xff]  }
 0x17e   : > { %3287 = vmatmul.mubr.bf16.gmra.mrb[172].mxu1 %v5395_v24  ;;  %3448 = vmatmul.mubr.bf16.gmra.mrb[172].mxu0 %v5396_v12 }
 0x17f   : > { %v6305_v1 = vadd.f32 %v4502_v60, %v2685_v57  ;;  %v2688_v38 = vadd.f32 %v4393_v58, %v6098_v46  ;;  %3294 = vmatprep.mubr.bf16.mxu1 %v5397_v44  ;;  %3455 = vmatprep.mubr.bf16.mxu0 %v5399_v33  ;;  %v5407_v44 = vld [vmem:[%s5666_s9 + $0x258] ss:$56 sps:$4 sm:$0xff]   ;;  %v5409_v58 = vld [vmem:[%s5666_s9 + $0x2cc] ss:$56 sps:$4 sm:$0xff]  }
 0x181   : > { %v6308_v3 = vadd.f32 %v4505_v48, %v2688_v38  ;;  %v4394_v41 = vpop.f32.mrb[68].mxu1  ;;  %v4506_v4 = vpop.f32.mrb[68].mxu0  ;;  %v5411_v48 = vld [vmem:[%s5666_s9 + $0x2d4] ss:$56 sps:$4 sm:$0xff]  }
 0x182   : > { %v4395_v8 = vpop.f32.mrb[69].mxu1  ;;  %v4507_v9 = vpop.f32.mrb[69].mxu0 }
 0x183   : > { %v4396_v15 = vadd.f32 %v4395_v8, %v4394_v41  ;;  %v4508_v16 = vadd.f32 %v4507_v9, %v4506_v4  ;;  %v4397_v21 = vpop.f32.mrb[70].mxu1  ;;  %v4509_v22 = vpop.f32.mrb[70].mxu0 }
 0x184   : > { %v4398_v26 = vpop.f32.mrb[71].mxu1  ;;  %v4510_v50 = vpop.f32.mrb[71].mxu0 }
 0x185   : > { %v2693_v46 = vadd.f32 %v4396_v15, %v6113_v63  ;;  %v4399_v55 = vadd.f32 %v4398_v26, %v4397_v21  ;;  %v4511_v35 = vadd.f32 %v4510_v50, %v4509_v22  ;;  %v5408_v63 = vld [vmem:[%s5666_s9 + $0x260] ss:$56 sps:$4 sm:$0xff]  }
 0x186   : > { %3295 = vmatmul.mubr.bf16.gmra.mrb[176].mxu1 %v5401_v13  ;;  %3456 = vmatmul.mubr.bf16.gmra.mrb[176].mxu0 %v5402_v40 }
 0x187   : > { %v6315_v36 = vadd.f32 %v4508_v16, %v2693_v46  ;;  %v2696_v24 = vadd.f32 %v4399_v55, %v6118_v2  ;;  %3302 = vmatprep.mubr.bf16.mxu1 %v5403_v18  ;;  %3463 = vmatprep.mubr.bf16.mxu0 %v5405_v25  ;;  %v5413_v18 = vld [vmem:[%s5666_s9 + $0x2c8] ss:$56 sps:$4 sm:$0xff]   ;;  %v5415_v55 = vld [vmem:[%s5666_s9 + $0x33c] ss:$56 sps:$4 sm:$0xff]  }
 0x189   : > { %v6318_v12 = vadd.f32 %v4511_v35, %v2696_v24  ;;  %v4400_v39 = vpop.f32.mrb[72].mxu1  ;;  %v4512_v60 = vpop.f32.mrb[72].mxu0  ;;  %v5417_v35 = vld [vmem:[%s5666_s9 + $0x344] ss:$56 sps:$4 sm:$0xff]  }
 0x18a   : > { %v4401_v43 = vpop.f32.mrb[73].mxu1  ;;  %v4513_v0 = vpop.f32.mrb[73].mxu0 }
 0x18b   : > { %v4402_v33 = vadd.f32 %v4401_v43, %v4400_v39  ;;  %v4514_v28 = vadd.f32 %v4513_v0, %v4512_v60  ;;  %v4403_v30 = vpop.f32.mrb[74].mxu1  ;;  %v4515_v57 = vpop.f32.mrb[74].mxu0 }
 0x18c   : > { %v4404_v38 = vpop.f32.mrb[75].mxu1  ;;  %v4516_v41 = vpop.f32.mrb[75].mxu0 }
 0x18d   : > { %v2701_v2 = vadd.f32 %v4402_v33, %v6127_v17  ;;  %v4405_v4 = vadd.f32 %v4404_v38, %v4403_v30  ;;  %v4517_v8 = vadd.f32 %v4516_v41, %v4515_v57  ;;  %v5414_v17 = vld [vmem:[%s5666_s9 + $0x2d0] ss:$56 sps:$4 sm:$0xff]  }
 0x18e   : > { %3303 = vmatmul.mubr.bf16.gmra.mrb[180].mxu1 %v5407_v44  ;;  %3464 = vmatmul.mubr.bf16.gmra.mrb[180].mxu0 %v5408_v63 }
 0x18f   : > { %v6325_v9 = vadd.f32 %v4514_v28, %v2701_v2  ;;  %v2704_v13 = vadd.f32 %v4405_v4, %v6132_v20  ;;  %3310 = vmatprep.mubr.bf16.mxu1 %v5409_v58  ;;  %3471 = vmatprep.mubr.bf16.mxu0 %v5411_v48  ;;  %v5419_v58 = vld [vmem:[%s5666_s9 + $0x338] ss:$56 sps:$4 sm:$0xff]   ;;  %v5421_v4 = vld [vmem:[%s5666_s9 + $0x3ac] ss:$56 sps:$4 sm:$0xff]  }
 0x191   : > { %v6328_v40 = vadd.f32 %v4517_v8, %v2704_v13  ;;  %v4406_v15 = vpop.f32.mrb[76].mxu1  ;;  %v4518_v16 = vpop.f32.mrb[76].mxu0  ;;  %v5423_v8 = vld [vmem:[%s5666_s9 + $0x3b4] ss:$56 sps:$4 sm:$0xff]  }
 0x192   : > { %v4407_v21 = vpop.f32.mrb[77].mxu1  ;;  %v4519_v22 = vpop.f32.mrb[77].mxu0 }
 0x193   : > { %v4408_v25 = vadd.f32 %v4407_v21, %v4406_v15  ;;  %v4520_v26 = vadd.f32 %v4519_v22, %v4518_v16  ;;  %v4409_v50 = vpop.f32.mrb[78].mxu1  ;;  %v4521_v46 = vpop.f32.mrb[78].mxu0 }
 0x194   : > { %v4410_v24 = vpop.f32.mrb[79].mxu1  ;;  %v4522_v39 = vpop.f32.mrb[79].mxu0 }
 0x195   : > { %v2709_v20 = vadd.f32 %v4408_v25, %v6141_v37  ;;  %v4411_v60 = vadd.f32 %v4410_v24, %v4409_v50  ;;  %v4523_v43 = vadd.f32 %v4522_v39, %v4521_v46  ;;  %v5420_v37 = vld [vmem:[%s5666_s9 + $0x340] ss:$56 sps:$4 sm:$0xff]  }
 0x196   : > { %3311 = vmatmul.mubr.bf16.gmra.mrb[184].mxu1 %v5413_v18  ;;  %3472 = vmatmul.mubr.bf16.gmra.mrb[184].mxu0 %v5414_v17 }
 0x197   : > { %v6335_v0 = vadd.f32 %v4520_v26, %v2709_v20  ;;  %v2712_v44 = vadd.f32 %v4411_v60, %v6146_v42  ;;  %3318 = vmatprep.mubr.bf16.mxu1 %v5415_v55  ;;  %3479 = vmatprep.mubr.bf16.mxu0 %v5417_v35  ;;  %v5425_v55 = vld [vmem:[%s5666_s9 + $0x3a8] ss:$56 sps:$4 sm:$0xff]   ;;  %v5427_v60 = vld [vmem:[%s5666_s9 + $0x41c] ss:$56 sps:$4 sm:$0xff]  }
 0x199   : > { %v6338_v63 = vadd.f32 %v4523_v43, %v2712_v44  ;;  %v4412_v33 = vpop.f32.mrb[80].mxu1  ;;  %v4524_v28 = vpop.f32.mrb[80].mxu0  ;;  %v5429_v43 = vld [vmem:[%s5666_s9 + $0x424] ss:$56 sps:$4 sm:$0xff]  }
 0x19a   : > { %v4413_v30 = vpop.f32.mrb[81].mxu1  ;;  %v4525_v57 = vpop.f32.mrb[81].mxu0 }
 0x19b   : > { %v4414_v48 = vadd.f32 %v4413_v30, %v4412_v33  ;;  %v4526_v38 = vadd.f32 %v4525_v57, %v4524_v28  ;;  %v4415_v41 = vpop.f32.mrb[82].mxu1  ;;  %v4527_v2 = vpop.f32.mrb[82].mxu0 }
 0x19c   : > { %v4416_v13 = vpop.f32.mrb[83].mxu1  ;;  %v4528_v15 = vpop.f32.mrb[83].mxu0 }
 0x19d   : > { %v2717_v42 = vadd.f32 %v4414_v48, %v6155_v59  ;;  %v4417_v16 = vadd.f32 %v4416_v13, %v4415_v41  ;;  %v4529_v21 = vadd.f32 %v4528_v15, %v4527_v2  ;;  %v5426_v59 = vld [vmem:[%s5666_s9 + $0x3b0] ss:$56 sps:$4 sm:$0xff]  }
 0x19e   : > { %3319 = vmatmul.mubr.bf16.gmra.mrb[188].mxu1 %v5419_v58  ;;  %3480 = vmatmul.mubr.bf16.gmra.mrb[188].mxu0 %v5420_v37 }
 0x19f   : > { %v6345_v22 = vadd.f32 %v4526_v38, %v2717_v42  ;;  %v2720_v18 = vadd.f32 %v4417_v16, %v6160_v62  ;;  %3326 = vmatprep.mubr.bf16.mxu1 %v5421_v4  ;;  %3487 = vmatprep.mubr.bf16.mxu0 %v5423_v8  ;;  %v5431_v4 = vld [vmem:[%s5666_s9 + $0x418] ss:$56 sps:$4 sm:$0xff]   ;;  %v5433_v16 = vld [vmem:[%s5666_s9 + $0x48c] ss:$56 sps:$4 sm:$0xff]  }
 0x1a1   : > { %v6348_v17 = vadd.f32 %v4529_v21, %v2720_v18  ;;  %v4418_v25 = vpop.f32.mrb[84].mxu1  ;;  %v4530_v26 = vpop.f32.mrb[84].mxu0  ;;  %v5435_v21 = vld [vmem:[%s5666_s9 + $0x494] ss:$56 sps:$4 sm:$0xff]  }
 0x1a2   : > { %v4419_v50 = vpop.f32.mrb[85].mxu1  ;;  %v4531_v46 = vpop.f32.mrb[85].mxu0 }
 0x1a3   : > { %v4420_v35 = vadd.f32 %v4419_v50, %v4418_v25  ;;  %v4532_v24 = vadd.f32 %v4531_v46, %v4530_v26  ;;  %v4421_v39 = vpop.f32.mrb[86].mxu1  ;;  %v4533_v20 = vpop.f32.mrb[86].mxu0 }
 0x1a4   : > { %v4422_v44 = vpop.f32.mrb[87].mxu1  ;;  %v4534_v33 = vpop.f32.mrb[87].mxu0 }
 0x1a5   : > { %v2725_v62 = vadd.f32 %v4420_v35, %v6169_v19  ;;  %v4423_v28 = vadd.f32 %v4422_v44, %v4421_v39  ;;  %v4535_v30 = vadd.f32 %v4534_v33, %v4533_v20  ;;  %v5432_v19 = vld [vmem:[%s5666_s9 + $0x420] ss:$56 sps:$4 sm:$0xff]  }
 0x1a6   : > { %3327 = vmatmul.mubr.bf16.gmra.mrb[192].mxu1 %v5425_v55  ;;  %3488 = vmatmul.mubr.bf16.gmra.mrb[192].mxu0 %v5426_v59 }
 0x1a7   : > { %v6355_v57 = vadd.f32 %v4532_v24, %v2725_v62  ;;  %v2728_v58 = vadd.f32 %v4423_v28, %v6174_v23  ;;  %3334 = vmatprep.mubr.bf16.mxu1 %v5427_v60  ;;  %3495 = vmatprep.mubr.bf16.mxu0 %v5429_v43  ;;  %v5437_v60 = vld [vmem:[%s5666_s9 + $0x488] ss:$56 sps:$4 sm:$0xff]   ;;  %v5439_v28 = vld [vmem:[%s5666_s9 + $0x4fc] ss:$56 sps:$4 sm:$0xff]  }
 0x1a9   : > { %v6358_v37 = vadd.f32 %v4535_v30, %v2728_v58  ;;  %v4424_v48 = vpop.f32.mrb[88].mxu1  ;;  %v4536_v38 = vpop.f32.mrb[88].mxu0  ;;  %v5441_v30 = vld [vmem:[%s5666_s9 + $0x504] ss:$56 sps:$4 sm:$0xff]  }
 0x1aa   : > { %v4425_v41 = vpop.f32.mrb[89].mxu1  ;;  %v4537_v2 = vpop.f32.mrb[89].mxu0 }
 0x1ab   : > { %v4426_v8 = vadd.f32 %v4425_v41, %v4424_v48  ;;  %v4538_v13 = vadd.f32 %v4537_v2, %v4536_v38  ;;  %v4427_v15 = vpop.f32.mrb[90].mxu1  ;;  %v4539_v42 = vpop.f32.mrb[90].mxu0 }
 0x1ac   : > { %v4428_v18 = vpop.f32.mrb[91].mxu1  ;;  %v4540_v25 = vpop.f32.mrb[91].mxu0 }
 0x1ad   : > { %v2733_v23 = vadd.f32 %v4426_v8, %v6183_v47  ;;  %v4429_v26 = vadd.f32 %v4428_v18, %v4427_v15  ;;  %v4541_v50 = vadd.f32 %v4540_v25, %v4539_v42  ;;  %v5438_v47 = vld [vmem:[%s5666_s9 + $0x490] ss:$56 sps:$4 sm:$0xff]  }
 0x1ae   : > { %3335 = vmatmul.mubr.bf16.gmra.mrb[196].mxu1 %v5431_v4  ;;  %3496 = vmatmul.mubr.bf16.gmra.mrb[196].mxu0 %v5432_v19 }
 0x1af   : > { %v6365_v46 = vadd.f32 %v4538_v13, %v2733_v23  ;;  %v2736_v55 = vadd.f32 %v4429_v26, %v6188_v51  ;;  %3342 = vmatprep.mubr.bf16.mxu1 %v5433_v16  ;;  %3503 = vmatprep.mubr.bf16.mxu0 %v5435_v21  ;;  %v5443_v16 = vld [vmem:[%s5666_s9 + $0x4f8] ss:$56 sps:$4 sm:$0xff]   ;;  %v5445_v26 = vld [vmem:[%s5666_s9 + $0x56c] ss:$56 sps:$4 sm:$0xff]  }
 0x1b1   : > { %v6368_v59 = vadd.f32 %v4541_v50, %v2736_v55  ;;  %v4430_v35 = vpop.f32.mrb[92].mxu1  ;;  %v4542_v24 = vpop.f32.mrb[92].mxu0  ;;  %v5447_v50 = vld [vmem:[%s5666_s9 + $0x574] ss:$56 sps:$4 sm:$0xff]  }
 0x1b2   : > { %v4431_v39 = vpop.f32.mrb[93].mxu1  ;;  %v4543_v20 = vpop.f32.mrb[93].mxu0 }
 0x1b3   : > { %v4432_v43 = vadd.f32 %v4431_v39, %v4430_v35  ;;  %v4544_v44 = vadd.f32 %v4543_v20, %v4542_v24  ;;  %v4433_v33 = vpop.f32.mrb[94].mxu1  ;;  %v4545_v62 = vpop.f32.mrb[94].mxu0 }
 0x1b4   : > { %v4434_v58 = vpop.f32.mrb[95].mxu1  ;;  %v4546_v48 = vpop.f32.mrb[95].mxu0 }
 0x1b5   : > { %v2741_v51 = vadd.f32 %v4432_v43, %v6197_v11  ;;  %v4435_v38 = vadd.f32 %v4434_v58, %v4433_v33  ;;  %v4547_v41 = vadd.f32 %v4546_v48, %v4545_v62  ;;  %v5444_v11 = vld [vmem:[%s5666_s9 + $0x500] ss:$56 sps:$4 sm:$0xff]  }
 0x1b6   : > { %3343 = vmatmul.mubr.bf16.gmra.mrb[200].mxu1 %v5437_v60  ;;  %3504 = vmatmul.mubr.bf16.gmra.mrb[200].mxu0 %v5438_v47 }
 0x1b7   : > { %v6375_v2 = vadd.f32 %v4544_v44, %v2741_v51  ;;  %v2744_v4 = vadd.f32 %v4435_v38, %v6202_v14  ;;  %3350 = vmatprep.mubr.bf16.mxu1 %v5439_v28  ;;  %3511 = vmatprep.mubr.bf16.mxu0 %v5441_v30  ;;  %v5449_v28 = vld [vmem:[%s5666_s9 + $0x568] ss:$56 sps:$4 sm:$0xff]   ;;  %v5451_v38 = vld [vmem:[%s5666_s9 + $0x5dc] ss:$56 sps:$4 sm:$0xff]  }
 0x1b9   : > { %v6378_v19 = vadd.f32 %v4547_v41, %v2744_v4  ;;  %v4564_v8 = vpop.f32.mrb[96].mxu1  ;;  %v4676_v13 = vpop.f32.mrb[96].mxu0  ;;  %v5453_v41 = vld [vmem:[%s5666_s9 + $0x5e4] ss:$56 sps:$4 sm:$0xff]  }
 0x1ba   : > { %v4565_v15 = vpop.f32.mrb[97].mxu1  ;;  %v4677_v42 = vpop.f32.mrb[97].mxu0 }
 0x1bb   : > { %v4566_v21 = vadd.f32 %v4565_v15, %v4564_v8  ;;  %v4678_v18 = vadd.f32 %v4677_v42, %v4676_v13  ;;  %v4567_v25 = vpop.f32.mrb[98].mxu1  ;;  %v4679_v23 = vpop.f32.mrb[98].mxu0 }
 0x1bc   : > { %v4568_v55 = vpop.f32.mrb[99].mxu1  ;;  %v4680_v35 = vpop.f32.mrb[99].mxu0 }
 0x1bd   : > { %v2943_v14 = vadd.f32 %v4566_v21, %v6212_v54  ;;  %v4569_v24 = vadd.f32 %v4568_v55, %v4567_v25  ;;  %v4681_v39 = vadd.f32 %v4680_v35, %v4679_v23  ;;  %v5450_v54 = vld [vmem:[%s5666_s9 + $0x570] ss:$56 sps:$4 sm:$0xff]  }
 0x1be   : > { %3351 = vmatmul.mubr.bf16.gmra.mrb[204].mxu1 %v5443_v16  ;;  %3512 = vmatmul.mubr.bf16.gmra.mrb[204].mxu0 %v5444_v11 }
 0x1bf   : > { %v6385_v20 = vadd.f32 %v4678_v18, %v2943_v14  ;;  %v2946_v60 = vadd.f32 %v4569_v24, %v6214_v56  ;;  %3358 = vmatprep.mubr.bf16.mxu1 %v5445_v26  ;;  %3519 = vmatprep.mubr.bf16.mxu0 %v5447_v50  ;;  %v5455_v26 = vld [vmem:[%s5666_s9 + $0x5d8] ss:$56 sps:$4 sm:$0xff]   ;;  %v5457_v24 = vld [vmem:[%s5666_s9 + $0x64c] ss:$56 sps:$4 sm:$0xff]  }
 0x1c1   : > { %v6388_v47 = vadd.f32 %v4681_v39, %v2946_v60  ;;  %v4570_v43 = vpop.f32.mrb[100].mxu1  ;;  %v4682_v44 = vpop.f32.mrb[100].mxu0  ;;  %v5459_v39 = vld [vmem:[%s5666_s9 + $0x654] ss:$56 sps:$4 sm:$0xff]  }
 0x1c2   : > { %v4571_v33 = vpop.f32.mrb[101].mxu1  ;;  %v4683_v62 = vpop.f32.mrb[101].mxu0 }
 0x1c3   : > { %v4572_v30 = vadd.f32 %v4571_v33, %v4570_v43  ;;  %v4684_v58 = vadd.f32 %v4683_v62, %v4682_v44  ;;  %v4573_v48 = vpop.f32.mrb[102].mxu1  ;;  %v4685_v51 = vpop.f32.mrb[102].mxu0 }
 0x1c4   : > { %v4574_v4 = vpop.f32.mrb[103].mxu1  ;;  %v4686_v8 = vpop.f32.mrb[103].mxu0 }
 0x1c5   : > { %v2951_v56 = vadd.f32 %v4572_v30, %v6224_v32  ;;  %v4575_v13 = vadd.f32 %v4574_v4, %v4573_v48  ;;  %v4687_v15 = vadd.f32 %v4686_v8, %v4685_v51  ;;  %v5456_v32 = vld [vmem:[%s5666_s9 + $0x5e0] ss:$56 sps:$4 sm:$0xff]  }
 0x1c6   : > { %3359 = vmatmul.mubr.bf16.gmra.mrb[208].mxu1 %v5449_v28  ;;  %3520 = vmatmul.mubr.bf16.gmra.mrb[208].mxu0 %v5450_v54 }
 0x1c7   : > { %v6395_v42 = vadd.f32 %v4684_v58, %v2951_v56  ;;  %v2954_v16 = vadd.f32 %v4575_v13, %v6226_v34  ;;  %3366 = vmatprep.mubr.bf16.mxu1 %v5451_v38  ;;  %3527 = vmatprep.mubr.bf16.mxu0 %v5453_v41  ;;  %v5461_v38 = vld [vmem:[%s5666_s9 + $0x648] ss:$56 sps:$4 sm:$0xff]   ;;  %v5463_v13 = vld [vmem:[%s5666_s9 + $0x6bc] ss:$56 sps:$4 sm:$0xff]  }
 0x1c9   : > { %v6398_v11 = vadd.f32 %v4687_v15, %v2954_v16  ;;  %v4576_v21 = vpop.f32.mrb[104].mxu1  ;;  %v4688_v18 = vpop.f32.mrb[104].mxu0  ;;  %v5465_v15 = vld [vmem:[%s5666_s9 + $0x6c4] ss:$56 sps:$4 sm:$0xff]  }
 0x1ca   : > { %v4577_v25 = vpop.f32.mrb[105].mxu1  ;;  %v4689_v23 = vpop.f32.mrb[105].mxu0 }
 0x1cb   : > { %v4578_v50 = vadd.f32 %v4577_v25, %v4576_v21  ;;  %v4690_v55 = vadd.f32 %v4689_v23, %v4688_v18  ;;  %v4579_v35 = vpop.f32.mrb[106].mxu1  ;;  %v4691_v14 = vpop.f32.mrb[106].mxu0 }
 0x1cc   : > { %v4580_v60 = vpop.f32.mrb[107].mxu1  ;;  %v4692_v43 = vpop.f32.mrb[107].mxu0 }
 0x1cd   : > { %v2959_v34 = vadd.f32 %v4578_v50, %v6236_v7  ;;  %v4581_v44 = vadd.f32 %v4580_v60, %v4579_v35  ;;  %v4693_v33 = vadd.f32 %v4692_v43, %v4691_v14  ;;  %v5462_v7 = vld [vmem:[%s5666_s9 + $0x650] ss:$56 sps:$4 sm:$0xff]  }
 0x1ce   : > { %3367 = vmatmul.mubr.bf16.gmra.mrb[212].mxu1 %v5455_v26  ;;  %3528 = vmatmul.mubr.bf16.gmra.mrb[212].mxu0 %v5456_v32 }
 0x1cf   : > { %v6405_v62 = vadd.f32 %v4690_v55, %v2959_v34  ;;  %v2962_v28 = vadd.f32 %v4581_v44, %v6238_v10  ;;  %3374 = vmatprep.mubr.bf16.mxu1 %v5457_v24  ;;  %3535 = vmatprep.mubr.bf16.mxu0 %v5459_v39  ;;  %v5467_v24 = vld [vmem:[%s5666_s9 + $0x6b8] ss:$56 sps:$4 sm:$0xff]  }
 0x1d0   : > { %v5468_v39 = vld [vmem:[%s5666_s9 + $0x6c0] ss:$56 sps:$4 sm:$0xff]   ;;  %s3840_s9 = sshll.u32 %s6572_s16, 3 }
 0x1d1   : > { %v6408_v54 = vadd.f32 %v4693_v33, %v2962_v28  ;;  %v4582_v30 = vpop.f32.mrb[108].mxu1  ;;  %v4694_v58 = vpop.f32.mrb[108].mxu0  ;;  %s6506_s30 = scalar_lea.vmem %s6570_s3, %s3840_s9 }
 0x1d2   : > { %v4583_v48 = vpop.f32.mrb[109].mxu1  ;;  %v4695_v51 = vpop.f32.mrb[109].mxu0 }
 0x1d3   : > { %v4584_v41 = vadd.f32 %v4583_v48, %v4582_v30  ;;  %v4696_v4 = vadd.f32 %v4695_v51, %v4694_v58  ;;  %v4585_v8 = vpop.f32.mrb[110].mxu1  ;;  %v4697_v56 = vpop.f32.mrb[110].mxu0 }
 0x1d4   : > { %v4586_v16 = vpop.f32.mrb[111].mxu1  ;;  %v4698_v21 = vpop.f32.mrb[111].mxu0 }
 0x1d5   : > { %v2967_v10 = vadd.f32 %v4584_v41, %v6248_v52  ;;  %v4587_v18 = vadd.f32 %v4586_v16, %v4585_v8  ;;  %v4699_v25 = vadd.f32 %v4698_v21, %v4697_v56 }
 0x1d6   : > { %3375 = vmatmul.mubr.bf16.gmra.mrb[216].mxu1 %v5461_v38  ;;  %3536 = vmatmul.mubr.bf16.gmra.mrb[216].mxu0 %v5462_v7 }
 0x1d7   : > { %v6415_v23 = vadd.f32 %v4696_v4, %v2967_v10  ;;  %v2970_v26 = vadd.f32 %v4587_v18, %v6250_v53  ;;  %3382 = vmatprep.mubr.bf16.mxu1 %v5463_v13  ;;  %3543 = vmatprep.mubr.bf16.mxu0 %v5465_v15 }
 0x1d9   : > { %v6418_v32 = vadd.f32 %v4699_v25, %v2970_v26  ;;  %v4588_v50 = vpop.f32.mrb[112].mxu1  ;;  %v4700_v55 = vpop.f32.mrb[112].mxu0 }
 0x1da   : > { %v4589_v35 = vpop.f32.mrb[113].mxu1  ;;  %v4701_v14 = vpop.f32.mrb[113].mxu0 }
 0x1db   : > { %v4590_v60 = vadd.f32 %v4589_v35, %v4588_v50  ;;  %v4702_v52 = vadd.f32 %v4701_v14, %v4700_v55  ;;  %v4591_v43 = vpop.f32.mrb[114].mxu1  ;;  %v4703_v34 = vpop.f32.mrb[114].mxu0 }
 0x1dc   : > { %v4592_v44 = vpop.f32.mrb[115].mxu1  ;;  %v4704_v33 = vpop.f32.mrb[115].mxu0 }
 0x1dd   : > { %v2975_v28 = vadd.f32 %v4590_v60, %v6260_v29  ;;  %v4593_v30 = vadd.f32 %v4592_v44, %v4591_v43  ;;  %v4705_v53 = vadd.f32 %v4704_v33, %v4703_v34 }
 0x1de   : > { %3383 = vmatmul.mubr.bf16.gmra.mrb[220].mxu1 %v5467_v24  ;;  %3544 = vmatmul.mubr.bf16.gmra.mrb[220].mxu0 %v5468_v39 }
 0x1df   : > { %v6423_v58 = vadd.f32 %v4702_v52, %v2975_v28  ;;  %v2978_v48 = vadd.f32 %v4593_v30, %v6262_v31 }
 0x1e1   : > { %v6426_v51 = vadd.f32 %v4705_v53, %v2978_v48  ;;  %v4594_v38 = vpop.f32.mrb[116].mxu1  ;;  %v4706_v7 = vpop.f32.mrb[116].mxu0 }
 0x1e2   : > { %v4595_v41 = vpop.f32.mrb[117].mxu1  ;;  %v4707_v4 = vpop.f32.mrb[117].mxu0 }
 0x1e3   : > { %v4596_v8 = vadd.f32 %v4595_v41, %v4594_v38  ;;  %v4708_v56 = vadd.f32 %v4707_v4, %v4706_v7  ;;  %v4597_v13 = vpop.f32.mrb[118].mxu1  ;;  %v4709_v15 = vpop.f32.mrb[118].mxu0 }
 0x1e4   : > { %v4598_v16 = vpop.f32.mrb[119].mxu1  ;;  %v4710_v29 = vpop.f32.mrb[119].mxu0 }
 0x1e5   : > { %v2983_v21 = vadd.f32 %v4596_v8, %v6272_v5  ;;  %v4599_v10 = vadd.f32 %v4598_v16, %v4597_v13  ;;  %v4711_v18 = vadd.f32 %v4710_v29, %v4709_v15 }
 0x1e7   : > { %v6429_v25 = vadd.f32 %v4708_v56, %v2983_v21  ;;  %v2986_v31 = vadd.f32 %v4599_v10, %v6274_v6 }
 0x1e9   : > { %v6432_v26 = vadd.f32 %v4711_v18, %v2986_v31  ;;  %v4600_v50 = vpop.f32.mrb[120].mxu1  ;;  %v4712_v55 = vpop.f32.mrb[120].mxu0 }
 0x1ea   : > { %v4601_v35 = vpop.f32.mrb[121].mxu1  ;;  %v4713_v14 = vpop.f32.mrb[121].mxu0 }
 0x1eb   : > { %v4602_v24 = vadd.f32 %v4601_v35, %v4600_v50  ;;  %v4714_v39 = vadd.f32 %v4713_v14, %v4712_v55  ;;  %v4603_v60 = vpop.f32.mrb[122].mxu1  ;;  %v4715_v52 = vpop.f32.mrb[122].mxu0 }
 0x1ec   : > { %v4604_v43 = vpop.f32.mrb[123].mxu1  ;;  %v4716_v34 = vpop.f32.mrb[123].mxu0 }
 0x1ed   : > { %v2991_v5 = vadd.f32 %v4602_v24, %v6284_v45  ;;  %v4605_v44 = vadd.f32 %v4604_v43, %v4603_v60  ;;  %v4717_v33 = vadd.f32 %v4716_v34, %v4715_v52 }
 0x1ef   : > { %v6435_v28 = vadd.f32 %v4714_v39, %v2991_v5  ;;  %v2994_v6 = vadd.f32 %v4605_v44, %v6286_v49 }
 0x1f1   : > { %v6438_v30 = vadd.f32 %v4717_v33, %v2994_v6  ;;  %v4606_v53 = vpop.f32.mrb[124].mxu1  ;;  %v4718_v48 = vpop.f32.mrb[124].mxu0 }
 0x1f2   : > { %v4607_v38 = vpop.f32.mrb[125].mxu1  ;;  %v4719_v7 = vpop.f32.mrb[125].mxu0 }
 0x1f3   : > { %v4608_v41 = vadd.f32 %v4607_v38, %v4606_v53  ;;  %v4720_v4 = vadd.f32 %v4719_v7, %v4718_v48  ;;  %v4609_v8 = vpop.f32.mrb[126].mxu1  ;;  %v4721_v56 = vpop.f32.mrb[126].mxu0 }
 0x1f4   : > { %v4610_v13 = vpop.f32.mrb[127].mxu1  ;;  %v4722_v15 = vpop.f32.mrb[127].mxu0 }
 0x1f5   : > { %v2999_v45 = vadd.f32 %v4608_v41, %v6296_v61  ;;  %v4611_v16 = vadd.f32 %v4610_v13, %v4609_v8  ;;  %v4723_v29 = vadd.f32 %v4722_v15, %v4721_v56 }
 0x1f7   : > { %v6441_v21 = vadd.f32 %v4720_v4, %v2999_v45  ;;  %v3002_v49 = vadd.f32 %v4611_v16, %v6298_v27 }
 0x1f9   : > { %v6444_v10 = vadd.f32 %v4723_v29, %v3002_v49  ;;  %v4612_v18 = vpop.f32.mrb[128].mxu1  ;;  %v4724_v31 = vpop.f32.mrb[128].mxu0 }
 0x1fa   : > { %v4613_v50 = vpop.f32.mrb[129].mxu1  ;;  %v4725_v55 = vpop.f32.mrb[129].mxu0 }
 0x1fb   : > { %v4614_v35 = vadd.f32 %v4613_v50, %v4612_v18  ;;  %v4726_v14 = vadd.f32 %v4725_v55, %v4724_v31  ;;  %v4615_v24 = vpop.f32.mrb[130].mxu1  ;;  %v4727_v39 = vpop.f32.mrb[130].mxu0 }
 0x1fc   : > { %v4616_v60 = vpop.f32.mrb[131].mxu1  ;;  %v4728_v52 = vpop.f32.mrb[131].mxu0 }
 0x1fd   : > { %v3007_v61 = vadd.f32 %v4614_v35, %v6305_v1  ;;  %v4617_v43 = vadd.f32 %v4616_v60, %v4615_v24  ;;  %v4729_v34 = vadd.f32 %v4728_v52, %v4727_v39 }
 0x1ff   : > { %v6447_v5 = vadd.f32 %v4726_v14, %v3007_v61  ;;  %v3010_v27 = vadd.f32 %v4617_v43, %v6308_v3 }
 0x201   : > { %v6450_v44 = vadd.f32 %v4729_v34, %v3010_v27  ;;  %v4618_v33 = vpop.f32.mrb[132].mxu1  ;;  %v4730_v6 = vpop.f32.mrb[132].mxu0 }
 0x202   : > { %v4619_v53 = vpop.f32.mrb[133].mxu1  ;;  %v4731_v48 = vpop.f32.mrb[133].mxu0 }
 0x203   : > { %v4620_v38 = vadd.f32 %v4619_v53, %v4618_v33  ;;  %v4732_v7 = vadd.f32 %v4731_v48, %v4730_v6  ;;  %v4621_v41 = vpop.f32.mrb[134].mxu1  ;;  %v4733_v4 = vpop.f32.mrb[134].mxu0 }
 0x204   : > { %v4622_v8 = vpop.f32.mrb[135].mxu1  ;;  %v4734_v56 = vpop.f32.mrb[135].mxu0 }
 0x205   : > { %v3015_v1 = vadd.f32 %v4620_v38, %v6315_v36  ;;  %v4623_v13 = vadd.f32 %v4622_v8, %v4621_v41  ;;  %v4735_v15 = vadd.f32 %v4734_v56, %v4733_v4 }
 0x207   : > { %v6453_v45 = vadd.f32 %v4732_v7, %v3015_v1  ;;  %v3018_v3 = vadd.f32 %v4623_v13, %v6318_v12 }
 0x209   : > { %v6456_v16 = vadd.f32 %v4735_v15, %v3018_v3  ;;  %v4624_v29 = vpop.f32.mrb[136].mxu1  ;;  %v4736_v49 = vpop.f32.mrb[136].mxu0 }
 0x20a   : > { %v4625_v18 = vpop.f32.mrb[137].mxu1  ;;  %v4737_v31 = vpop.f32.mrb[137].mxu0 }
 0x20b   : > { %v4626_v50 = vadd.f32 %v4625_v18, %v4624_v29  ;;  %v4738_v55 = vadd.f32 %v4737_v31, %v4736_v49  ;;  %v4627_v35 = vpop.f32.mrb[138].mxu1  ;;  %v4739_v14 = vpop.f32.mrb[138].mxu0 }
 0x20c   : > { %v4628_v24 = vpop.f32.mrb[139].mxu1  ;;  %v4740_v39 = vpop.f32.mrb[139].mxu0 }
 0x20d   : > { %v3023_v36 = vadd.f32 %v4626_v50, %v6325_v9  ;;  %v4629_v60 = vadd.f32 %v4628_v24, %v4627_v35  ;;  %v4741_v52 = vadd.f32 %v4740_v39, %v4739_v14 }
 0x20f   : > { %v6459_v61 = vadd.f32 %v4738_v55, %v3023_v36  ;;  %v3026_v12 = vadd.f32 %v4629_v60, %v6328_v40 }
 0x211   : > { %v6462_v43 = vadd.f32 %v4741_v52, %v3026_v12  ;;  %v4630_v34 = vpop.f32.mrb[140].mxu1  ;;  %v4742_v27 = vpop.f32.mrb[140].mxu0 }
 0x212   : > { %v4631_v33 = vpop.f32.mrb[141].mxu1  ;;  %v4743_v6 = vpop.f32.mrb[141].mxu0 }
 0x213   : > { %v4632_v53 = vadd.f32 %v4631_v33, %v4630_v34  ;;  %v4744_v48 = vadd.f32 %v4743_v6, %v4742_v27  ;;  %v4633_v38 = vpop.f32.mrb[142].mxu1  ;;  %v4745_v7 = vpop.f32.mrb[142].mxu0 }
 0x214   : > { %v4634_v41 = vpop.f32.mrb[143].mxu1  ;;  %v4746_v4 = vpop.f32.mrb[143].mxu0 }
 0x215   : > { %v3031_v9 = vadd.f32 %v4632_v53, %v6335_v0  ;;  %v4635_v8 = vadd.f32 %v4634_v41, %v4633_v38  ;;  %v4747_v56 = vadd.f32 %v4746_v4, %v4745_v7 }
 0x217   : > { %v6465_v1 = vadd.f32 %v4744_v48, %v3031_v9  ;;  %v3034_v40 = vadd.f32 %v4635_v8, %v6338_v63 }
 0x219   : > { %v6468_v13 = vadd.f32 %v4747_v56, %v3034_v40  ;;  %v4636_v15 = vpop.f32.mrb[144].mxu1  ;;  %v4748_v3 = vpop.f32.mrb[144].mxu0 }
 0x21a   : > { %v4637_v29 = vpop.f32.mrb[145].mxu1  ;;  %v4749_v49 = vpop.f32.mrb[145].mxu0 }
 0x21b   : > { %v4638_v18 = vadd.f32 %v4637_v29, %v4636_v15  ;;  %v4750_v31 = vadd.f32 %v4749_v49, %v4748_v3  ;;  %v4639_v50 = vpop.f32.mrb[146].mxu1  ;;  %v4751_v55 = vpop.f32.mrb[146].mxu0 }
 0x21c   : > { %v4640_v35 = vpop.f32.mrb[147].mxu1  ;;  %v4752_v14 = vpop.f32.mrb[147].mxu0 }
 0x21d   : > { %v3039_v0 = vadd.f32 %v4638_v18, %v6345_v22  ;;  %v4641_v24 = vadd.f32 %v4640_v35, %v4639_v50  ;;  %v4753_v39 = vadd.f32 %v4752_v14, %v4751_v55 }
 0x21f   : > { %v6471_v36 = vadd.f32 %v4750_v31, %v3039_v0  ;;  %v3042_v63 = vadd.f32 %v4641_v24, %v6348_v17 }
 0x221   : > { %v6474_v60 = vadd.f32 %v4753_v39, %v3042_v63  ;;  %v4642_v52 = vpop.f32.mrb[148].mxu1  ;;  %v4754_v12 = vpop.f32.mrb[148].mxu0 }
 0x222   : > { %v4643_v34 = vpop.f32.mrb[149].mxu1  ;;  %v4755_v27 = vpop.f32.mrb[149].mxu0 }
 0x223   : > { %v4644_v33 = vadd.f32 %v4643_v34, %v4642_v52  ;;  %v4756_v6 = vadd.f32 %v4755_v27, %v4754_v12  ;;  %v4645_v53 = vpop.f32.mrb[150].mxu1  ;;  %v4757_v48 = vpop.f32.mrb[150].mxu0 }
 0x224   : > { %v4646_v38 = vpop.f32.mrb[151].mxu1  ;;  %v4758_v7 = vpop.f32.mrb[151].mxu0 }
 0x225   : > { %v3047_v22 = vadd.f32 %v4644_v33, %v6355_v57  ;;  %v4647_v41 = vadd.f32 %v4646_v38, %v4645_v53  ;;  %v4759_v4 = vadd.f32 %v4758_v7, %v4757_v48 }
 0x227   : > { %v6477_v9 = vadd.f32 %v4756_v6, %v3047_v22  ;;  %v3050_v17 = vadd.f32 %v4647_v41, %v6358_v37 }
 0x229   : > { %v6480_v8 = vadd.f32 %v4759_v4, %v3050_v17  ;;  %v4648_v56 = vpop.f32.mrb[152].mxu1  ;;  %v4760_v40 = vpop.f32.mrb[152].mxu0 }
 0x22a   : > { %v4649_v15 = vpop.f32.mrb[153].mxu1  ;;  %v4761_v3 = vpop.f32.mrb[153].mxu0 }
 0x22b   : > { %v4650_v29 = vadd.f32 %v4649_v15, %v4648_v56  ;;  %v4762_v49 = vadd.f32 %v4761_v3, %v4760_v40  ;;  %v4651_v18 = vpop.f32.mrb[154].mxu1  ;;  %v4763_v31 = vpop.f32.mrb[154].mxu0 }
 0x22c   : > { %v4652_v50 = vpop.f32.mrb[155].mxu1  ;;  %v4764_v55 = vpop.f32.mrb[155].mxu0 }
 0x22d   : > { %v3055_v57 = vadd.f32 %v4650_v29, %v6365_v46  ;;  %v4653_v35 = vadd.f32 %v4652_v50, %v4651_v18  ;;  %v4765_v14 = vadd.f32 %v4764_v55, %v4763_v31 }
 0x22f   : > { %v6483_v0 = vadd.f32 %v4762_v49, %v3055_v57  ;;  %v3058_v37 = vadd.f32 %v4653_v35, %v6368_v59 }
 0x231   : > { %v6486_v24 = vadd.f32 %v4765_v14, %v3058_v37  ;;  %v4654_v39 = vpop.f32.mrb[156].mxu1  ;;  %v4766_v63 = vpop.f32.mrb[156].mxu0 }
 0x232   : > { %v4655_v52 = vpop.f32.mrb[157].mxu1  ;;  %v4767_v12 = vpop.f32.mrb[157].mxu0 }
 0x233   : > { %v4656_v34 = vadd.f32 %v4655_v52, %v4654_v39  ;;  %v4768_v27 = vadd.f32 %v4767_v12, %v4766_v63  ;;  %v4657_v33 = vpop.f32.mrb[158].mxu1  ;;  %v4769_v6 = vpop.f32.mrb[158].mxu0 }
 0x234   : > { %v4658_v53 = vpop.f32.mrb[159].mxu1  ;;  %v4770_v48 = vpop.f32.mrb[159].mxu0 }
 0x235   : > { %v3063_v46 = vadd.f32 %v4656_v34, %v6375_v2  ;;  %v4659_v38 = vadd.f32 %v4658_v53, %v4657_v33  ;;  %v4771_v7 = vadd.f32 %v4770_v48, %v4769_v6 }
 0x237   : > { %v6489_v22 = vadd.f32 %v4768_v27, %v3063_v46  ;;  %v3066_v59 = vadd.f32 %v4659_v38, %v6378_v19 }
 0x239   : > { %v6492_v41 = vadd.f32 %v4771_v7, %v3066_v59  ;;  %v4788_v4 = vpop.f32.mrb[160].mxu1  ;;  %v4900_v17 = vpop.f32.mrb[160].mxu0 }
 0x23a   : > { %v4789_v56 = vpop.f32.mrb[161].mxu1  ;;  %v4901_v40 = vpop.f32.mrb[161].mxu0 }
 0x23b   : > { %v4790_v15 = vadd.f32 %v4789_v56, %v4788_v4  ;;  %v4902_v3 = vadd.f32 %v4901_v40, %v4900_v17  ;;  %v4791_v29 = vpop.f32.mrb[162].mxu1  ;;  %v4903_v49 = vpop.f32.mrb[162].mxu0 }
 0x23c   : > { %v4792_v18 = vpop.f32.mrb[163].mxu1  ;;  %v4904_v31 = vpop.f32.mrb[163].mxu0 }
 0x23d   : > { %v3265_v2 = vadd.f32 %v4790_v15, %v6385_v20  ;;  %v4793_v50 = vadd.f32 %v4792_v18, %v4791_v29  ;;  %v4905_v55 = vadd.f32 %v4904_v31, %v4903_v49 }
 0x23f   : > { %v3426_v57 = vadd.f32 %v4902_v3, %v3265_v2  ;;  %v3268_v35 = vadd.f32 %v4793_v50, %v6388_v47 }
 0x241   : > { %v4178_v19 = vmul.f32 -1.442695, %v3426_v57  ;;  %v3429_v14 = vadd.f32 %v4905_v55, %v3268_v35  ;;  %v4794_v37 = vpop.f32.mrb[164].mxu1  ;;  %v4906_v39 = vpop.f32.mrb[164].mxu0 }
 0x242   : > { %v4795_v63 = vpop.f32.mrb[165].mxu1  ;;  %v4907_v52 = vpop.f32.mrb[165].mxu0 }
 0x243   : > { %5469 = vpow2.f32 %v4178_v19  ;;  %v4179_v12 = vmul.f32 -1.442695, %v3429_v14  ;;  %v4796_v34 = vadd.f32 %v4795_v63, %v4794_v37  ;;  %v4908_v27 = vadd.f32 %v4907_v52, %v4906_v39  ;;  %v4797_v33 = vpop.f32.mrb[166].mxu1  ;;  %v4909_v6 = vpop.f32.mrb[166].mxu0 }
 0x244   : > { %v4798_v53 = vpop.f32.mrb[167].mxu1  ;;  %v4910_v48 = vpop.f32.mrb[167].mxu0 }
 0x245   : > { %5471 = vpow2.f32 %v4179_v12  ;;  %v3273_v20 = vadd.f32 %v4796_v34, %v6395_v42  ;;  %v4799_v46 = vadd.f32 %v4798_v53, %v4797_v33  ;;  %v4911_v38 = vadd.f32 %v4910_v48, %v4909_v6 }
 0x247   : > { %v3434_v47 = vadd.f32 %v4908_v27, %v3273_v20  ;;  %v3276_v7 = vadd.f32 %v4799_v46, %v6398_v11 }
 0x249   : > { %v4180_v59 = vmul.f32 -1.442695, %v3434_v47  ;;  %v3437_v4 = vadd.f32 %v4911_v38, %v3276_v7  ;;  %v4800_v17 = vpop.f32.mrb[168].mxu1  ;;  %v4912_v56 = vpop.f32.mrb[168].mxu0 }
 0x24a   : > { %v4801_v40 = vpop.f32.mrb[169].mxu1  ;;  %v4913_v15 = vpop.f32.mrb[169].mxu0 }
 0x24b   : > { %5473 = vpow2.f32 %v4180_v59  ;;  %v4181_v3 = vmul.f32 -1.442695, %v3437_v4  ;;  %v4802_v29 = vadd.f32 %v4801_v40, %v4800_v17  ;;  %v4914_v49 = vadd.f32 %v4913_v15, %v4912_v56  ;;  %v4803_v18 = vpop.f32.mrb[170].mxu1  ;;  %v4915_v31 = vpop.f32.mrb[170].mxu0 }
 0x24c   : > { %v4804_v2 = vpop.f32.mrb[171].mxu1  ;;  %v4916_v50 = vpop.f32.mrb[171].mxu0 }
 0x24d   : > { %v5470_v42 = vpop.eup %5469  ;;  %5475 = vpow2.f32 %v4181_v3  ;;  %v3281_v55 = vadd.f32 %v4802_v29, %v6405_v62  ;;  %v4805_v57 = vadd.f32 %v4804_v2, %v4803_v18  ;;  %v4917_v11 = vadd.f32 %v4916_v50, %v4915_v31 }
 0x24e   : > { %v3648_v35 = vadd.f32 1.0, %v5470_v42 }
 0x24f   : > { %v5472_v19 = vpop.eup %5471  ;;  %v3442_v14 = vadd.f32 %v4914_v49, %v3281_v55  ;;  %v3284_v37 = vadd.f32 %v4805_v57, %v6408_v54 }
 0x250   : > { %5477 = vrcp.f32 %v3648_v35  ;;  %v3649_v39 = vadd.f32 1.0, %v5472_v19 }
 0x251   : > { %v4182_v63 = vmul.f32 -1.442695, %v3442_v14  ;;  %v3445_v52 = vadd.f32 %v4917_v11, %v3284_v37  ;;  %v4806_v12 = vpop.f32.mrb[172].mxu1  ;;  %v4918_v34 = vpop.f32.mrb[172].mxu0 }
 0x252   : > { %5479 = vrcp.f32 %v3649_v39  ;;  %v4807_v27 = vpop.f32.mrb[173].mxu1  ;;  %v4919_v33 = vpop.f32.mrb[173].mxu0 }
 0x253   : > { %5481 = vpow2.f32 %v4182_v63  ;;  %v4183_v6 = vmul.f32 -1.442695, %v3445_v52  ;;  %v4808_v62 = vadd.f32 %v4807_v27, %v4806_v12  ;;  %v4920_v53 = vadd.f32 %v4919_v33, %v4918_v34  ;;  %v4809_v48 = vpop.f32.mrb[174].mxu1  ;;  %v4921_v20 = vpop.f32.mrb[174].mxu0 }
 0x254   : > { %v4810_v46 = vpop.f32.mrb[175].mxu1  ;;  %v4922_v38 = vpop.f32.mrb[175].mxu0 }
 0x255   : > { %v5474_v47 = vpop.eup %5473  ;;  %5483 = vpow2.f32 %v4183_v6  ;;  %v3289_v54 = vadd.f32 %v4808_v62, %v6415_v23  ;;  %v4811_v7 = vadd.f32 %v4810_v46, %v4809_v48  ;;  %v4923_v59 = vadd.f32 %v4922_v38, %v4921_v20 }
 0x256   : > { %v3650_v4 = vadd.f32 1.0, %v5474_v47 }
 0x257   : > { %v5476_v17 = vpop.eup %5475  ;;  %v3450_v56 = vadd.f32 %v4920_v53, %v3289_v54  ;;  %v3292_v40 = vadd.f32 %v4811_v7, %v6418_v32 }
 0x258   : > { %5485 = vrcp.f32 %v3650_v4  ;;  %v3651_v15 = vadd.f32 1.0, %v5476_v17 }
 0x259   : > { %v4184_v3 = vmul.f32 -1.442695, %v3450_v56  ;;  %v3453_v29 = vadd.f32 %v4923_v59, %v3292_v40  ;;  %v4812_v49 = vpop.f32.mrb[176].mxu1  ;;  %v4924_v18 = vpop.f32.mrb[176].mxu0 }
 0x25a   : > { %v5478_v23 = vpop.eup %5477  ;;  %5487 = vrcp.f32 %v3651_v15  ;;  %v4813_v31 = vpop.f32.mrb[177].mxu1 }
 0x25b   : > { %v4925_v2 = vpop.f32.mrb[177].mxu0  ;;  %3744 = vst [vmem:[%s6506_s30] sm:$0xff] %v5478_v23  ;;  %5489 = vpow2.f32 %v4184_v3  ;;  %v4185_v32 = vmul.f32 -1.442695, %v3453_v29  ;;  %v4814_v50 = vadd.f32 %v4813_v31, %v4812_v49  ;;  %v4815_v55 = vpop.f32.mrb[178].mxu1 }
 0x25c   : > { %v4926_v42 = vadd.f32 %v4925_v2, %v4924_v18  ;;  %v4927_v57 = vpop.f32.mrb[178].mxu0  ;;  %v5480_v11 = vpop.eup %5479 }
 0x25d   : > { %v4816_v35 = vpop.f32.mrb[179].mxu1  ;;  %v4928_v19 = vpop.f32.mrb[179].mxu0  ;;  %3745 = vst [vmem:[%s6506_s30 + $0x8] sm:$0xff] %v5480_v11  ;;  %5491 = vpow2.f32 %v4185_v32  ;;  %v3297_v37 = vadd.f32 %v4814_v50, %v6423_v58 }
 0x25e   : > { %v5482_v14 = vpop.eup %5481  ;;  %v4817_v39 = vadd.f32 %v4816_v35, %v4815_v55  ;;  %v4929_v63 = vadd.f32 %v4928_v19, %v4927_v57 }
 0x25f   : > { %v3652_v52 = vadd.f32 1.0, %v5482_v14  ;;  %v5484_v12 = vpop.eup %5483  ;;  %v3458_v34 = vadd.f32 %v4926_v42, %v3297_v37 }
 0x260   : > { %v3300_v27 = vadd.f32 %v4817_v39, %v6426_v51  ;;  %v3653_v33 = vadd.f32 1.0, %v5484_v12 }
 0x261   : > { %5493 = vrcp.f32 %v3652_v52  ;;  %v4186_v6 = vmul.f32 -1.442695, %v3458_v34  ;;  %v4818_v53 = vpop.f32.mrb[180].mxu1  ;;  %v4930_v48 = vpop.f32.mrb[180].mxu0 }
 0x262   : > { %v3461_v62 = vadd.f32 %v4929_v63, %v3300_v27  ;;  %v5486_v20 = vpop.eup %5485  ;;  %5495 = vrcp.f32 %v3653_v33  ;;  %v4819_v46 = vpop.f32.mrb[181].mxu1 }
 0x263   : > { %v4931_v38 = vpop.f32.mrb[181].mxu0  ;;  %3746 = vst [vmem:[%s6506_s30 + $0x10] sm:$0xff] %v5486_v20  ;;  %5497 = vpow2.f32 %v4186_v6  ;;  %v4820_v47 = vadd.f32 %v4819_v46, %v4818_v53  ;;  %v4821_v7 = vpop.f32.mrb[182].mxu1 }
 0x264   : > { %v4187_v58 = vmul.f32 -1.442695, %v3461_v62  ;;  %v4932_v54 = vadd.f32 %v4931_v38, %v4930_v48  ;;  %v4933_v59 = vpop.f32.mrb[182].mxu0  ;;  %v5488_v4 = vpop.eup %5487 }
 0x265   : > { %v4822_v51 = vpop.f32.mrb[183].mxu1  ;;  %v4934_v17 = vpop.f32.mrb[183].mxu0  ;;  %3747 = vst [vmem:[%s6506_s30 + $0x18] sm:$0xff] %v5488_v4  ;;  %v3305_v40 = vadd.f32 %v4820_v47, %v6429_v25 }
 0x266   : > { %v5490_v56 = vpop.eup %5489  ;;  %5499 = vpow2.f32 %v4187_v58  ;;  %v4823_v15 = vadd.f32 %v4822_v51, %v4821_v7  ;;  %v4935_v3 = vadd.f32 %v4934_v17, %v4933_v59 }
 0x267   : > { %v3654_v29 = vadd.f32 1.0, %v5490_v56  ;;  %v5492_v49 = vpop.eup %5491  ;;  %v3466_v18 = vadd.f32 %v4932_v54, %v3305_v40 }
 0x268   : > { %v3308_v23 = vadd.f32 %v4823_v15, %v6432_v26  ;;  %v3655_v31 = vadd.f32 1.0, %v5492_v49 }
 0x269   : > { %5501 = vrcp.f32 %v3654_v29  ;;  %v4188_v2 = vmul.f32 -1.442695, %v3466_v18  ;;  %v4824_v50 = vpop.f32.mrb[184].mxu1  ;;  %v4936_v42 = vpop.f32.mrb[184].mxu0 }
 0x26a   : > { %v3469_v32 = vadd.f32 %v4935_v3, %v3308_v23  ;;  %5503 = vrcp.f32 %v3655_v31  ;;  %v4825_v57 = vpop.f32.mrb[185].mxu1  ;;  %v4937_v11 = vpop.f32.mrb[185].mxu0 }
 0x26b   : > { %v5494_v55 = vpop.eup %5493  ;;  %5505 = vpow2.f32 %v4188_v2  ;;  %v4826_v35 = vadd.f32 %v4825_v57, %v4824_v50  ;;  %v4938_v19 = vadd.f32 %v4937_v11, %v4936_v42  ;;  %v4827_v14 = vpop.f32.mrb[186].mxu1 }
 0x26c   : > { %3748 = vst [vmem:[%s6506_s30 + $0x20] sm:$0xff] %v5494_v55  ;;  %v4189_v25 = vmul.f32 -1.442695, %v3469_v32  ;;  %v4939_v37 = vpop.f32.mrb[186].mxu0  ;;  %v5496_v39 = vpop.eup %5495 }
 0x26d   : > { %v4828_v26 = vpop.f32.mrb[187].mxu1  ;;  %v4940_v63 = vpop.f32.mrb[187].mxu0  ;;  %3749 = vst [vmem:[%s6506_s30 + $0x28] sm:$0xff] %v5496_v39  ;;  %v3313_v12 = vadd.f32 %v4826_v35, %v6435_v28 }
 0x26e   : > { %v5498_v52 = vpop.eup %5497  ;;  %5507 = vpow2.f32 %v4189_v25  ;;  %v4829_v34 = vadd.f32 %v4828_v26, %v4827_v14  ;;  %v4941_v27 = vadd.f32 %v4940_v63, %v4939_v37 }
 0x26f   : > { %v3656_v33 = vadd.f32 1.0, %v5498_v52  ;;  %v3474_v62 = vadd.f32 %v4938_v19, %v3313_v12 }
 0x270   : > { %v5500_v6 = vpop.eup %5499  ;;  %v3316_v53 = vadd.f32 %v4829_v34, %v6438_v30 }
 0x271   : > { %5509 = vrcp.f32 %v3656_v33  ;;  %v3657_v48 = vadd.f32 1.0, %v5500_v6  ;;  %v4190_v20 = vmul.f32 -1.442695, %v3474_v62  ;;  %v4830_v38 = vpop.f32.mrb[188].mxu1  ;;  %v4942_v58 = vpop.f32.mrb[188].mxu0 }
 0x272   : > { %v3477_v46 = vadd.f32 %v4941_v27, %v3316_v53  ;;  %v4831_v54 = vpop.f32.mrb[189].mxu1  ;;  %v4943_v7 = vpop.f32.mrb[189].mxu0 }
 0x273   : > { %v5502_v47 = vpop.eup %5501  ;;  %5511 = vrcp.f32 %v3657_v48  ;;  %v4832_v59 = vadd.f32 %v4831_v54, %v4830_v38  ;;  %v4944_v4 = vadd.f32 %v4943_v7, %v4942_v58  ;;  %v4833_v51 = vpop.f32.mrb[190].mxu1 }
 0x274   : > { %3750 = vst [vmem:[%s6506_s30 + $0x30] sm:$0xff] %v5502_v47  ;;  %5513 = vpow2.f32 %v4190_v20  ;;  %v4191_v28 = vmul.f32 -1.442695, %v3477_v46  ;;  %v4945_v17 = vpop.f32.mrb[190].mxu0  ;;  %v5504_v56 = vpop.eup %5503 }
 0x275   : > { %v4834_v30 = vpop.f32.mrb[191].mxu1  ;;  %v4946_v40 = vpop.f32.mrb[191].mxu0  ;;  %3751 = vst [vmem:[%s6506_s30 + $0x38] sm:$0xff] %v5504_v56  ;;  %v3321_v3 = vadd.f32 %v4832_v59, %v6441_v21 }
 0x276   : > { %v5506_v15 = vpop.eup %5505  ;;  %5515 = vpow2.f32 %v4191_v28  ;;  %v4835_v29 = vadd.f32 %v4834_v30, %v4833_v51  ;;  %v4947_v49 = vadd.f32 %v4946_v40, %v4945_v17 }
 0x277   : > { %v3658_v18 = vadd.f32 1.0, %v5506_v15  ;;  %v3482_v31 = vadd.f32 %v4944_v4, %v3321_v3 }
 0x278   : > { %v5508_v23 = vpop.eup %5507  ;;  %v3324_v2 = vadd.f32 %v4835_v29, %v6444_v10 }
 0x279   : > { %5517 = vrcp.f32 %v3658_v18  ;;  %v3659_v32 = vadd.f32 1.0, %v5508_v23  ;;  %v4192_v50 = vmul.f32 -1.442695, %v3482_v31  ;;  %v4836_v55 = vpop.f32.mrb[192].mxu1  ;;  %v4948_v57 = vpop.f32.mrb[192].mxu0 }
 0x27a   : > { %v3485_v42 = vadd.f32 %v4947_v49, %v3324_v2  ;;  %v4837_v25 = vpop.f32.mrb[193].mxu1  ;;  %v4949_v35 = vpop.f32.mrb[193].mxu0 }
 0x27b   : > { %v5510_v11 = vpop.eup %5509  ;;  %5519 = vrcp.f32 %v3659_v32  ;;  %v4838_v19 = vadd.f32 %v4837_v25, %v4836_v55  ;;  %v4950_v14 = vadd.f32 %v4949_v35, %v4948_v57  ;;  %v4839_v37 = vpop.f32.mrb[194].mxu1 }
 0x27c   : > { %3752 = vst [vmem:[%s6506_s30 + $0x40] sm:$0xff] %v5510_v11  ;;  %5521 = vpow2.f32 %v4192_v50  ;;  %v4193_v21 = vmul.f32 -1.442695, %v3485_v42  ;;  %v4951_v39 = vpop.f32.mrb[194].mxu0  ;;  %v4840_v10 = vpop.f32.mrb[195].mxu1 }
 0x27d   : > { %v5512_v26 = vpop.eup %5511  ;;  %v4952_v63 = vpop.f32.mrb[195].mxu0  ;;  %v3329_v12 = vadd.f32 %v4838_v19, %v6447_v5  ;;  %v4841_v34 = vadd.f32 %v4840_v10, %v4839_v37 }
 0x27e   : > { %v5514_v52 = vpop.eup %5513  ;;  %3753 = vst [vmem:[%s6506_s30 + $0x48] sm:$0xff] %v5512_v26  ;;  %5523 = vpow2.f32 %v4193_v21  ;;  %v4953_v27 = vadd.f32 %v4952_v63, %v4951_v39 }
 0x27f   : > { %v3660_v33 = vadd.f32 1.0, %v5514_v52  ;;  %v3490_v62 = vadd.f32 %v4950_v14, %v3329_v12  ;;  %v3332_v53 = vadd.f32 %v4841_v34, %v6450_v44 }
 0x280   : > { %v5516_v6 = vpop.eup %5515 }
 0x281   : > { %5525 = vrcp.f32 %v3660_v33  ;;  %v3661_v48 = vadd.f32 1.0, %v5516_v6  ;;  %v4194_v20 = vmul.f32 -1.442695, %v3490_v62  ;;  %v3493_v46 = vadd.f32 %v4953_v27, %v3332_v53  ;;  %v4842_v38 = vpop.f32.mrb[196].mxu1  ;;  %v4954_v58 = vpop.f32.mrb[196].mxu0 }
 0x282   : > { %v4843_v54 = vpop.f32.mrb[197].mxu1  ;;  %v4955_v7 = vpop.f32.mrb[197].mxu0 }
 0x283   : > { %v5518_v47 = vpop.eup %5517  ;;  %5527 = vrcp.f32 %v3661_v48  ;;  %v4195_v5 = vmul.f32 -1.442695, %v3493_v46  ;;  %v4844_v28 = vadd.f32 %v4843_v54, %v4842_v38  ;;  %v4956_v59 = vadd.f32 %v4955_v7, %v4954_v58  ;;  %v4845_v4 = vpop.f32.mrb[198].mxu1 }
 0x284   : > { %3754 = vst [vmem:[%s6506_s30 + $0x50] sm:$0xff] %v5518_v47  ;;  %5529 = vpow2.f32 %v4194_v20  ;;  %v4957_v51 = vpop.f32.mrb[198].mxu0  ;;  %v4846_v44 = vpop.f32.mrb[199].mxu1 }
 0x285   : > { %v5520_v17 = vpop.eup %5519  ;;  %v4958_v56 = vpop.f32.mrb[199].mxu0  ;;  %5531 = vpow2.f32 %v4195_v5  ;;  %v3337_v40 = vadd.f32 %v4844_v28, %v6453_v45  ;;  %v4847_v15 = vadd.f32 %v4846_v44, %v4845_v4 }
 0x286   : > { %v5522_v30 = vpop.eup %5521  ;;  %3755 = vst [vmem:[%s6506_s30 + $0x58] sm:$0xff] %v5520_v17  ;;  %v4959_v3 = vadd.f32 %v4958_v56, %v4957_v51 }
 0x287   : > { %v3662_v29 = vadd.f32 1.0, %v5522_v30  ;;  %v3498_v18 = vadd.f32 %v4956_v59, %v3337_v40  ;;  %v3340_v23 = vadd.f32 %v4847_v15, %v6456_v16 }
 0x288   : > { %v5524_v49 = vpop.eup %5523 }
 0x289   : > { %5533 = vrcp.f32 %v3662_v29  ;;  %v3663_v31 = vadd.f32 1.0, %v5524_v49  ;;  %v4196_v2 = vmul.f32 -1.442695, %v3498_v18  ;;  %v3501_v32 = vadd.f32 %v4959_v3, %v3340_v23  ;;  %v4848_v50 = vpop.f32.mrb[200].mxu1  ;;  %v4960_v42 = vpop.f32.mrb[200].mxu0 }
 0x28a   : > { %v4849_v57 = vpop.f32.mrb[201].mxu1  ;;  %v4961_v11 = vpop.f32.mrb[201].mxu0 }
 0x28b   : > { %v5526_v55 = vpop.eup %5525  ;;  %5535 = vrcp.f32 %v3663_v31  ;;  %v4197_v45 = vmul.f32 -1.442695, %v3501_v32  ;;  %v4850_v25 = vadd.f32 %v4849_v57, %v4848_v50  ;;  %v4962_v35 = vadd.f32 %v4961_v11, %v4960_v42  ;;  %v4851_v21 = vpop.f32.mrb[202].mxu1 }
 0x28c   : > { %3756 = vst [vmem:[%s6506_s30 + $0x60] sm:$0xff] %v5526_v55  ;;  %5537 = vpow2.f32 %v4196_v2  ;;  %v4963_v19 = vpop.f32.mrb[202].mxu0  ;;  %v4852_v16 = vpop.f32.mrb[203].mxu1 }
 0x28d   : > { %v5528_v14 = vpop.eup %5527  ;;  %v4964_v37 = vpop.f32.mrb[203].mxu0  ;;  %5539 = vpow2.f32 %v4197_v45  ;;  %v3345_v26 = vadd.f32 %v4850_v25, %v6459_v61  ;;  %v4853_v10 = vadd.f32 %v4852_v16, %v4851_v21 }
 0x28e   : > { %v5530_v39 = vpop.eup %5529  ;;  %3757 = vst [vmem:[%s6506_s30 + $0x68] sm:$0xff] %v5528_v14  ;;  %v4965_v63 = vadd.f32 %v4964_v37, %v4963_v19 }
 0x28f   : > { %v3664_v52 = vadd.f32 1.0, %v5530_v39  ;;  %v5532_v12 = vpop.eup %5531  ;;  %v3506_v34 = vadd.f32 %v4962_v35, %v3345_v26  ;;  %v3348_v27 = vadd.f32 %v4853_v10, %v6462_v43 }
 0x290   : > { %v3665_v33 = vadd.f32 1.0, %v5532_v12 }
 0x291   : > { %5541 = vrcp.f32 %v3664_v52  ;;  %v4198_v6 = vmul.f32 -1.442695, %v3506_v34  ;;  %v3509_v62 = vadd.f32 %v4965_v63, %v3348_v27  ;;  %v4854_v53 = vpop.f32.mrb[204].mxu1  ;;  %v4966_v48 = vpop.f32.mrb[204].mxu0 }
 0x292   : > { %5543 = vrcp.f32 %v3665_v33  ;;  %v4855_v46 = vpop.f32.mrb[205].mxu1  ;;  %v4967_v38 = vpop.f32.mrb[205].mxu0 }
 0x293   : > { %v5534_v20 = vpop.eup %5533  ;;  %5545 = vpow2.f32 %v4198_v6  ;;  %v4199_v61 = vmul.f32 -1.442695, %v3509_v62  ;;  %v4856_v58 = vadd.f32 %v4855_v46, %v4854_v53  ;;  %v4968_v47 = vadd.f32 %v4967_v38, %v4966_v48  ;;  %v4857_v54 = vpop.f32.mrb[206].mxu1 }
 0x294   : > { %3758 = vst [vmem:[%s6506_s30 + $0x70] sm:$0xff] %v5534_v20  ;;  %v4969_v7 = vpop.f32.mrb[206].mxu0  ;;  %v4858_v43 = vpop.f32.mrb[207].mxu1 }
 0x295   : > { %v5536_v5 = vpop.eup %5535  ;;  %v4970_v28 = vpop.f32.mrb[207].mxu0  ;;  %5547 = vpow2.f32 %v4199_v61  ;;  %v3353_v4 = vadd.f32 %v4856_v58, %v6465_v1  ;;  %v4859_v51 = vadd.f32 %v4858_v43, %v4857_v54 }
 0x296   : > { %v5538_v59 = vpop.eup %5537  ;;  %3759 = vst [vmem:[%s6506_s30 + $0x78] sm:$0xff] %v5536_v5  ;;  %v4971_v17 = vadd.f32 %v4970_v28, %v4969_v7 }
 0x297   : > { %v3666_v44 = vadd.f32 1.0, %v5538_v59  ;;  %v5540_v56 = vpop.eup %5539  ;;  %v3514_v30 = vadd.f32 %v4968_v47, %v3353_v4  ;;  %v3356_v40 = vadd.f32 %v4859_v51, %v6468_v13 }
 0x298   : > { %v3667_v15 = vadd.f32 1.0, %v5540_v56 }
 0x299   : > { %5549 = vrcp.f32 %v3666_v44  ;;  %v4200_v3 = vmul.f32 -1.442695, %v3514_v30  ;;  %v3517_v29 = vadd.f32 %v4971_v17, %v3356_v40  ;;  %v4860_v49 = vpop.f32.mrb[208].mxu1  ;;  %v4972_v18 = vpop.f32.mrb[208].mxu0 }
 0x29a   : > { %5551 = vrcp.f32 %v3667_v15  ;;  %v4861_v31 = vpop.f32.mrb[209].mxu1  ;;  %v4973_v2 = vpop.f32.mrb[209].mxu0 }
 0x29b   : > { %v5542_v23 = vpop.eup %5541  ;;  %5553 = vpow2.f32 %v4200_v3  ;;  %v4201_v1 = vmul.f32 -1.442695, %v3517_v29  ;;  %v4862_v32 = vadd.f32 %v4861_v31, %v4860_v49  ;;  %v4974_v50 = vadd.f32 %v4973_v2, %v4972_v18  ;;  %v4863_v42 = vpop.f32.mrb[210].mxu1 }
 0x29c   : > { %3760 = vst [vmem:[%s6506_s30 + $0x80] sm:$0xff] %v5542_v23  ;;  %v4975_v55 = vpop.f32.mrb[210].mxu0  ;;  %v5544_v57 = vpop.eup %5543 }
 0x29d   : > { %v4864_v13 = vpop.f32.mrb[211].mxu1  ;;  %v4976_v11 = vpop.f32.mrb[211].mxu0  ;;  %3761 = vst [vmem:[%s6506_s30 + $0x88] sm:$0xff] %v5544_v57  ;;  %5555 = vpow2.f32 %v4201_v1  ;;  %v3361_v25 = vadd.f32 %v4862_v32, %v6471_v36 }
 0x29e   : > { %v5546_v45 = vpop.eup %5545  ;;  %v4865_v35 = vadd.f32 %v4864_v13, %v4863_v42  ;;  %v4977_v21 = vadd.f32 %v4976_v11, %v4975_v55 }
 0x29f   : > { %v3668_v19 = vadd.f32 1.0, %v5546_v45  ;;  %v5548_v14 = vpop.eup %5547  ;;  %v3522_v16 = vadd.f32 %v4974_v50, %v3361_v25 }
 0x2a0   : > { %v3364_v37 = vadd.f32 %v4865_v35, %v6474_v60  ;;  %v3669_v39 = vadd.f32 1.0, %v5548_v14 }
 0x2a1   : > { %5557 = vrcp.f32 %v3668_v19  ;;  %v4202_v26 = vmul.f32 -1.442695, %v3522_v16  ;;  %v4866_v63 = vpop.f32.mrb[212].mxu1  ;;  %v4978_v52 = vpop.f32.mrb[212].mxu0 }
 0x2a2   : > { %v3525_v10 = vadd.f32 %v4977_v21, %v3364_v37  ;;  %5559 = vrcp.f32 %v3669_v39  ;;  %v4867_v34 = vpop.f32.mrb[213].mxu1  ;;  %v4979_v27 = vpop.f32.mrb[213].mxu0 }
 0x2a3   : > { %v5550_v12 = vpop.eup %5549  ;;  %5561 = vpow2.f32 %v4202_v26  ;;  %v4868_v33 = vadd.f32 %v4867_v34, %v4866_v63  ;;  %v4980_v6 = vadd.f32 %v4979_v27, %v4978_v52  ;;  %v4869_v62 = vpop.f32.mrb[214].mxu1 }
 0x2a4   : > { %3762 = vst [vmem:[%s6506_s30 + $0x90] sm:$0xff] %v5550_v12  ;;  %v4203_v36 = vmul.f32 -1.442695, %v3525_v10  ;;  %v4981_v53 = vpop.f32.mrb[214].mxu0  ;;  %v5552_v48 = vpop.eup %5551 }
 0x2a5   : > { %v4870_v60 = vpop.f32.mrb[215].mxu1  ;;  %v4982_v20 = vpop.f32.mrb[215].mxu0  ;;  %3763 = vst [vmem:[%s6506_s30 + $0x98] sm:$0xff] %v5552_v48  ;;  %v3369_v38 = vadd.f32 %v4868_v33, %v6477_v9 }
 0x2a6   : > { %v5554_v46 = vpop.eup %5553  ;;  %5563 = vpow2.f32 %v4203_v36  ;;  %v4871_v61 = vadd.f32 %v4870_v60, %v4869_v62  ;;  %v4983_v58 = vadd.f32 %v4982_v20, %v4981_v53 }
 0x2a7   : > { %v3670_v47 = vadd.f32 1.0, %v5554_v46  ;;  %v5556_v54 = vpop.eup %5555  ;;  %v3530_v7 = vadd.f32 %v4980_v6, %v3369_v38 }
 0x2a8   : > { %v3372_v5 = vadd.f32 %v4871_v61, %v6480_v8  ;;  %v3671_v43 = vadd.f32 1.0, %v5556_v54 }
 0x2a9   : > { %5565 = vrcp.f32 %v3670_v47  ;;  %v4204_v28 = vmul.f32 -1.442695, %v3530_v7  ;;  %v4872_v4 = vpop.f32.mrb[216].mxu1  ;;  %v4984_v51 = vpop.f32.mrb[216].mxu0 }
 0x2aa   : > { %v3533_v59 = vadd.f32 %v4983_v58, %v3372_v5  ;;  %5567 = vrcp.f32 %v3671_v43  ;;  %v4873_v44 = vpop.f32.mrb[217].mxu1  ;;  %v4985_v56 = vpop.f32.mrb[217].mxu0 }
 0x2ab   : > { %v5558_v17 = vpop.eup %5557  ;;  %5569 = vpow2.f32 %v4204_v28  ;;  %v4874_v30 = vadd.f32 %v4873_v44, %v4872_v4  ;;  %v4986_v40 = vadd.f32 %v4985_v56, %v4984_v51  ;;  %v4875_v15 = vpop.f32.mrb[218].mxu1 }
 0x2ac   : > { %3764 = vst [vmem:[%s6506_s30 + $0xa0] sm:$0xff] %v5558_v17  ;;  %v4205_v9 = vmul.f32 -1.442695, %v3533_v59  ;;  %v4987_v3 = vpop.f32.mrb[218].mxu0  ;;  %v5560_v29 = vpop.eup %5559 }
 0x2ad   : > { %v4876_v8 = vpop.f32.mrb[219].mxu1  ;;  %v4988_v49 = vpop.f32.mrb[219].mxu0  ;;  %3765 = vst [vmem:[%s6506_s30 + $0xa8] sm:$0xff] %v5560_v29  ;;  %v3377_v23 = vadd.f32 %v4874_v30, %v6483_v0 }
 0x2ae   : > { %v5562_v18 = vpop.eup %5561  ;;  %5571 = vpow2.f32 %v4205_v9  ;;  %v4877_v31 = vadd.f32 %v4876_v8, %v4875_v15  ;;  %v4989_v2 = vadd.f32 %v4988_v49, %v4987_v3 }
 0x2af   : > { %v3672_v1 = vadd.f32 1.0, %v5562_v18  ;;  %v3538_v50 = vadd.f32 %v4986_v40, %v3377_v23 }
 0x2b0   : > { %v5564_v32 = vpop.eup %5563  ;;  %v3380_v42 = vadd.f32 %v4877_v31, %v6486_v24 }
 0x2b1   : > { %5573 = vrcp.f32 %v3672_v1  ;;  %v3673_v55 = vadd.f32 1.0, %v5564_v32  ;;  %v4206_v57 = vmul.f32 -1.442695, %v3538_v50  ;;  %v4878_v11 = vpop.f32.mrb[220].mxu1  ;;  %v4990_v45 = vpop.f32.mrb[220].mxu0 }
 0x2b2   : > { %v3541_v13 = vadd.f32 %v4989_v2, %v3380_v42  ;;  %v4879_v35 = vpop.f32.mrb[221].mxu1  ;;  %v4991_v21 = vpop.f32.mrb[221].mxu0 }
 0x2b3   : > { %v5566_v25 = vpop.eup %5565  ;;  %5575 = vrcp.f32 %v3673_v55  ;;  %v4880_v19 = vadd.f32 %v4879_v35, %v4878_v11  ;;  %v4992_v14 = vadd.f32 %v4991_v21, %v4990_v45  ;;  %v4881_v16 = vpop.f32.mrb[222].mxu1 }
 0x2b4   : > { %3766 = vst [vmem:[%s6506_s30 + $0xb0] sm:$0xff] %v5566_v25  ;;  %5577 = vpow2.f32 %v4206_v57  ;;  %v4207_v0 = vmul.f32 -1.442695, %v3541_v13  ;;  %v4993_v37 = vpop.f32.mrb[222].mxu0  ;;  %v5568_v39 = vpop.eup %5567 }
 0x2b5   : > { %v4882_v24 = vpop.f32.mrb[223].mxu1  ;;  %v4994_v26 = vpop.f32.mrb[223].mxu0  ;;  %3767 = vst [vmem:[%s6506_s30 + $0xb8] sm:$0xff] %v5568_v39  ;;  %v3385_v63 = vadd.f32 %v4880_v19, %v6489_v22 }
 0x2b6   : > { %v5570_v10 = vpop.eup %5569  ;;  %5579 = vpow2.f32 %v4207_v0  ;;  %v4883_v52 = vadd.f32 %v4882_v24, %v4881_v16  ;;  %v4995_v12 = vadd.f32 %v4994_v26, %v4993_v37 }
 0x2b7   : > { %v3674_v34 = vadd.f32 1.0, %v5570_v10  ;;  %v3546_v36 = vadd.f32 %v4992_v14, %v3385_v63 }
 0x2b8   : > { %v5572_v27 = vpop.eup %5571  ;;  %v3388_v33 = vadd.f32 %v4883_v52, %v6492_v41 }
 0x2b9   : > { %5581 = vrcp.f32 %v3674_v34  ;;  %v3675_v6 = vadd.f32 1.0, %v5572_v27  ;;  %v4208_v62 = vmul.f32 -1.442695, %v3546_v36 }
 0x2ba   : > { %v3549_v53 = vadd.f32 %v4995_v12, %v3388_v33 }
 0x2bb   : > { %v5574_v48 = vpop.eup %5573  ;;  %5583 = vrcp.f32 %v3675_v6 }
 0x2bc   : > { %3768 = vst [vmem:[%s6506_s30 + $0xc0] sm:$0xff] %v5574_v48  ;;  %5585 = vpow2.f32 %v4208_v62  ;;  %v4209_v60 = vmul.f32 -1.442695, %v3549_v53 }
 0x2bd   : > { %v5576_v22 = vpop.eup %5575 }
 0x2be   : > { %v5578_v20 = vpop.eup %5577  ;;  %3769 = vst [vmem:[%s6506_s30 + $0xc8] sm:$0xff] %v5576_v22  ;;  %5587 = vpow2.f32 %v4209_v60 }
 0x2bf   : > { %v3676_v46 = vadd.f32 1.0, %v5578_v20 }
 0x2c0   : > { %v5580_v38 = vpop.eup %5579 }
 0x2c1   : > { %5589 = vrcp.f32 %v3676_v46  ;;  %v3677_v41 = vadd.f32 1.0, %v5580_v38 }
 0x2c3   : > { %v5582_v61 = vpop.eup %5581  ;;  %5591 = vrcp.f32 %v3677_v41 }
 0x2c4   : > { %3770 = vst [vmem:[%s6506_s30 + $0xd0] sm:$0xff] %v5582_v61 }
 0x2c5   : > { %v5584_v58 = vpop.eup %5583 }
 0x2c6   : > { %v5586_v47 = vpop.eup %5585  ;;  %3771 = vst [vmem:[%s6506_s30 + $0xd8] sm:$0xff] %v5584_v58 }
 0x2c7   : > { %v3678_v54 = vadd.f32 1.0, %v5586_v47 }
 0x2c8   : > { %v5588_v7 = vpop.eup %5587 }
 0x2c9   : > { %5593 = vrcp.f32 %v3678_v54  ;;  %v3679_v5 = vadd.f32 1.0, %v5588_v7 }
 0x2cb   : > { %v5590_v43 = vpop.eup %5589  ;;  %5595 = vrcp.f32 %v3679_v5 }
 0x2cc   : > { %3772 = vst [vmem:[%s6506_s30 + $0xe0] sm:$0xff] %v5590_v43 }
 0x2cd   : > { %v5592_v28 = vpop.eup %5591 }
 0x2ce   : > { %3773 = vst [vmem:[%s6506_s30 + $0xe8] sm:$0xff] %v5592_v28 }
 0x2d3   : > { %v5594_v59 = vpop.eup %5593 }
 0x2d4   : > { %3774 = vst [vmem:[%s6506_s30 + $0xf0] sm:$0xff] %v5594_v59 }
 0x2d5   : > { %v5596_v4 = vpop.eup %5595 }
 0x2d6   : > { %3775 = vst [vmem:[%s6506_s30 + $0xf8] sm:$0xff] %v5596_v4 }
 0x2d7 PF: > { %s13_s12 = sadd.s32 1, %s5603_s12  }
 0x2d8   : > { %p10_p4 = scmp.ge.s32.totalorder %s13_s12, 4  }
 0x2da   :  { %12 = sbr.rel (!%p10_p4) target bundleno = 1 (0x1), region = 62 }

</bundles_post_ra>
